<compile_context>
chip_gen: v7x
topology: tpu7x:2x2x1
jax: 0.10.0
libtpu: 0.0.40
codegen_flags: <defaults>
</compile_context>

<pallas_src>
import functools

import numpy as np
import jax
import jax.numpy as jnp
from jax import lax
from jax.experimental import pallas as pl
from jax.experimental.pallas import tpu as pltpu


def _round_up(x, m):
    return (x + m - 1) // m * m


def _pick_batch_tile(n, c_sub, w_elem, k, lw):
    """Largest batch tile that keeps >=2 grid steps (megacore) and stays under
    a conservative VMEM budget (safe for the 16/32 MiB default scoped limits
    and v7x's smaller physical VMEM)."""
    # 2 f32 ping-pong buffers + f32 dot-result temp + bf16 tap stack
    # + double-buffered input block, per batch element.
    per_elem = c_sub * w_elem * (3 * 4 + k * 2) + 2 * c_sub * lw * 4
    budget = 12 * 1024 * 1024
    max_bt = max(1, budget // per_elem)
    bt = min(max_bt, max(1, (n + 1) // 2))
    return max(1, min(bt, n))


# ----------------------------------------------------------------------------
# Fused kernel: all TemporalBlocks + final Linear for B_TILE batch elements.
# ----------------------------------------------------------------------------
def _fused_tcn_kernel(x_ref, w_ref, b_ref, mask_ref, lin_w_ref, lin_b_ref,
                      out_ref, buf_a, buf_b, stk_ref,
                      *, dilations, K, C_sub, B_TILE, LPAD, W_elem, Lw):
    """Refs:
         x_ref     (B_TILE, C_sub, Lw)        pre-padded input tile
         w_ref     (n_layers*C_sub, K*C_sub)  bf16, BN + residual folded
         b_ref     (n_layers*C_sub, 1)        f32 folded biases
         mask_ref  (1, B_TILE*W_elem)         0 in causal-pad lanes, 1 else
         lin_w_ref (1, B_TILE*W_elem)         Linear(L,1) weight per segment
         lin_b_ref (1, 1)
         out_ref   (1, C_sub, B_TILE)
         buf_a/b   VMEM (C_sub, B_TILE*W_elem) f32 ping-pong activations
         stk_ref   VMEM (K*C_sub, B_TILE*W_elem) bf16 persistent tap stack
    """
    n_layers = len(dilations)
    mask = mask_ref[...]                                  # (1, W_total)

    # Stage the input: per element, zero its causal-pad lanes and place the
    # (channel/length pre-padded) input at lane offset LPAD.  Both stores are
    # full-tile aligned.  The pad lanes are re-zeroed every grid step (not
    # gated on program_id == 0): on megacore parts a "parallel" grid axis is
    # split across cores, so program 0 only runs on one of them.
    for b in range(B_TILE):
        base = b * W_elem
        buf_a[:, base:base + LPAD] = jnp.zeros((C_sub, LPAD), jnp.float32)
        buf_a[:, base + LPAD:base + LPAD + Lw] = x_ref[b]

    bufs = (buf_a, buf_b)
    for i, d in enumerate(dilations):
        src = bufs[i % 2]
        dst = bufs[(i + 1) % 2]

        # Tap stack: roll the whole batched buffer right by (K-1-k)*d on the
        # XLU and stage it (bf16) into the persistent stack scratch.  Lane
        # wrap-around / cross-element bleed only ever lands in causal-pad
        # lanes, which the mask below forces back to zero.
        for k in range(K):
            shift = (K - 1 - k) * d                       # <= max_pad <= LPAD
            v = src[...]
            if shift:
                v = pltpu.roll(v, shift=shift, axis=1)
            stk_ref[k * C_sub:(k + 1) * C_sub, :] = v.astype(stk_ref.dtype)

        # Dilated causal conv + chomp + bias + BN + residual / 1x1 downsample
        # as a single bf16 MXU dot with f32 accumulation (BN & residual are
        # folded into w_ref / b_ref at trace time; dropout = identity in eval).
        w_i = w_ref[i * C_sub:(i + 1) * C_sub, :]         # (C_sub, K*C_sub) bf16
        b_i = b_ref[i * C_sub:(i + 1) * C_sub, :]         # (C_sub, 1)       f32
        y = jnp.dot(w_i, stk_ref[...], preferred_element_type=jnp.float32)
        dst[...] = jnp.maximum(y + b_i, 0.0) * mask       # ReLU, pad lanes -> 0

    # Final nn.Linear(L, 1) over time: VPU multiply against the per-element
    # zero-padded Linear weight (zeros beyond L kill any stale tail lanes),
    # then one lane reduction per element; single lane-dense (C_sub, B_TILE)
    # store per grid step.
    feat = bufs[n_layers % 2][...]                        # (C_sub, W_total)
    prod = feat * lin_w_ref[...]
    cols = [jnp.sum(prod[:, b * W_elem:(b + 1) * W_elem], axis=-1, keepdims=True)
            for b in range(B_TILE)]
    out_ref[0] = jnp.concatenate(cols, axis=-1) + lin_b_ref[...]


# ----------------------------------------------------------------------------
# Wrapper: fold BN / residual into the weights, pack operands, launch one call.
# ----------------------------------------------------------------------------
def tcn_forward(x, params, *, kernel_size, b_tile=None):
    """x: (N, C_in, L) float32 -> (N, C_last, 1) float32 (eval-mode TCN)."""
    N, c_in0, L = x.shape
    K = kernel_size
    eps = 1e-5
    n_layers = len(params["blocks"])

    chans = [c_in0] + [blk["w"].shape[0] for blk in params["blocks"]]
    c_last = chans[-1]
    C_sub = _round_up(max(chans), 16)          # 16: bf16 row slices tile-aligned
    Lw = _round_up(L, 128)                     # lane-dense working length
    max_pad = (K - 1) * (2 ** (n_layers - 1))
    LPAD = _round_up(max_pad, 128)             # lane-aligned causal-pad region
    W_elem = LPAD + Lw                         # per-element lane span

    if b_tile is None:
        b_tile = _pick_batch_tile(N, C_sub, W_elem, K, Lw)
    num_steps = pl.cdiv(N, b_tile)
    N_pad = num_steps * b_tile
    W_total = b_tile * W_elem

    # Input pre-padded to (N_pad, C_sub, Lw): the in-kernel placement is then a
    # full-tile unmasked store and padded channel rows / tail lanes are zero.
    x_pad = jnp.zeros((N_pad, C_sub, Lw), jnp.float32)
    x_pad = x_pad.at[:N, :c_in0, :L].set(x.astype(jnp.float32))

    # Fold eval-mode BatchNorm1d and the residual path into each layer's conv
    # weight/bias; pad to C_sub rows/cols (zero rows -> relu(0)=0 keeps padded
    # channel rows zero); pack all layers into single operands.
    w_blocks, b_blocks, dilations = [], [], []
    for i, blk in enumerate(params["blocks"]):
        c_in, c_out = chans[i], chans[i + 1]
        d = 2 ** i
        scale = blk["bn_gamma"] / jnp.sqrt(blk["bn_var"] + eps)         # (c_out,)
        w_f = blk["w"].astype(jnp.float32) * scale[:, None, None]       # (c_out,c_in,K)
        b_total = (blk["b"] - blk["bn_mean"]) * scale + blk["bn_beta"]
        # Residual folded into the last tap (that tap reads x[:, t]):
        if blk["w_ds"] is not None:
            res_w = blk["w_ds"].reshape(c_out, c_in).astype(jnp.float32)
            b_total = b_total + blk["b_ds"]
        else:
            res_w = jnp.eye(c_out, dtype=jnp.float32)                   # c_in == c_out
        w_taps = jnp.transpose(w_f, (0, 2, 1))                          # (c_out, K, c_in)
        w_taps = w_taps.at[:, K - 1, :].add(res_w)
        w_pad = jnp.zeros((C_sub, K, C_sub), jnp.float32)
        w_pad = w_pad.at[:c_out, :, :c_in].set(w_taps)
        w_blocks.append(w_pad.reshape(C_sub, K * C_sub))
        b_pad = jnp.zeros((C_sub, 1), jnp.float32).at[:c_out, 0].set(b_total)
        b_blocks.append(b_pad)
        dilations.append(d)
    w_all = jnp.concatenate(w_blocks, axis=0).astype(jnp.bfloat16)      # bf16 MXU LHS
    b_all = jnp.concatenate(b_blocks, axis=0)                           # f32

    # 0/1 mask: zero in every element's causal-pad lanes, one elsewhere.
    mask_seg = np.ones((1, W_elem), np.float32)
    mask_seg[0, :LPAD] = 0.0
    pad_mask = jnp.asarray(np.tile(mask_seg, (1, b_tile)))

    # Final Linear weight laid out per element segment (zeros in pad / tail).
    lin_seg = jnp.zeros((1, W_elem), jnp.float32)
    lin_seg = lin_seg.at[0, LPAD:LPAD + L].set(
        params["lin_w"].reshape(-1).astype(jnp.float32))
    lin_w_full = jnp.tile(lin_seg, (1, b_tile))
    lin_b = params["lin_b"].reshape(1, 1).astype(jnp.float32)

    kernel = functools.partial(
        _fused_tcn_kernel, dilations=tuple(dilations), K=K, C_sub=C_sub,
        B_TILE=b_tile, LPAD=LPAD, W_elem=W_elem, Lw=Lw)

    out = pl.pallas_call(
        kernel,
        out_shape=jax.ShapeDtypeStruct((num_steps, C_sub, b_tile), jnp.float32),
        grid_spec=pltpu.PrefetchScalarGridSpec(
            num_scalar_prefetch=0,
            grid=(num_steps,),
            in_specs=[
                pl.BlockSpec((b_tile, C_sub, Lw), lambda s: (s, 0, 0)),
                # Constant-index operands (weights / bias / mask / linear):
                # one packed DMA each, index map never changes.
                pl.BlockSpec((n_layers * C_sub, K * C_sub), lambda s: (0, 0)),
                pl.BlockSpec((n_layers * C_sub, 1), lambda s: (0, 0)),
                pl.BlockSpec((1, W_total), lambda s: (0, 0)),
                pl.BlockSpec((1, W_total), lambda s: (0, 0)),
                pl.BlockSpec((1, 1), lambda s: (0, 0)),
            ],
            out_specs=pl.BlockSpec((1, C_sub, b_tile), lambda s: (s, 0, 0)),
            scratch_shapes=[
                pltpu.VMEM((C_sub, W_total), jnp.float32),      # ping
                pltpu.VMEM((C_sub, W_total), jnp.float32),      # pong
                pltpu.VMEM((K * C_sub, W_total), jnp.bfloat16),  # tap stack
            ],
        ),
        compiler_params=pltpu.CompilerParams(
            dimension_semantics=("parallel",)),     # batch tiles across cores
    )(x_pad, w_all, b_all, pad_mask, lin_w_full, lin_b)

    # Un-tile: (num_steps, C_sub, B_TILE) -> (N, c_last, 1).
    out = out.transpose(0, 2, 1).reshape(N_pad, C_sub)[:N, :c_last]
    return out.reshape(N, c_last, 1)


# ----------------------------------------------------------------------------
# Deterministic parameter init (matches module __init__ shapes / init_weights)
# ----------------------------------------------------------------------------
def init_params(key, num_inputs, num_channels, kernel_size, seq_len):
    blocks = []
    c_in = num_inputs
    for c_out in num_channels:
        key, kw, kb, kdw, kdb = jax.random.split(key, 5)
        fan_in = c_in * kernel_size
        blk = {
            # conv.weight.data.normal_(0, 0.01)
            "w": 0.01 * jax.random.normal(kw, (c_out, c_in, kernel_size), jnp.float32),
            "b": jax.random.uniform(kb, (c_out,), jnp.float32,
                                    -1.0 / np.sqrt(fan_in), 1.0 / np.sqrt(fan_in)),
            # BatchNorm1d default params / running stats (eval mode)
            "bn_gamma": jnp.ones((c_out,), jnp.float32),
            "bn_beta": jnp.zeros((c_out,), jnp.float32),
            "bn_mean": jnp.zeros((c_out,), jnp.float32),
            "bn_var": jnp.ones((c_out,), jnp.float32),
        }
        if c_in != c_out:
            blk["w_ds"] = 0.01 * jax.random.normal(kdw, (c_out, c_in, 1), jnp.float32)
            blk["b_ds"] = jax.random.uniform(kdb, (c_out,), jnp.float32,
                                             -1.0 / np.sqrt(c_in), 1.0 / np.sqrt(c_in))
        else:
            blk["w_ds"] = None
            blk["b_ds"] = None
        blocks.append(blk)
        c_in = c_out

    key, klw, klb = jax.random.split(key, 3)
    bound = 1.0 / np.sqrt(seq_len)
    return {
        "blocks": blocks,
        "lin_w": jax.random.uniform(klw, (1, seq_len), jnp.float32, -bound, bound),
        "lin_b": jax.random.uniform(klb, (1,), jnp.float32, -bound, bound),
    }


# ----------------------------------------------------------------------------
# Pure-JAX reference (sanity check)
# ----------------------------------------------------------------------------
def tcn_reference(x, params, *, kernel_size):
    feat = x
    eps = 1e-5
    for i, blk in enumerate(params["blocks"]):
        d = 2 ** i
        pad = (kernel_size - 1) * d
        y = lax.conv_general_dilated(
            feat, blk["w"], window_strides=(1,), padding=[(pad, pad)],
            rhs_dilation=(d,), dimension_numbers=("NCH", "OIH", "NCH"))
        y = y + blk["b"][None, :, None]
        y = y[:, :, :-pad]                                        # Chomp1d
        scale = blk["bn_gamma"] / jnp.sqrt(blk["bn_var"] + eps)
        y = (y - blk["bn_mean"][None, :, None]) * scale[None, :, None] \
            + blk["bn_beta"][None, :, None]
        if blk["w_ds"] is not None:
            res = lax.conv_general_dilated(
                feat, blk["w_ds"], window_strides=(1,), padding=[(0, 0)],
                dimension_numbers=("NCH", "OIH", "NCH")) + blk["b_ds"][None, :, None]
        else:
            res = feat
        feat = jax.nn.relu(y + res)
    return jnp.einsum("ncl,ol->nco", feat, params["lin_w"]) + params["lin_b"]


# ----------------------------------------------------------------------------
if __name__ == "__main__":
    key = jax.random.PRNGKey(0)
    key, kx, kp = jax.random.split(key, 3)

    batch, num_inputs = 8, 4
    seq_len = 1000                      # fixed by nn.Linear(1000, 1) in the module
    num_channels = [8, 8]               # level 0 has a 1x1 downsample, level 1 doesn't
    kernel_size = 4

    params = init_params(kp, num_inputs, num_channels, kernel_size, seq_len)
    x = jax.random.normal(kx, (batch, num_inputs, seq_len), jnp.float32)

    fwd = jax.jit(functools.partial(tcn_forward, kernel_size=kernel_size))
    out = fwd(x, params)
    jax.block_until_ready(out)
    assert out.shape == (batch, num_channels[-1], 1), out.shape

    ref = tcn_reference(x, params, kernel_size=kernel_size)
    np.testing.assert_allclose(np.asarray(out), np.asarray(ref), rtol=2e-2, atol=2e-2)

    print("KERNEL_OK")
</pallas_src>

<mosaic_0001>
module attributes {stable_mosaic.version = 11 : i64} {
  func.func @_fused_tcn_kernel(%arg0: i32, %arg1: memref<4x16x1024xf32, #tpu.memory_space<vmem>>, %arg2: memref<32x64xbf16, #tpu.memory_space<vmem>>, %arg3: memref<32x1xf32, #tpu.memory_space<vmem>>, %arg4: memref<1x4608xf32, #tpu.memory_space<vmem>>, %arg5: memref<1x4608xf32, #tpu.memory_space<vmem>>, %arg6: memref<1x1xf32, #tpu.memory_space<vmem>>, %arg7: memref<1x16x4xf32, #tpu.memory_space<vmem>>, %arg8: memref<16x4608xf32, #tpu.memory_space<vmem>>, %arg9: memref<16x4608xf32, #tpu.memory_space<vmem>>, %arg10: memref<64x4608xbf16, #tpu.memory_space<vmem>>) attributes {dimension_semantics = [#tpu.dimension_semantics<parallel>], iteration_bounds = array<i64: 2>, scalar_prefetch = 0 : i64, scratch_operands = 3 : i64, tpu.core_type = #tpu.core_type<tc>, window_params = [{transform_indices = @transform_0, window_bounds = array<i64: 4, 16, 1024>}, {pipeline_mode = #tpu.pipeline_mode<synchronous>, transform_indices = @transform_1, window_bounds = array<i64: 32, 64>}, {pipeline_mode = #tpu.pipeline_mode<synchronous>, transform_indices = @transform_2, window_bounds = array<i64: 32, 1>}, {pipeline_mode = #tpu.pipeline_mode<synchronous>, transform_indices = @transform_3, window_bounds = array<i64: 1, 4608>}, {pipeline_mode = #tpu.pipeline_mode<synchronous>, transform_indices = @transform_4, window_bounds = array<i64: 1, 4608>}, {pipeline_mode = #tpu.pipeline_mode<synchronous>, transform_indices = @transform_5, window_bounds = array<i64: 1, 1>}, {transform_indices = @transform_6, window_bounds = array<i64: 1, 16, 4>}]} {
    %c0 = arith.constant 0 : index
    %c0_0 = arith.constant 0 : index
    %0 = vector.load %arg4[%c0, %c0_0] : memref<1x4608xf32, #tpu.memory_space<vmem>>, vector<1x4608xf32>
    %cst = arith.constant 0.000000e+00 : f32
    %1 = vector.broadcast %cst : f32 to vector<16x128xf32>
    %c0_1 = arith.constant 0 : index
    %c0_2 = arith.constant 0 : index
    %2 = vector.load %arg8[%c0_1, %c0_2] : memref<16x4608xf32, #tpu.memory_space<vmem>>, vector<16x128xf32>
    tpu.vector_store %arg8[%c0_1, %c0_2], %1 {strides = array<i32>} : memref<16x4608xf32, #tpu.memory_space<vmem>>, vector<16x128xf32>,
    %c0_3 = arith.constant 0 : index
    %c0_4 = arith.constant 0 : index
    %c0_5 = arith.constant 0 : index
    %3 = vector.load %arg1[%c0_3, %c0_4, %c0_5] : memref<4x16x1024xf32, #tpu.memory_space<vmem>>, vector<1x16x1024xf32>
    %4 = vector.shape_cast %3 : vector<1x16x1024xf32> to vector<16x1024xf32>
    %c0_6 = arith.constant 0 : index
    %c128 = arith.constant 128 : index
    %5 = vector.load %arg8[%c0_6, %c128] : memref<16x4608xf32, #tpu.memory_space<vmem>>, vector<16x1024xf32>
    tpu.vector_store %arg8[%c0_6, %c128], %4 {strides = array<i32>} : memref<16x4608xf32, #tpu.memory_space<vmem>>, vector<16x1024xf32>,
    %cst_7 = arith.constant 0.000000e+00 : f32
    %6 = vector.broadcast %cst_7 : f32 to vector<16x128xf32>
    %c0_8 = arith.constant 0 : index
    %c1152 = arith.constant 1152 : index
    %7 = vector.load %arg8[%c0_8, %c1152] : memref<16x4608xf32, #tpu.memory_space<vmem>>, vector<16x128xf32>
    tpu.vector_store %arg8[%c0_8, %c1152], %6 {strides = array<i32>} : memref<16x4608xf32, #tpu.memory_space<vmem>>, vector<16x128xf32>,
    %c1 = arith.constant 1 : index
    %c0_9 = arith.constant 0 : index
    %c0_10 = arith.constant 0 : index
    %8 = vector.load %arg1[%c1, %c0_9, %c0_10] : memref<4x16x1024xf32, #tpu.memory_space<vmem>>, vector<1x16x1024xf32>
    %9 = vector.shape_cast %8 : vector<1x16x1024xf32> to vector<16x1024xf32>
    %c0_11 = arith.constant 0 : index
    %c1280 = arith.constant 1280 : index
    %10 = vector.load %arg8[%c0_11, %c1280] : memref<16x4608xf32, #tpu.memory_space<vmem>>, vector<16x1024xf32>
    tpu.vector_store %arg8[%c0_11, %c1280], %9 {strides = array<i32>} : memref<16x4608xf32, #tpu.memory_space<vmem>>, vector<16x1024xf32>,
    %cst_12 = arith.constant 0.000000e+00 : f32
    %11 = vector.broadcast %cst_12 : f32 to vector<16x128xf32>
    %c0_13 = arith.constant 0 : index
    %c2304 = arith.constant 2304 : index
    %12 = vector.load %arg8[%c0_13, %c2304] : memref<16x4608xf32, #tpu.memory_space<vmem>>, vector<16x128xf32>
    tpu.vector_store %arg8[%c0_13, %c2304], %11 {strides = array<i32>} : memref<16x4608xf32, #tpu.memory_space<vmem>>, vector<16x128xf32>,
    %c2 = arith.constant 2 : index
    %c0_14 = arith.constant 0 : index
    %c0_15 = arith.constant 0 : index
    %13 = vector.load %arg1[%c2, %c0_14, %c0_15] : memref<4x16x1024xf32, #tpu.memory_space<vmem>>, vector<1x16x1024xf32>
    %14 = vector.shape_cast %13 : vector<1x16x1024xf32> to vector<16x1024xf32>
    %c0_16 = arith.constant 0 : index
    %c2432 = arith.constant 2432 : index
    %15 = vector.load %arg8[%c0_16, %c2432] : memref<16x4608xf32, #tpu.memory_space<vmem>>, vector<16x1024xf32>
    tpu.vector_store %arg8[%c0_16, %c2432], %14 {strides = array<i32>} : memref<16x4608xf32, #tpu.memory_space<vmem>>, vector<16x1024xf32>,
    %cst_17 = arith.constant 0.000000e+00 : f32
    %16 = vector.broadcast %cst_17 : f32 to vector<16x128xf32>
    %c0_18 = arith.constant 0 : index
    %c3456 = arith.constant 3456 : index
    %17 = vector.load %arg8[%c0_18, %c3456] : memref<16x4608xf32, #tpu.memory_space<vmem>>, vector<16x128xf32>
    tpu.vector_store %arg8[%c0_18, %c3456], %16 {strides = array<i32>} : memref<16x4608xf32, #tpu.memory_space<vmem>>, vector<16x128xf32>,
    %c3 = arith.constant 3 : index
    %c0_19 = arith.constant 0 : index
    %c0_20 = arith.constant 0 : index
    %18 = vector.load %arg1[%c3, %c0_19, %c0_20] : memref<4x16x1024xf32, #tpu.memory_space<vmem>>, vector<1x16x1024xf32>
    %19 = vector.shape_cast %18 : vector<1x16x1024xf32> to vector<16x1024xf32>
    %c0_21 = arith.constant 0 : index
    %c3584 = arith.constant 3584 : index
    %20 = vector.load %arg8[%c0_21, %c3584] : memref<16x4608xf32, #tpu.memory_space<vmem>>, vector<16x1024xf32>
    tpu.vector_store %arg8[%c0_21, %c3584], %19 {strides = array<i32>} : memref<16x4608xf32, #tpu.memory_space<vmem>>, vector<16x1024xf32>,
    %c0_22 = arith.constant 0 : index
    %c0_23 = arith.constant 0 : index
    %21 = vector.load %arg8[%c0_22, %c0_23] : memref<16x4608xf32, #tpu.memory_space<vmem>>, vector<16x4608xf32>
    %c3_i32 = arith.constant 3 : i32
    %22 = tpu.dynamic_rotate %21 by %c3_i32 dim 1 : vector<16x4608xf32>, i32 -> vector<16x4608xf32>
    %23 = arith.truncf %22 : vector<16x4608xf32> to vector<16x4608xbf16>
    %c0_24 = arith.constant 0 : index
    %c0_25 = arith.constant 0 : index
    %24 = vector.load %arg10[%c0_24, %c0_25] : memref<64x4608xbf16, #tpu.memory_space<vmem>>, vector<16x4608xbf16>
    tpu.vector_store %arg10[%c0_24, %c0_25], %23 {strides = array<i32>} : memref<64x4608xbf16, #tpu.memory_space<vmem>>, vector<16x4608xbf16>,
    %c0_26 = arith.constant 0 : index
    %c0_27 = arith.constant 0 : index
    %25 = vector.load %arg8[%c0_26, %c0_27] : memref<16x4608xf32, #tpu.memory_space<vmem>>, vector<16x4608xf32>
    %c2_i32 = arith.constant 2 : i32
    %26 = tpu.dynamic_rotate %25 by %c2_i32 dim 1 : vector<16x4608xf32>, i32 -> vector<16x4608xf32>
    %27 = arith.truncf %26 : vector<16x4608xf32> to vector<16x4608xbf16>
    %c16 = arith.constant 16 : index
    %c0_28 = arith.constant 0 : index
    %28 = vector.load %arg10[%c16, %c0_28] : memref<64x4608xbf16, #tpu.memory_space<vmem>>, vector<16x4608xbf16>
    tpu.vector_store %arg10[%c16, %c0_28], %27 {strides = array<i32>} : memref<64x4608xbf16, #tpu.memory_space<vmem>>, vector<16x4608xbf16>,
    %c0_29 = arith.constant 0 : index
    %c0_30 = arith.constant 0 : index
    %29 = vector.load %arg8[%c0_29, %c0_30] : memref<16x4608xf32, #tpu.memory_space<vmem>>, vector<16x4608xf32>
    %c1_i32 = arith.constant 1 : i32
    %30 = tpu.dynamic_rotate %29 by %c1_i32 dim 1 : vector<16x4608xf32>, i32 -> vector<16x4608xf32>
    %31 = arith.truncf %30 : vector<16x4608xf32> to vector<16x4608xbf16>
    %c32 = arith.constant 32 : index
    %c0_31 = arith.constant 0 : index
    %32 = vector.load %arg10[%c32, %c0_31] : memref<64x4608xbf16, #tpu.memory_space<vmem>>, vector<16x4608xbf16>
    tpu.vector_store %arg10[%c32, %c0_31], %31 {strides = array<i32>} : memref<64x4608xbf16, #tpu.memory_space<vmem>>, vector<16x4608xbf16>,
    %c0_32 = arith.constant 0 : index
    %c0_33 = arith.constant 0 : index
    %33 = vector.load %arg8[%c0_32, %c0_33] : memref<16x4608xf32, #tpu.memory_space<vmem>>, vector<16x4608xf32>
    %34 = arith.truncf %33 : vector<16x4608xf32> to vector<16x4608xbf16>
    %c48 = arith.constant 48 : index
    %c0_34 = arith.constant 0 : index
    %35 = vector.load %arg10[%c48, %c0_34] : memref<64x4608xbf16, #tpu.memory_space<vmem>>, vector<16x4608xbf16>
    tpu.vector_store %arg10[%c48, %c0_34], %34 {strides = array<i32>} : memref<64x4608xbf16, #tpu.memory_space<vmem>>, vector<16x4608xbf16>,
    %c0_35 = arith.constant 0 : index
    %c0_36 = arith.constant 0 : index
    %36 = vector.load %arg2[%c0_35, %c0_36] : memref<32x64xbf16, #tpu.memory_space<vmem>>, vector<16x64xbf16>
    %c0_37 = arith.constant 0 : index
    %c0_38 = arith.constant 0 : index
    %37 = vector.load %arg3[%c0_37, %c0_38] : memref<32x1xf32, #tpu.memory_space<vmem>>, vector<16x1xf32>
    %c0_39 = arith.constant 0 : index
    %c0_40 = arith.constant 0 : index
    %38 = vector.load %arg10[%c0_39, %c0_40] : memref<64x4608xbf16, #tpu.memory_space<vmem>>, vector<64x4608xbf16>
    %cst_41 = arith.constant dense<0.000000e+00> : vector<16x4608xf32>
    %39 = tpu.matmul %36, %38, %cst_41 {dimension_numbers = #tpu.dot_dimension_numbers<[1], [0], [0], [1], [0, 0, 1, 1], [], []>} : vector<16x64xbf16>, vector<64x4608xbf16>, vector<16x4608xf32> -> vector<16x4608xf32>
    %40 = vector.broadcast %37 : vector<16x1xf32> to vector<16x4608xf32>
    %41 = arith.addf %39, %40 : vector<16x4608xf32>
    %cst_42 = arith.constant 0.000000e+00 : f32
    %42 = vector.broadcast %cst_42 : f32 to vector<16x4608xf32>
    %43 = arith.maximumf %41, %42 : vector<16x4608xf32>
    %44 = vector.broadcast %0 : vector<1x4608xf32> to vector<16x4608xf32>
    %45 = arith.mulf %43, %44 : vector<16x4608xf32>
    %c0_43 = arith.constant 0 : index
    %c0_44 = arith.constant 0 : index
    %46 = vector.load %arg9[%c0_43, %c0_44] : memref<16x4608xf32, #tpu.memory_space<vmem>>, vector<16x4608xf32>
    tpu.vector_store %arg9[%c0_43, %c0_44], %45 {strides = array<i32>} : memref<16x4608xf32, #tpu.memory_space<vmem>>, vector<16x4608xf32>,
    %c0_45 = arith.constant 0 : index
    %c0_46 = arith.constant 0 : index
    %47 = vector.load %arg9[%c0_45, %c0_46] : memref<16x4608xf32, #tpu.memory_space<vmem>>, vector<16x4608xf32>
    %c6_i32 = arith.constant 6 : i32
    %48 = tpu.dynamic_rotate %47 by %c6_i32 dim 1 : vector<16x4608xf32>, i32 -> vector<16x4608xf32>
    %49 = arith.truncf %48 : vector<16x4608xf32> to vector<16x4608xbf16>
    %c0_47 = arith.constant 0 : index
    %c0_48 = arith.constant 0 : index
    %50 = vector.load %arg10[%c0_47, %c0_48] : memref<64x4608xbf16, #tpu.memory_space<vmem>>, vector<16x4608xbf16>
    tpu.vector_store %arg10[%c0_47, %c0_48], %49 {strides = array<i32>} : memref<64x4608xbf16, #tpu.memory_space<vmem>>, vector<16x4608xbf16>,
    %c0_49 = arith.constant 0 : index
    %c0_50 = arith.constant 0 : index
    %51 = vector.load %arg9[%c0_49, %c0_50] : memref<16x4608xf32, #tpu.memory_space<vmem>>, vector<16x4608xf32>
    %c4_i32 = arith.constant 4 : i32
    %52 = tpu.dynamic_rotate %51 by %c4_i32 dim 1 : vector<16x4608xf32>, i32 -> vector<16x4608xf32>
    %53 = arith.truncf %52 : vector<16x4608xf32> to vector<16x4608xbf16>
    %c16_51 = arith.constant 16 : index
    %c0_52 = arith.constant 0 : index
    %54 = vector.load %arg10[%c16_51, %c0_52] : memref<64x4608xbf16, #tpu.memory_space<vmem>>, vector<16x4608xbf16>
    tpu.vector_store %arg10[%c16_51, %c0_52], %53 {strides = array<i32>} : memref<64x4608xbf16, #tpu.memory_space<vmem>>, vector<16x4608xbf16>,
    %c0_53 = arith.constant 0 : index
    %c0_54 = arith.constant 0 : index
    %55 = vector.load %arg9[%c0_53, %c0_54] : memref<16x4608xf32, #tpu.memory_space<vmem>>, vector<16x4608xf32>
    %c2_i32_55 = arith.constant 2 : i32
    %56 = tpu.dynamic_rotate %55 by %c2_i32_55 dim 1 : vector<16x4608xf32>, i32 -> vector<16x4608xf32>
    %57 = arith.truncf %56 : vector<16x4608xf32> to vector<16x4608xbf16>
    %c32_56 = arith.constant 32 : index
    %c0_57 = arith.constant 0 : index
    %58 = vector.load %arg10[%c32_56, %c0_57] : memref<64x4608xbf16, #tpu.memory_space<vmem>>, vector<16x4608xbf16>
    tpu.vector_store %arg10[%c32_56, %c0_57], %57 {strides = array<i32>} : memref<64x4608xbf16, #tpu.memory_space<vmem>>, vector<16x4608xbf16>,
    %c0_58 = arith.constant 0 : index
    %c0_59 = arith.constant 0 : index
    %59 = vector.load %arg9[%c0_58, %c0_59] : memref<16x4608xf32, #tpu.memory_space<vmem>>, vector<16x4608xf32>
    %60 = arith.truncf %59 : vector<16x4608xf32> to vector<16x4608xbf16>
    %c48_60 = arith.constant 48 : index
    %c0_61 = arith.constant 0 : index
    %61 = vector.load %arg10[%c48_60, %c0_61] : memref<64x4608xbf16, #tpu.memory_space<vmem>>, vector<16x4608xbf16>
    tpu.vector_store %arg10[%c48_60, %c0_61], %60 {strides = array<i32>} : memref<64x4608xbf16, #tpu.memory_space<vmem>>, vector<16x4608xbf16>,
    %c16_62 = arith.constant 16 : index
    %c0_63 = arith.constant 0 : index
    %62 = vector.load %arg2[%c16_62, %c0_63] : memref<32x64xbf16, #tpu.memory_space<vmem>>, vector<16x64xbf16>
    %c16_64 = arith.constant 16 : index
    %c0_65 = arith.constant 0 : index
    %63 = vector.load %arg3[%c16_64, %c0_65] : memref<32x1xf32, #tpu.memory_space<vmem>>, vector<16x1xf32>
    %c0_66 = arith.constant 0 : index
    %c0_67 = arith.constant 0 : index
    %64 = vector.load %arg10[%c0_66, %c0_67] : memref<64x4608xbf16, #tpu.memory_space<vmem>>, vector<64x4608xbf16>
    %cst_68 = arith.constant dense<0.000000e+00> : vector<16x4608xf32>
    %65 = tpu.matmul %62, %64, %cst_68 {dimension_numbers = #tpu.dot_dimension_numbers<[1], [0], [0], [1], [0, 0, 1, 1], [], []>} : vector<16x64xbf16>, vector<64x4608xbf16>, vector<16x4608xf32> -> vector<16x4608xf32>
    %66 = vector.broadcast %63 : vector<16x1xf32> to vector<16x4608xf32>
    %67 = arith.addf %65, %66 : vector<16x4608xf32>
    %cst_69 = arith.constant 0.000000e+00 : f32
    %68 = vector.broadcast %cst_69 : f32 to vector<16x4608xf32>
    %69 = arith.maximumf %67, %68 : vector<16x4608xf32>
    %70 = vector.broadcast %0 : vector<1x4608xf32> to vector<16x4608xf32>
    %71 = arith.mulf %69, %70 : vector<16x4608xf32>
    %c0_70 = arith.constant 0 : index
    %c0_71 = arith.constant 0 : index
    %72 = vector.load %arg8[%c0_70, %c0_71] : memref<16x4608xf32, #tpu.memory_space<vmem>>, vector<16x4608xf32>
    tpu.vector_store %arg8[%c0_70, %c0_71], %71 {strides = array<i32>} : memref<16x4608xf32, #tpu.memory_space<vmem>>, vector<16x4608xf32>,
    %c0_72 = arith.constant 0 : index
    %c0_73 = arith.constant 0 : index
    %73 = vector.load %arg8[%c0_72, %c0_73] : memref<16x4608xf32, #tpu.memory_space<vmem>>, vector<16x4608xf32>
    %c0_74 = arith.constant 0 : index
    %c0_75 = arith.constant 0 : index
    %74 = vector.load %arg5[%c0_74, %c0_75] : memref<1x4608xf32, #tpu.memory_space<vmem>>, vector<1x4608xf32>
    %75 = vector.broadcast %74 : vector<1x4608xf32> to vector<16x4608xf32>
    %76 = arith.mulf %73, %75 : vector<16x4608xf32>
    %77 = vector.extract_strided_slice %76 {offsets = [0, 0], sizes = [16, 1152], strides = [1, 1]} : vector<16x4608xf32> to vector<16x1152xf32>
    %cst_76 = arith.constant dense<0.000000e+00> : vector<16xf32>
    %78 = vector.multi_reduction <add>, %77, %cst_76 [1] : vector<16x1152xf32> to vector<16xf32>
    %79 = vector.shape_cast %78 : vector<16xf32> to vector<16x1xf32>
    %80 = vector.extract_strided_slice %76 {offsets = [0, 1152], sizes = [16, 1152], strides = [1, 1]} : vector<16x4608xf32> to vector<16x1152xf32>
    %cst_77 = arith.constant dense<0.000000e+00> : vector<16xf32>
    %81 = vector.multi_reduction <add>, %80, %cst_77 [1] : vector<16x1152xf32> to vector<16xf32>
    %82 = vector.shape_cast %81 : vector<16xf32> to vector<16x1xf32>
    %83 = vector.extract_strided_slice %76 {offsets = [0, 2304], sizes = [16, 1152], strides = [1, 1]} : vector<16x4608xf32> to vector<16x1152xf32>
    %cst_78 = arith.constant dense<0.000000e+00> : vector<16xf32>
    %84 = vector.multi_reduction <add>, %83, %cst_78 [1] : vector<16x1152xf32> to vector<16xf32>
    %85 = vector.shape_cast %84 : vector<16xf32> to vector<16x1xf32>
    %86 = vector.extract_strided_slice %76 {offsets = [0, 3456], sizes = [16, 1152], strides = [1, 1]} : vector<16x4608xf32> to vector<16x1152xf32>
    %cst_79 = arith.constant dense<0.000000e+00> : vector<16xf32>
    %87 = vector.multi_reduction <add>, %86, %cst_79 [1] : vector<16x1152xf32> to vector<16xf32>
    %88 = vector.shape_cast %87 : vector<16xf32> to vector<16x1xf32>
    %89 = tpu.concatenate %79, %82, %85, %88 in 1 : vector<16x1xf32>, vector<16x1xf32>, vector<16x1xf32>, vector<16x1xf32> -> vector<16x4xf32>
    %c0_80 = arith.constant 0 : index
    %c0_81 = arith.constant 0 : index
    %90 = vector.load %arg6[%c0_80, %c0_81] : memref<1x1xf32, #tpu.memory_space<vmem>>, vector<1x1xf32>
    %91 = vector.broadcast %90 : vector<1x1xf32> to vector<16x4xf32>
    %92 = arith.addf %89, %91 : vector<16x4xf32>
    %c0_82 = arith.constant 0 : index
    %c0_83 = arith.constant 0 : index
    %c0_84 = arith.constant 0 : index
    %93 = vector.load %arg7[%c0_82, %c0_83, %c0_84] : memref<1x16x4xf32, #tpu.memory_space<vmem>>, vector<1x16x4xf32>
    %94 = vector.shape_cast %93 : vector<1x16x4xf32> to vector<16x4xf32>
    %95 = vector.shape_cast %92 : vector<16x4xf32> to vector<1x16x4xf32>
    tpu.vector_store %arg7[%c0_82, %c0_83, %c0_84], %95 {strides = array<i32>} : memref<1x16x4xf32, #tpu.memory_space<vmem>>, vector<1x16x4xf32>,
    return
  }
  func.func @transform_0(%arg0: i32) -> (i32, i32, i32) {
    %c0_i32 = arith.constant 0 : i32
    %c0_i32_0 = arith.constant 0 : i32
    %c0_i32_1 = arith.constant 0 : i32
    return %arg0, %c0_i32, %c0_i32_0 : i32, i32, i32
  }
  func.func @transform_1(%arg0: i32) -> (i32, i32) {
    %c0_i32 = arith.constant 0 : i32
    %c0_i32_0 = arith.constant 0 : i32
    %c0_i32_1 = arith.constant 0 : i32
    return %c0_i32, %c0_i32_0 : i32, i32
  }
  func.func @transform_2(%arg0: i32) -> (i32, i32) {
    %c0_i32 = arith.constant 0 : i32
    %c0_i32_0 = arith.constant 0 : i32
    %c0_i32_1 = arith.constant 0 : i32
    return %c0_i32, %c0_i32_0 : i32, i32
  }
  func.func @transform_3(%arg0: i32) -> (i32, i32) {
    %c0_i32 = arith.constant 0 : i32
    %c0_i32_0 = arith.constant 0 : i32
    %c0_i32_1 = arith.constant 0 : i32
    return %c0_i32, %c0_i32_0 : i32, i32
  }
  func.func @transform_4(%arg0: i32) -> (i32, i32) {
    %c0_i32 = arith.constant 0 : i32
    %c0_i32_0 = arith.constant 0 : i32
    %c0_i32_1 = arith.constant 0 : i32
    return %c0_i32, %c0_i32_0 : i32, i32
  }
  func.func @transform_5(%arg0: i32) -> (i32, i32) {
    %c0_i32 = arith.constant 0 : i32
    %c0_i32_0 = arith.constant 0 : i32
    %c0_i32_1 = arith.constant 0 : i32
    return %c0_i32, %c0_i32_0 : i32, i32
  }
  func.func @transform_6(%arg0: i32) -> (i32, i32, i32) {
    %c0_i32 = arith.constant 0 : i32
    %c0_i32_0 = arith.constant 0 : i32
    %c0_i32_1 = arith.constant 0 : i32
    return %arg0, %c0_i32, %c0_i32_0 : i32, i32, i32
  }
}

</mosaic_0001>

<bundles_post_ra>
// kernel: tcn_forward.1
= control target key start
LH: loop header
LB: loop body
LE: loop exit
PB: predicated region body
PF: predicated region fallthrough
CT: control target
= control target key end

     0   :  { %s7151_s23 = smov 0   ;;  %s11355_s0 = inlined_call_operand.vmem [shape: f32[8,16,1024], index: 0, kind: input, shape index: {}]   ;;  %s11356_s1 = inlined_call_operand.vmem [shape: bf16[32,64], index: 1, kind: input, shape index: {}]   ;;  %s11357_s2 = inlined_call_operand.vmem [shape: f32[32,1], index: 2, kind: input, shape index: {}]   ;;  %s11358_s3 = inlined_call_operand.vmem [shape: f32[1,4608], index: 3, kind: input, shape index: {}]   ;;  %s11359_s4 = inlined_call_operand.vmem [shape: f32[1,4608], index: 4, kind: input, shape index: {}]   ;;  %s11360_s5 = inlined_call_operand.<no memory space> [shape: f32[1,1], index: 5, kind: input, shape index: {}]   ;;  %s11361_s6 = inlined_call_operand.vmem [shape: f32[2,16,4], index: 6, kind: output, shape index: {}]  }
   0x1   :  { %v11_v0 = vstv %s11360_s5 }
   0x2   :  { %12 = vst [vmem:[#allocation5] sm:$0x1] %v11_v0 }
   0x3 LB: > { %s7157_s24 = sadd.s32 4294967295, %s7103_s23   ;;  %p5854_p0 = scmp.ge.s32.totalorder %s7103_s23, 1  ;;  %s7103_s23 = sphi %s7151_s23, %s18_s23  }
   0x4   : > { %p216_p1 = scmp.lt.s32.totalorder %s7103_s23, 3 }
   0x6   : > { %p217_p2 = pnand %p5854_p0, %p216_p1 }
   0x8   : > { %220 = sbr.rel (%p217_p2) target bundleno = 1262 (0x4ee), region = 44 }
   0xf   : > { %s5855_s25 = sshll.u32 %s7157_s24, 2  ;;  %s7105_s29 = smov 3   ;;  %v11451_v20 = vmov 0   ;;  %v7109_v30 = vmov 0.0   ;;  %vm1796_vm3 = vcmask 523264   ;;  %vm5771_vm6 = vcmask 7168  }
  0x10   : > { %p248_p3 = scmp.lt.s32.totalorder %s5855_s25, 7  ;;  %s7106_s30 = smov 2   ;;  %1875 = vmatprep.mubr.bf16.mxu1 %v11451_v20  ;;  %1832 = vmatprep.mubr.bf16.mxu0 %v11451_v20  ;;  %vm5774_vm7 = vcmask 15360   ;;  %vm5777_vm8 = vcmask 23552   ;;  %vm5792_vm9 = vcmask 31744  }
  0x11   : > { %s7107_s7 = smov 1   ;;  %6508 = vset.pattern.permute.xlu1 %v11451_v20  ;;  %6507 = vset.pattern.permute.xlu0 %v11451_v20  ;;  %s7111_s18 = smov 6  }
  0x12   : > { %s12126_s25 = smov (!%p248_p3, %s5855_s25), 7  ;;  %p254_p4 = scmp.lt.s32.totalorder %s7157_s24, 1 }
  0x13   : > { %s5949_s5 = sshll.u32 %s12126_s25, 7 }
  0x14   : > { %s7165_s28 = scalar_lea.vmem %s11355_s0, %s5949_s5  ;;  %s12128_s24 = smov (!%p254_p4, %s7157_s24), 1 }
  0x15   : > { %v7168_v1 = vld [vmem:[%s7165_s28 + $0x8] sm:$0xff]  ;;  %v267_v3 = vld [vmem:[%s7165_s28] sm:$0xff]  ;;  %v7178_v6 = vld [vmem:[%s7165_s28 + $0x10] sm:$0xff]  ;;  %s5950_s25 = sshll.u32 %s12128_s24, 4 }
  0x16   : > { %v7171_v2 = vld [vmem:[%s7165_s28 + $0x48] sm:$0xff]  ;;  %v275_v5 = vld [vmem:[%s7165_s28 + $0x40] sm:$0xff]  ;;  %v7181_v7 = vld [vmem:[%s7165_s28 + $0x50] sm:$0xff]  ;;  %s258_s27 = scalar_lea.vmem %s11361_s6, %s5950_s25 }
  0x17   : > { %v5967_v4 = vpack.i.bf16 %v7171_v2, %v7168_v1  ;;  %v5977_v8 = vpack.i.bf16 %v275_v5, %v267_v3  ;;  %v5972_v9 = vpack.i.bf16 %v7181_v7, %v7178_v6  ;;  %v7192_v10 = vld [vmem:[%s7165_s28 + $0x28] sm:$0xff]  ;;  %v7202_v13 = vld [vmem:[%s7165_s28 + $0x30] sm:$0xff]  ;;  %v1564_v15 = vpack.c.bf16 %v7181_v7, %v7178_v6  ;;  %v271_v16 = vld [vmem:[%s7165_s28 + $0x20] sm:$0xff] }
  0x18   : > { %v7195_v11 = vld [vmem:[%s7165_s28 + $0x68] sm:$0xff]  ;;  %v7205_v14 = vld [vmem:[%s7165_s28 + $0x70] sm:$0xff]  ;;  %v279_v17 = vld [vmem:[%s7165_s28 + $0x60] sm:$0xff]  ;;  %v1563_v18 = vpack.c.bf16 %v7171_v2, %v7168_v1  ;;  %v11362_v3 = vlaneseq }
  0x19   : > { %5968 = vrot.lane.b32.xlu0 %v5967_v4, %s7105_s29  ;;  %5978 = vrot.lane.b32.xlu1 %v5977_v8, %s7105_s29  ;;  %v6012_v12 = vpack.i.bf16 %v7195_v11, %v7192_v10  ;;  %v6017_v19 = vpack.i.bf16 %v7205_v14, %v7202_v13  ;;  %v6022_v21 = vpack.i.bf16 %v279_v17, %v271_v16  ;;  %v7232_v24 = vld [vmem:[%s7165_s28 + $0x80] sm:$0xff]  ;;  %v7238_v26 = vld [vmem:[%s7165_s28 + $0x88] sm:$0xff] }
  0x1a   : > { %v1568_v22 = vpack.c.bf16 %v7205_v14, %v7202_v13  ;;  %v1567_v23 = vpack.c.bf16 %v7195_v11, %v7192_v10  ;;  %v7235_v25 = vld [vmem:[%s7165_s28 + $0xc0] sm:$0xff]  ;;  %v7241_v27 = vld [vmem:[%s7165_s28 + $0xc8] sm:$0xff]  ;;  %v5863_v38 = vld [vmem:[%s7165_s28 + $0x98] sm:$0xff] }
  0x1b   : > { %v6057_v28 = vpack.i.bf16 %v7235_v25, %v7232_v24  ;;  %v6062_v29 = vpack.i.bf16 %v7241_v27, %v7238_v26  ;;  %v7258_v31 = vld [vmem:[%s7165_s28 + $0xa0] sm:$0xff]  ;;  %v1572_v33 = vpack.c.bf16 %v7241_v27, %v7238_v26  ;;  %v1571_v34 = vpack.c.bf16 %v7235_v25, %v7232_v24  ;;  %v7272_v36 = vld [vmem:[%s7165_s28 + $0xa8] sm:$0xff]  ;;  %v5871_v39 = vld [vmem:[%s7165_s28 + $0xd8] sm:$0xff] }
  0x1c   : > { %v7261_v32 = vld [vmem:[%s7165_s28 + $0xe0] sm:$0xff]  ;;  %v7275_v37 = vld [vmem:[%s7165_s28 + $0xe8] sm:$0xff]  ;;  %v6112_v41 = vpack.i.bf16 %v5871_v39, %v5863_v38  ;;  %v5867_v47 = vld [vmem:[%s7165_s28 + $0xb8] sm:$0xff] }
  0x1d   : > { %5973 = vrot.lane.b32.xlu0 %v5972_v9, %s7105_s29  ;;  %5983 = vrot.lane.b32.xlu1 %v5967_v4, %s7106_s30  ;;  %v6102_v35 = vpack.i.bf16 %v7261_v32, %v7258_v31  ;;  %v6107_v40 = vpack.i.bf16 %v7275_v37, %v7272_v36  ;;  %v1576_v42 = vpack.c.bf16 %v7275_v37, %v7272_v36  ;;  %v7295_v44 = vld [vmem:[%s7165_s28 + $0x100] sm:$0xff]  ;;  %v5875_v48 = vld [vmem:[%s7165_s28 + $0xf8] sm:$0xff] }
  0x1e   : > { %v1575_v43 = vpack.c.bf16 %v7261_v32, %v7258_v31  ;;  %v7298_v45 = vld [vmem:[%s7165_s28 + $0x140] sm:$0xff]  ;;  %v6157_v49 = vpack.i.bf16 %v5875_v48, %v5867_v47  ;;  %v5879_v50 = vld [vmem:[%s7165_s28 + $0x118] sm:$0xff]  ;;  %v5878_v55 = vld [vmem:[%s7165_s28 + $0x110] sm:$0xff] }
  0x1f   : > { %v6152_v46 = vpack.i.bf16 %v7298_v45, %v7295_v44  ;;  %v5887_v51 = vld [vmem:[%s7165_s28 + $0x158] sm:$0xff]  ;;  %v7320_v53 = vld [vmem:[%s7165_s28 + $0x120] sm:$0xff]  ;;  %v5886_v56 = vld [vmem:[%s7165_s28 + $0x150] sm:$0xff] }
  0x20   : > { %v6192_v52 = vpack.i.bf16 %v5887_v51, %v5879_v50  ;;  %v7323_v54 = vld [vmem:[%s7165_s28 + $0x160] sm:$0xff]  ;;  %v6202_v58 = vpack.i.bf16 %v5886_v56, %v5878_v55  ;;  %v5883_v59 = vld [vmem:[%s7165_s28 + $0x138] sm:$0xff]  ;;  %v5882_v62 = vld [vmem:[%s7165_s28 + $0x130] sm:$0xff] }
  0x21   : > { %5988 = vrot.lane.b32.xlu0 %v5972_v9, %s7106_s30  ;;  %5993 = vrot.lane.b32.xlu1 %v5977_v8, %s7106_s30  ;;  %v6197_v57 = vpack.i.bf16 %v7323_v54, %v7320_v53  ;;  %v5891_v60 = vld [vmem:[%s7165_s28 + $0x178] sm:$0xff]  ;;  %v5890_v63 = vld [vmem:[%s7165_s28 + $0x170] sm:$0xff] }
  0x22   : > { %v6237_v61 = vpack.i.bf16 %v5891_v60, %v5883_v59  ;;  %v6247_v0 = vpack.i.bf16 %v5890_v63, %v5882_v62  ;;  %v5895_v50 = vld [vmem:[%s7165_s28 + $0x198] sm:$0xff]  ;;  %v5893_v56 = vld [vmem:[%s7165_s28 + $0x188] sm:$0xff] }
  0x23   : > { %v5903_v51 = vld [vmem:[%s7165_s28 + $0x1d8] sm:$0xff] }
  0x25   : > { %5998 = vrot.lane.b32.xlu0 %v5967_v4, %s7107_s7  ;;  %6003 = vrot.lane.b32.xlu1 %v5972_v9, %s7107_s7  ;;  %v7349_v4 = vand.u32 127, %v11362_v3 }
  0x27   : > { %vm622_vm0 = vcmp.lt.s32.totalorder %v7349_v4, 3  ;;  %vm983_vm1 = vcmp.lt.s32.totalorder %v7349_v4, 2  ;;  %vm1344_vm2 = vcmp.lt.s32.totalorder %v7349_v4, 1  ;;  %vm3191_vm4 = vcmp.lt.s32.totalorder %v7349_v4, 6 }
  0x28   : > { %vm3552_vm5 = vcmp.lt.s32.totalorder %v7349_v4, 4 }
  0x29   : > { %6008 = vrot.lane.b32.xlu0 %v5977_v8, %s7107_s7  ;;  %6013 = vrot.lane.b32.xlu1 %v6012_v12, %s7105_s29 }
  0x2d   : > { %6018 = vrot.lane.b32.xlu0 %v6017_v19, %s7105_s29  ;;  %6023 = vrot.lane.b32.xlu1 %v6022_v21, %s7105_s29 }
  0x31   : > { %6028 = vrot.lane.b32.xlu0 %v6012_v12, %s7106_s30  ;;  %6033 = vrot.lane.b32.xlu1 %v6017_v19, %s7106_s30 }
  0x35   : > { %6038 = vrot.lane.b32.xlu0 %v6022_v21, %s7106_s30  ;;  %6043 = vrot.lane.b32.xlu1 %v6012_v12, %s7107_s7 }
  0x39   : > { %6048 = vrot.lane.b32.xlu0 %v6017_v19, %s7107_s7  ;;  %6053 = vrot.lane.b32.xlu1 %v6022_v21, %s7107_s7  ;;  %v5894_v19 = vld [vmem:[%s7165_s28 + $0x190] sm:$0xff] }
  0x3a   : > { %v5902_v21 = vld [vmem:[%s7165_s28 + $0x1d0] sm:$0xff] }
  0x3b   : > { %v7366_v39 = vpack.i.bf16 %v5902_v21, %v5894_v19 }
  0x3d   : > { %6058 = vrot.lane.b32.xlu0 %v6057_v28, %s7105_s29  ;;  %6063 = vrot.lane.b32.xlu1 %v6062_v29, %s7105_s29 }
  0x41   : > { %6068 = vrot.lane.b32.xlu0 %v7109_v30, %s7105_s29  ;;  %6073 = vrot.lane.b32.xlu1 %v6057_v28, %s7106_s30 }
  0x45   : > { %6078 = vrot.lane.b32.xlu0 %v6062_v29, %s7106_s30  ;;  %6083 = vrot.lane.b32.xlu1 %v7109_v30, %s7106_s30 }
  0x49   : > { %6088 = vrot.lane.b32.xlu0 %v6057_v28, %s7107_s7  ;;  %6093 = vrot.lane.b32.xlu1 %v6062_v29, %s7107_s7 }
  0x4d   : > { %6098 = vrot.lane.b32.xlu0 %v7109_v30, %s7107_s7  ;;  %6103 = vrot.lane.b32.xlu1 %v6102_v35, %s7105_s29 }
  0x51   : > { %6108 = vrot.lane.b32.xlu0 %v6107_v40, %s7105_s29  ;;  %6113 = vrot.lane.b32.xlu1 %v6112_v41, %s7105_s29 }
  0x55   : > { %6118 = vrot.lane.b32.xlu0 %v6102_v35, %s7106_s30  ;;  %6123 = vrot.lane.b32.xlu1 %v6107_v40, %s7106_s30 }
  0x59   : > { %6128 = vrot.lane.b32.xlu0 %v6112_v41, %s7106_s30  ;;  %6133 = vrot.lane.b32.xlu1 %v6102_v35, %s7107_s7 }
  0x5d   : > { %6138 = vrot.lane.b32.xlu0 %v6107_v40, %s7107_s7  ;;  %6143 = vrot.lane.b32.xlu1 %v6112_v41, %s7107_s7 }
  0x61   : > { %6148 = vrot.lane.b32.xlu0 %v7109_v30, %s7105_s29  ;;  %6153 = vrot.lane.b32.xlu1 %v6152_v46, %s7105_s29 }
  0x65   : > { %6158 = vrot.lane.b32.xlu0 %v6157_v49, %s7105_s29  ;;  %6163 = vrot.lane.b32.xlu1 %v7109_v30, %s7106_s30 }
  0x69   : > { %6168 = vrot.lane.b32.xlu0 %v6152_v46, %s7106_s30  ;;  %6173 = vrot.lane.b32.xlu1 %v6157_v49, %s7106_s30 }
  0x6d   : > { %6178 = vrot.lane.b32.xlu0 %v7109_v30, %s7107_s7  ;;  %6183 = vrot.lane.b32.xlu1 %v6152_v46, %s7107_s7 }
  0x71   : > { %6188 = vrot.lane.b32.xlu0 %v6157_v49, %s7107_s7  ;;  %6193 = vrot.lane.b32.xlu1 %v6192_v52, %s7105_s29 }
  0x75   : > { %6198 = vrot.lane.b32.xlu0 %v6197_v57, %s7105_s29  ;;  %6203 = vrot.lane.b32.xlu1 %v6202_v58, %s7105_s29 }
  0x79   : > { %6208 = vrot.lane.b32.xlu0 %v6192_v52, %s7106_s30  ;;  %6213 = vrot.lane.b32.xlu1 %v6197_v57, %s7106_s30 }
  0x7d   : > { %6218 = vrot.lane.b32.xlu0 %v6202_v58, %s7106_s30  ;;  %6223 = vrot.lane.b32.xlu1 %v6192_v52, %s7107_s7 }
  0x81   : > { %6228 = vrot.lane.b32.xlu0 %v6197_v57, %s7107_s7  ;;  %6233 = vrot.lane.b32.xlu1 %v6202_v58, %s7107_s7  ;;  %v5901_v57 = vld [vmem:[%s7165_s28 + $0x1c8] sm:$0xff] }
  0x85   : > { %6238 = vrot.lane.b32.xlu0 %v6237_v61, %s7105_s29  ;;  %6243 = vrot.lane.b32.xlu1 %v7109_v30, %s7105_s29 }
  0x89   : > { %6248 = vrot.lane.b32.xlu0 %v6247_v0, %s7105_s29  ;;  %6253 = vrot.lane.b32.xlu1 %v6237_v61, %s7106_s30 }
  0x8b   : > { %v5969_v5 = vpop.permute.xlu0 %5968  ;;  %v7351_v8 = vpop.permute.xlu1 %5978 }
  0x8c   : > { %v5971_v9 = vunpack.i.h.bf16 %v5969_v5  ;;  %v5970_v12 = vunpack.i.l.bf16 %v5969_v5  ;;  %v11444_v16 = vunpack.i.h.bf16 %v7351_v8  ;;  %v11450_v17 = vunpack.i.l.bf16 %v7351_v8 }
  0x8d   : > { %6258 = vrot.lane.b32.xlu0 %v7109_v30, %s7106_s30  ;;  %6263 = vrot.lane.b32.xlu1 %v6247_v0, %s7106_s30  ;;  %v6287_v5 = vpack.i.bf16 %v5903_v51, %v5895_v50 }
  0x8e   : > { %v689_v40 = vsel %vm622_vm0, %v11450_v17, %v5970_v12  ;;  %v690_v41 = vsel %vm622_vm0, %v11444_v16, %v5971_v9  ;;  %v7054_v16 = vld [vmem:[%s7165_s28 + $0x178] sm:$0xff] }
  0x8f   : > { %v7361_v28 = vpop.permute.xlu0 %5973  ;;  %v5984_v38 = vpop.permute.xlu1 %5983 }
  0x90   : > { %v11370_v29 = vunpack.i.h.bf16 %v7361_v28  ;;  %v11369_v35 = vunpack.i.l.bf16 %v7361_v28  ;;  %v5986_v46 = vunpack.i.h.bf16 %v5984_v38  ;;  %v5985_v47 = vunpack.i.l.bf16 %v5984_v38 }
  0x91   : > { %6268 = vrot.lane.b32.xlu0 %v6237_v61, %s7107_s7  ;;  %6273 = vrot.lane.b32.xlu1 %v7109_v30, %s7107_s7  ;;  %v697_v61 = vpack.c.bf16 %v690_v41, %v689_v40 }
  0x92   : > { %v687_v48 = vsel %vm622_vm0, %v5970_v12, %v11369_v35  ;;  %v688_v49 = vsel %vm622_vm0, %v5971_v9, %v11370_v29  ;;  %v6292_v9 = vpack.i.bf16 %v5901_v57, %v5893_v56  ;;  %v5905_v35 = vld [vmem:[%s7165_s28 + $0x1e8] sm:$0xff] }
  0x93   : > { %v7388_v52 = vpop.permute.xlu0 %5988  ;;  %v698_v55 = vpack.c.bf16 %v688_v49, %v687_v48  ;;  %v7395_v60 = vpop.permute.xlu1 %5993 }
  0x94   : > { %v11368_v58 = vunpack.i.h.bf16 %v7388_v52  ;;  %v11367_v59 = vunpack.i.l.bf16 %v7388_v52  ;;  %v11437_v62 = vunpack.i.h.bf16 %v7395_v60  ;;  %v11442_v63 = vunpack.i.l.bf16 %v7395_v60 }
  0x95   : > { %1843 = vmatprep.subr.bf16.mxu1 %v698_v55  ;;  %6278 = vrot.lane.b32.xlu0 %v6247_v0, %s7107_s7 }
  0x96   : > { %6283 = vrot.lane.b32.xlu1 %v7366_v39, %s7105_s29  ;;  %1844 = vmatpush1.bf16.msra.mxu1 %v697_v61  ;;  %v1048_v12 = vsel %vm983_vm1, %v5985_v47, %v11367_v59  ;;  %v1049_v19 = vsel %vm983_vm1, %v5986_v46, %v11368_v58  ;;  %v1050_v0 = vsel %vm983_vm1, %v11442_v63, %v5985_v47  ;;  %v5907_v59 = vld [vmem:[%s7165_s28 + $0x1f8] sm:$0xff]  ;;  %v5897_v58 = vld [vmem:[%s7165_s28 + $0x1a8] sm:$0xff] }
  0x97   : > { %v5999_v21 = vpop.permute.xlu0 %5998  ;;  %v1059_v38 = vpack.c.bf16 %v1049_v19, %v1048_v12  ;;  %v1051_v40 = vsel %vm983_vm1, %v11437_v62, %v5986_v46  ;;  %v7418_v49 = vpop.permute.xlu1 %6003 }
  0x98   : > { %v6001_v41 = vunpack.i.h.bf16 %v5999_v21  ;;  %v6000_v48 = vunpack.i.l.bf16 %v5999_v21  ;;  %v1058_v50 = vpack.c.bf16 %v1051_v40, %v1050_v0  ;;  %v11365_v51 = vunpack.i.h.bf16 %v7418_v49 }
  0x99   : > { %v11366_v55 = vunpack.i.l.bf16 %v7418_v49  ;;  %6288 = vrot.lane.b32.xlu0 %v6287_v5, %s7105_s29  ;;  %1845 = vmatprep.subr.bf16.mxu1 %v1059_v38 }
  0x9a   : > { %6293 = vrot.lane.b32.xlu1 %v6292_v9, %s7105_s29  ;;  %1846 = vmatpush1.bf16.msra.mxu1 %v1058_v50  ;;  %v1410_v56 = vsel %vm1344_vm2, %v6001_v41, %v11365_v51 }
  0x9b   : > { %v7425_v47 = vpop.permute.xlu0 %6008  ;;  %v1409_v46 = vsel %vm1344_vm2, %v6000_v48, %v11366_v55  ;;  %v6014_v12 = vpop.permute.xlu1 %6013 }
  0x9c   : > { %v11427_v57 = vunpack.i.h.bf16 %v7425_v47  ;;  %v11429_v61 = vunpack.i.l.bf16 %v7425_v47  ;;  %v1420_v19 = vpack.c.bf16 %v1410_v56, %v1409_v46  ;;  %v6016_v21 = vunpack.i.h.bf16 %v6014_v12 }
  0x9d   : > { %6298 = vrot.lane.b32.xlu0 %v7366_v39, %s7106_s30  ;;  %v6015_v38 = vunpack.i.l.bf16 %v6014_v12 }
  0x9e   : > { %6303 = vrot.lane.b32.xlu1 %v6287_v5, %s7106_s30  ;;  %1847 = vmatprep.subr.bf16.mxu1 %v1420_v19  ;;  %v1411_v0 = vsel %vm1344_vm2, %v11429_v61, %v6000_v48  ;;  %v1412_v40 = vsel %vm1344_vm2, %v11427_v57, %v6001_v41 }
  0x9f   : > { %v7448_v50 = vpop.permute.xlu0 %6018  ;;  %v1419_v46 = vpack.c.bf16 %v1412_v40, %v1411_v0  ;;  %v7452_v19 = vpop.permute.xlu1 %6023 }
  0xa0   : > { %v11364_v56 = vunpack.i.h.bf16 %v7448_v50  ;;  %v11363_v12 = vunpack.i.l.bf16 %v7448_v50  ;;  %v11376_v3 = vunpack.i.h.bf16 %v7452_v19  ;;  %v11426_v48 = vunpack.i.l.bf16 %v7452_v19 }
  0xa1   : > { %6308 = vrot.lane.b32.xlu0 %v6292_v9, %s7106_s30  ;;  %1848 = vmatpush1.bf16.msra.mxu1 %v1419_v46  ;;  %v5906_v46 = vld [vmem:[%s7165_s28 + $0x1f0] sm:$0xff] }
  0xa2   : > { %6313 = vrot.lane.b32.xlu1 %v7366_v39, %s7107_s7  ;;  %1849 = vmatprep.subr.bf16.mxu1 %v1564_v15  ;;  %v679_v41 = vsel %vm622_vm0, %v6015_v38, %v11363_v12  ;;  %v680_v0 = vsel %vm622_vm0, %v6016_v21, %v11364_v56  ;;  %v681_v40 = vsel %vm622_vm0, %v11426_v48, %v6015_v38  ;;  %v5898_v39 = vld [vmem:[%s7165_s28 + $0x1b0] sm:$0xff]  ;;  %v7485_v38 = vld [vmem:[%s11356_s1] sm:$0xff]  }
  0xa3   : > { %v682_v6 = vsel %vm622_vm0, %v11376_v3, %v6016_v21  ;;  %v6029_v7 = vpop.permute.xlu0 %6028  ;;  %v702_v15 = vpack.c.bf16 %v680_v0, %v679_v41  ;;  %v7480_v51 = vpop.permute.xlu1 %6033  ;;  %v5899_v0 = vld [vmem:[%s7165_s28 + $0x1b8] sm:$0xff] }
  0xa4   : > { %v6031_v12 = vunpack.i.h.bf16 %v6029_v7  ;;  %v6030_v56 = vunpack.i.l.bf16 %v6029_v7  ;;  %v11371_v55 = vunpack.i.h.bf16 %v7480_v51  ;;  %v11372_v21 = vunpack.i.l.bf16 %v7480_v51 }
  0xa5   : > { %6318 = vrot.lane.b32.xlu0 %v6287_v5, %s7107_s7  ;;  %1850 = vmatpush1.bf16.msra.mxu1 %v1563_v18  ;;  %v701_v41 = vpack.c.bf16 %v682_v6, %v681_v40  ;;  %v7495_v7 = vpack.i.bf16 %v5906_v46, %v5898_v39  ;;  %v7516_v6 = vpack.i.bf16 %v5907_v59, %v5899_v0 }
  0xa6   : > { %6323 = vrot.lane.b32.xlu1 %v6292_v9, %s7107_s7  ;;  %1929 = vmatprep.subr.bf16.mxu1 %v702_v15  ;;  %v1040_v5 = vsel %vm983_vm1, %v6030_v56, %v11372_v21  ;;  %v1041_v1 = vsel %vm983_vm1, %v6031_v12, %v11371_v55  ;;  %v7518_v15 = vpack.i.bf16 %v5905_v35, %v5897_v58 }
  0xa7   : > { %v7500_v29 = vpop.permute.xlu0 %6038  ;;  %v6044_v9 = vpop.permute.xlu1 %6043  ;;  %v1063_v40 = vpack.c.bf16 %v1041_v1, %v1040_v5 }
  0xa8   : > { %v11373_v2 = vunpack.i.h.bf16 %v7500_v29  ;;  %v11375_v18 = vunpack.i.l.bf16 %v7500_v29  ;;  %5910 = vmatmul.mubr.msk.bf16.vlgmr.msra.gmra.mrb[0].mxu1 %vm1796_vm3, %v7485_v38  ;;  %v6046_v55 = vunpack.i.h.bf16 %v6044_v9  ;;  %v6045_v5 = vunpack.i.l.bf16 %v6044_v9 }
  0xa9   : > { %6328 = vrot.lane.b32.xlu0 %v7109_v30, %s7105_s29  ;;  %1930 = vmatpush1.bf16.msra.mxu1 %v701_v41 }
  0xaa   : > { %v1042_v39 = vsel %vm983_vm1, %v11375_v18, %v6030_v56  ;;  %v1043_v46 = vsel %vm983_vm1, %v11373_v2, %v6031_v12  ;;  %6333 = vrot.lane.b32.xlu1 %v7495_v7, %s7105_s29  ;;  %1931 = vmatprep.subr.bf16.mxu1 %v1063_v40 }
  0xab   : > { %v7530_v59 = vpop.permute.xlu0 %6048  ;;  %v1062_v35 = vpack.c.bf16 %v1043_v46, %v1042_v39  ;;  %1961 = vmatprep.mubr.bf16.mxu1 %v11451_v20  ;;  %v7535_v41 = vpop.permute.xlu1 %6053 }
  0xac   : > { %v11377_v58 = vunpack.i.h.bf16 %v7530_v59  ;;  %v11374_v56 = vunpack.i.l.bf16 %v7530_v59  ;;  %v11400_v0 = vunpack.i.h.bf16 %v7535_v41  ;;  %v11421_v12 = vunpack.i.l.bf16 %v7535_v41 }
  0xad   : > { %6338 = vrot.lane.b32.xlu0 %v7516_v6, %s7105_s29  ;;  %1932 = vmatpush1.bf16.msra.mxu1 %v1062_v35 }
  0xae   : > { %6343 = vrot.lane.b32.xlu1 %v7518_v15, %s7105_s29  ;;  %v1401_v1 = vsel %vm1344_vm2, %v6045_v5, %v11374_v56  ;;  %v1402_v9 = vsel %vm1344_vm2, %v6046_v55, %v11377_v58  ;;  %v1403_v40 = vsel %vm1344_vm2, %v11421_v12, %v6045_v5  ;;  %v1404_v39 = vsel %vm1344_vm2, %v11400_v0, %v6046_v55 }
  0xaf   : > { %v6059_v46 = vpop.permute.xlu0 %6058  ;;  %v1424_v35 = vpack.c.bf16 %v1402_v9, %v1401_v1  ;;  %v7559_v56 = vpop.permute.xlu1 %6063  ;;  %v1423_v18 = vpack.c.bf16 %v1404_v39, %v1403_v40 }
  0xb0   : > { %v6061_v21 = vunpack.i.h.bf16 %v6059_v46  ;;  %v6060_v2 = vunpack.i.l.bf16 %v6059_v46  ;;  %v11378_v3 = vunpack.i.h.bf16 %v7559_v56  ;;  %v11381_v58 = vunpack.i.l.bf16 %v7559_v56 }
  0xb1   : > { %6348 = vrot.lane.b32.xlu0 %v7109_v30, %s7106_s30  ;;  %1933 = vmatprep.subr.bf16.mxu1 %v1424_v35 }
  0xb2   : > { %6353 = vrot.lane.b32.xlu1 %v7495_v7, %s7106_s30  ;;  %1934 = vmatpush1.bf16.msra.mxu1 %v1423_v18  ;;  %v671_v5 = vsel %vm622_vm0, %v6060_v2, %v11381_v58  ;;  %v672_v1 = vsel %vm622_vm0, %v6061_v21, %v11378_v3 }
  0xb3   : > { %v7567_v55 = vpop.permute.xlu0 %6068  ;;  %1935 = vmatprep.subr.bf16.mxu1 %v1568_v22  ;;  %v6074_v40 = vpop.permute.xlu1 %6073  ;;  %v706_v13 = vpack.c.bf16 %v672_v1, %v671_v5 }
  0xb4   : > { %v11382_v9 = vunpack.i.h.bf16 %v7567_v55  ;;  %v11399_v18 = vunpack.i.l.bf16 %v7567_v55  ;;  %v6076_v39 = vunpack.i.h.bf16 %v6074_v40  ;;  %v6075_v46 = vunpack.i.l.bf16 %v6074_v40 }
  0xb5   : > { %6358 = vrot.lane.b32.xlu0 %v7516_v6, %s7106_s30 }
  0xb6   : > { %v673_v14 = vsel %vm622_vm0, %v11399_v18, %v6060_v2  ;;  %v674_v22 = vsel %vm622_vm0, %v11382_v9, %v6061_v21  ;;  %6363 = vrot.lane.b32.xlu1 %v7518_v15, %s7106_s30  ;;  %1936 = vmatpush1.bf16.msra.mxu1 %v1567_v23  ;;  %v270_v23 = vld [vmem:[%s7165_s28 + $0x18] sm:$0xff] }
  0xb7   : > { %v7597_v35 = vpop.permute.xlu0 %6078  ;;  %2015 = vmatprep.subr.bf16.mxu1 %v706_v13  ;;  %v705_v2 = vpack.c.bf16 %v674_v22, %v673_v14  ;;  %v7601_v21 = vpop.permute.xlu1 %6083  ;;  %v278_v13 = vld [vmem:[%s7165_s28 + $0x58] sm:$0xff] }
  0xb8   : > { %v11380_v5 = vunpack.i.h.bf16 %v7597_v35  ;;  %v11379_v1 = vunpack.i.l.bf16 %v7597_v35  ;;  %v11390_v40 = vunpack.i.h.bf16 %v7601_v21  ;;  %v11383_v3 = vunpack.i.l.bf16 %v7601_v21 }
  0xb9   : > { %6368 = vrot.lane.b32.xlu0 %v7109_v30, %s7107_s7  ;;  %5912 = vmatmul.mubr.msk.bf16.vlgmr.msra.gmra.mrb[4].mxu1 %vm1796_vm3, %v7485_v38 }
  0xba   : > { %6373 = vrot.lane.b32.xlu1 %v7495_v7, %s7107_s7  ;;  %2016 = vmatpush1.bf16.msra.mxu1 %v705_v2  ;;  %v1032_v10 = vsel %vm983_vm1, %v6075_v46, %v11379_v1  ;;  %v1033_v11 = vsel %vm983_vm1, %v6076_v39, %v11380_v5  ;;  %v1034_v30 = vsel %vm983_vm1, %v11383_v3, %v6075_v46 }
  0xbb   : > { %v1035_v7 = vsel %vm983_vm1, %v11390_v40, %v6076_v39  ;;  %v6089_v14 = vpop.permute.xlu0 %6088  ;;  %v1067_v22 = vpack.c.bf16 %v1033_v11, %v1032_v10  ;;  %2047 = vmatprep.mubr.bf16.mxu1 %v11451_v20  ;;  %v7630_v5 = vpop.permute.xlu1 %6093  ;;  %v6387_v3 = vpack.i.bf16 %v278_v13, %v270_v23  ;;  %v274_v39 = vld [vmem:[%s7165_s28 + $0x38] sm:$0xff] }
  0xbc   : > { %v6091_v2 = vunpack.i.h.bf16 %v6089_v14  ;;  %v6090_v1 = vunpack.i.l.bf16 %v6089_v14  ;;  %v1066_v58 = vpack.c.bf16 %v1035_v7, %v1034_v30  ;;  %v11384_v9 = vunpack.i.h.bf16 %v7630_v5  ;;  %v282_v10 = vld [vmem:[%s7165_s28 + $0x78] sm:$0xff] }
  0xbd   : > { %v11385_v46 = vunpack.i.l.bf16 %v7630_v5  ;;  %6378 = vrot.lane.b32.xlu0 %v7516_v6, %s7107_s7  ;;  %2017 = vmatprep.subr.bf16.mxu1 %v1067_v22  ;;  %v6402_v7 = vpack.i.bf16 %v282_v10, %v274_v39 }
  0xbe   : > { %6383 = vrot.lane.b32.xlu1 %v7518_v15, %s7107_s7  ;;  %2018 = vmatpush1.bf16.msra.mxu1 %v1066_v58  ;;  %v1394_v6 = vsel %vm1344_vm2, %v6091_v2, %v11384_v9 }
  0xbf   : > { %v7640_v11 = vpop.permute.xlu0 %6098  ;;  %v1393_v30 = vsel %vm1344_vm2, %v6090_v1, %v11385_v46  ;;  %v6104_v15 = vpop.permute.xlu1 %6103 }
  0xc0   : > { %v11388_v23 = vunpack.i.h.bf16 %v7640_v11  ;;  %v11386_v13 = vunpack.i.l.bf16 %v7640_v11  ;;  %v1428_v58 = vpack.c.bf16 %v1394_v6, %v1393_v30  ;;  %v6106_v9 = vunpack.i.h.bf16 %v6104_v15 }
  0xc1   : > { %6388 = vrot.lane.b32.xlu0 %v6387_v3, %s7105_s29  ;;  %v6105_v46 = vunpack.i.l.bf16 %v6104_v15 }
  0xc2   : > { %v1395_v14 = vsel %vm1344_vm2, %v11386_v13, %v6090_v1  ;;  %v1396_v22 = vsel %vm1344_vm2, %v11388_v23, %v6091_v2  ;;  %6393 = vrot.lane.b32.xlu1 %v6387_v3, %s7106_s30  ;;  %2019 = vmatprep.subr.bf16.mxu1 %v1428_v58 }
  0xc3   : > { %v7662_v30 = vpop.permute.xlu0 %6108  ;;  %v1427_v39 = vpack.c.bf16 %v1396_v22, %v1395_v14  ;;  %v7666_v1 = vpop.permute.xlu1 %6113  ;;  %v5862_v14 = vld [vmem:[%s7165_s28 + $0x90] sm:$0xff] }
  0xc4   : > { %v11389_v10 = vunpack.i.h.bf16 %v7662_v30  ;;  %v11387_v6 = vunpack.i.l.bf16 %v7662_v30  ;;  %v11397_v13 = vunpack.i.h.bf16 %v7666_v1  ;;  %v11391_v2 = vunpack.i.l.bf16 %v7666_v1  ;;  %v5870_v22 = vld [vmem:[%s7165_s28 + $0xd0] sm:$0xff] }
  0xc5   : > { %6398 = vrot.lane.b32.xlu0 %v6387_v3, %s7107_s7  ;;  %2020 = vmatpush1.bf16.msra.mxu1 %v1427_v39 }
  0xc6   : > { %6403 = vrot.lane.b32.xlu1 %v6402_v7, %s7105_s29  ;;  %2021 = vmatprep.subr.bf16.mxu1 %v1572_v33  ;;  %v663_v15 = vsel %vm622_vm0, %v6105_v46, %v11387_v6  ;;  %v664_v58 = vsel %vm622_vm0, %v6106_v9, %v11389_v10  ;;  %v665_v3 = vsel %vm622_vm0, %v11391_v2, %v6105_v46 }
  0xc7   : > { %v666_v26 = vsel %vm622_vm0, %v11397_v13, %v6106_v9  ;;  %v6119_v27 = vpop.permute.xlu0 %6118  ;;  %v710_v33 = vpack.c.bf16 %v664_v58, %v663_v15  ;;  %v7693_v23 = vpop.permute.xlu1 %6123  ;;  %v6417_v46 = vpack.i.bf16 %v5870_v22, %v5862_v14  ;;  %v5866_v9 = vld [vmem:[%s7165_s28 + $0xb0] sm:$0xff] }
  0xc8   : > { %v6121_v39 = vunpack.i.h.bf16 %v6119_v27  ;;  %v6120_v6 = vunpack.i.l.bf16 %v6119_v27  ;;  %v11392_v10 = vunpack.i.h.bf16 %v7693_v23  ;;  %v11394_v40 = vunpack.i.l.bf16 %v7693_v23  ;;  %v5874_v15 = vld [vmem:[%s7165_s28 + $0xf0] sm:$0xff] }
  0xc9   : > { %6408 = vrot.lane.b32.xlu0 %v6402_v7, %s7106_s30  ;;  %2022 = vmatpush1.bf16.msra.mxu1 %v1571_v34  ;;  %v709_v2 = vpack.c.bf16 %v666_v26, %v665_v3  ;;  %v6432_v22 = vpack.i.bf16 %v5874_v15, %v5866_v9 }
  0xca   : > { %6413 = vrot.lane.b32.xlu1 %v6402_v7, %s7107_s7  ;;  %2101 = vmatprep.subr.bf16.mxu1 %v710_v33  ;;  %v1024_v27 = vsel %vm983_vm1, %v6120_v6, %v11394_v40  ;;  %v1025_v24 = vsel %vm983_vm1, %v6121_v39, %v11392_v10 }
  0xcb   : > { %v7704_v58 = vpop.permute.xlu0 %6128  ;;  %v6134_v7 = vpop.permute.xlu1 %6133  ;;  %v1071_v14 = vpack.c.bf16 %v1025_v24, %v1024_v27 }
  0xcc   : > { %v11395_v25 = vunpack.i.h.bf16 %v7704_v58  ;;  %v11396_v34 = vunpack.i.l.bf16 %v7704_v58  ;;  %5914 = vmatmul.mubr.msk.bf16.vlgmr.msra.gmra.mrb[8].mxu1 %vm1796_vm3, %v7485_v38  ;;  %v6136_v33 = vunpack.i.h.bf16 %v6134_v7  ;;  %v6135_v10 = vunpack.i.l.bf16 %v6134_v7 }
  0xcd   : > { %6418 = vrot.lane.b32.xlu0 %v6417_v46, %s7105_s29  ;;  %2102 = vmatpush1.bf16.msra.mxu1 %v709_v2 }
  0xce   : > { %v1026_v3 = vsel %vm983_vm1, %v11396_v34, %v6120_v6  ;;  %v1027_v26 = vsel %vm983_vm1, %v11395_v25, %v6121_v39  ;;  %6423 = vrot.lane.b32.xlu1 %v6417_v46, %s7106_s30  ;;  %2103 = vmatprep.subr.bf16.mxu1 %v1071_v14 }
  0xcf   : > { %v7728_v27 = vpop.permute.xlu0 %6138  ;;  %v1070_v2 = vpack.c.bf16 %v1027_v26, %v1026_v3  ;;  %2133 = vmatprep.mubr.bf16.mxu1 %v11451_v20  ;;  %v7733_v15 = vpop.permute.xlu1 %6143  ;;  %v5877_v3 = vld [vmem:[%s7165_s28 + $0x108] sm:$0xff] }
  0xd0   : > { %v11398_v9 = vunpack.i.h.bf16 %v7728_v27  ;;  %v11393_v6 = vunpack.i.l.bf16 %v7728_v27  ;;  %v11402_v39 = vunpack.i.h.bf16 %v7733_v15  ;;  %v11401_v24 = vunpack.i.l.bf16 %v7733_v15  ;;  %v5885_v26 = vld [vmem:[%s7165_s28 + $0x148] sm:$0xff] }
  0xd1   : > { %6428 = vrot.lane.b32.xlu0 %v6417_v46, %s7107_s7  ;;  %2104 = vmatpush1.bf16.msra.mxu1 %v1070_v2 }
  0xd2   : > { %6433 = vrot.lane.b32.xlu1 %v6432_v22, %s7105_s29  ;;  %v1385_v7 = vsel %vm1344_vm2, %v6135_v10, %v11393_v6  ;;  %v1386_v14 = vsel %vm1344_vm2, %v6136_v33, %v11398_v9  ;;  %v1387_v46 = vsel %vm1344_vm2, %v11401_v24, %v6135_v10  ;;  %v1388_v2 = vsel %vm1344_vm2, %v11402_v39, %v6136_v33  ;;  %v5881_v24 = vld [vmem:[%s7165_s28 + $0x128] sm:$0xff] }
  0xd3   : > { %v6149_v6 = vpop.permute.xlu0 %6148  ;;  %v1432_v40 = vpack.c.bf16 %v1386_v14, %v1385_v7  ;;  %v7757_v13 = vpop.permute.xlu1 %6153  ;;  %v1431_v9 = vpack.c.bf16 %v1388_v2, %v1387_v46  ;;  %v6447_v10 = vpack.i.bf16 %v5885_v26, %v5877_v3  ;;  %v5889_v33 = vld [vmem:[%s7165_s28 + $0x168] sm:$0xff] }
  0xd4   : > { %v6151_v25 = vunpack.i.h.bf16 %v6149_v6  ;;  %v6150_v34 = vunpack.i.l.bf16 %v6149_v6  ;;  %v11405_v18 = vunpack.i.h.bf16 %v7757_v13  ;;  %v11406_v0 = vunpack.i.l.bf16 %v7757_v13 }
  0xd5   : > { %6438 = vrot.lane.b32.xlu0 %v6432_v22, %s7106_s30  ;;  %2105 = vmatprep.subr.bf16.mxu1 %v1432_v40  ;;  %v6462_v36 = vpack.i.bf16 %v5889_v33, %v5881_v24 }
  0xd6   : > { %6443 = vrot.lane.b32.xlu1 %v6432_v22, %s7107_s7  ;;  %2106 = vmatpush1.bf16.msra.mxu1 %v1431_v9  ;;  %v655_v6 = vsel %vm622_vm0, %v6150_v34, %v11406_v0  ;;  %v656_v40 = vsel %vm622_vm0, %v6151_v25, %v11405_v18 }
  0xd7   : > { %v7765_v39 = vpop.permute.xlu0 %6158  ;;  %2107 = vmatprep.subr.bf16.mxu1 %v1576_v42  ;;  %v6164_v7 = vpop.permute.xlu1 %6163  ;;  %v714_v14 = vpack.c.bf16 %v656_v40, %v655_v6  ;;  %v5900_v40 = vld [vmem:[%s7165_s28 + $0x1c0] sm:$0xff] }
  0xd8   : > { %v11419_v22 = vunpack.i.h.bf16 %v7765_v39  ;;  %v11420_v9 = vunpack.i.l.bf16 %v7765_v39  ;;  %v6166_v3 = vunpack.i.h.bf16 %v6164_v7  ;;  %v6165_v26 = vunpack.i.l.bf16 %v6164_v7 }
  0xd9   : > { %6448 = vrot.lane.b32.xlu0 %v6447_v10, %s7105_s29 }
  0xda   : > { %v657_v37 = vsel %vm622_vm0, %v11420_v9, %v6150_v34  ;;  %v658_v42 = vsel %vm622_vm0, %v11419_v22, %v6151_v25  ;;  %6453 = vrot.lane.b32.xlu1 %v6447_v10, %s7106_s30  ;;  %2108 = vmatpush1.bf16.msra.mxu1 %v1575_v43  ;;  %v5892_v43 = vld [vmem:[%s7165_s28 + $0x180] sm:$0xff] }
  0xdb   : > { %v7793_v24 = vpop.permute.xlu0 %6168  ;;  %2187 = vmatprep.subr.bf16.mxu1 %v714_v14  ;;  %v713_v46 = vpack.c.bf16 %v658_v42, %v657_v37  ;;  %v7797_v33 = vpop.permute.xlu1 %6173  ;;  %v6477_v0 = vpack.i.bf16 %v5900_v40, %v5892_v43 }
  0xdc   : > { %v11404_v34 = vunpack.i.h.bf16 %v7793_v24  ;;  %v11403_v2 = vunpack.i.l.bf16 %v7793_v24  ;;  %v11409_v25 = vunpack.i.h.bf16 %v7797_v33  ;;  %v11410_v6 = vunpack.i.l.bf16 %v7797_v33 }
  0xdd   : > { %6458 = vrot.lane.b32.xlu0 %v6447_v10, %s7107_s7  ;;  %5916 = vmatmul.mubr.msk.bf16.vlgmr.msra.gmra.mrb[12].mxu1 %vm1796_vm3, %v7485_v38 }
  0xde   : > { %6463 = vrot.lane.b32.xlu1 %v6462_v36, %s7105_s29  ;;  %2188 = vmatpush1.bf16.msra.mxu1 %v713_v46  ;;  %v1016_v31 = vsel %vm983_vm1, %v6165_v26, %v11403_v2  ;;  %v1017_v32 = vsel %vm983_vm1, %v6166_v3, %v11404_v34  ;;  %v1018_v10 = vsel %vm983_vm1, %v11410_v6, %v6165_v26 }
  0xdf   : > { %v1019_v7 = vsel %vm983_vm1, %v11409_v25, %v6166_v3  ;;  %v6179_v14 = vpop.permute.xlu0 %6178  ;;  %v1075_v37 = vpack.c.bf16 %v1017_v32, %v1016_v31  ;;  %2219 = vmatprep.mubr.bf16.mxu1 %v11451_v20  ;;  %v7824_v2 = vpop.permute.xlu1 %6183  ;;  %v5896_v3 = vld [vmem:[%s7165_s28 + $0x1a0] sm:$0xff] }
  0xe0   : > { %v6181_v42 = vunpack.i.h.bf16 %v6179_v14  ;;  %v6180_v46 = vunpack.i.l.bf16 %v6179_v14  ;;  %v1074_v34 = vpack.c.bf16 %v1019_v7, %v1018_v10  ;;  %v11408_v18 = vunpack.i.h.bf16 %v7824_v2  ;;  %v5904_v31 = vld [vmem:[%s7165_s28 + $0x1e0] sm:$0xff] }
  0xe1   : > { %v11407_v26 = vunpack.i.l.bf16 %v7824_v2  ;;  %6468 = vrot.lane.b32.xlu0 %v6462_v36, %s7106_s30  ;;  %2189 = vmatprep.subr.bf16.mxu1 %v1075_v37  ;;  %v6492_v40 = vpack.i.bf16 %v5904_v31, %v5896_v3  ;;  %v1580_v37 = vpack.c.bf16 %v7298_v45, %v7295_v44 }
  0xe2   : > { %6473 = vrot.lane.b32.xlu1 %v6462_v36, %s7107_s7  ;;  %2190 = vmatpush1.bf16.msra.mxu1 %v1074_v34  ;;  %v1378_v7 = vsel %vm1344_vm2, %v6181_v42, %v11408_v18 }
  0xe3   : > { %v7832_v32 = vpop.permute.xlu0 %6188  ;;  %v1377_v10 = vsel %vm1344_vm2, %v6180_v46, %v11407_v26  ;;  %v6194_v36 = vpop.permute.xlu1 %6193 }
  0xe4   : > { %v11412_v14 = vunpack.i.h.bf16 %v7832_v32  ;;  %v11414_v43 = vunpack.i.l.bf16 %v7832_v32  ;;  %v1436_v34 = vpack.c.bf16 %v1378_v7, %v1377_v10  ;;  %v6196_v25 = vunpack.i.h.bf16 %v6194_v36 }
  0xe5   : > { %6478 = vrot.lane.b32.xlu0 %v6477_v0, %s7105_s29  ;;  %v6195_v6 = vunpack.i.l.bf16 %v6194_v36 }
  0xe6   : > { %v1379_v26 = vsel %vm1344_vm2, %v11414_v43, %v6180_v46  ;;  %v1380_v18 = vsel %vm1344_vm2, %v11412_v14, %v6181_v42  ;;  %6483 = vrot.lane.b32.xlu1 %v6477_v0, %s7106_s30  ;;  %2191 = vmatprep.subr.bf16.mxu1 %v1436_v34  ;;  %v11447_v43 = vmov 0.0|0.0  }
  0xe7   : > { %v7856_v10 = vpop.permute.xlu0 %6198  ;;  %v1435_v3 = vpack.c.bf16 %v1380_v18, %v1379_v26  ;;  %v7860_v31 = vpop.permute.xlu1 %6203 }
  0xe8   : > { %v11413_v44 = vunpack.i.h.bf16 %v7856_v10  ;;  %v11411_v45 = vunpack.i.l.bf16 %v7856_v10  ;;  %v11417_v46 = vunpack.i.h.bf16 %v7860_v31  ;;  %v11418_v7 = vunpack.i.l.bf16 %v7860_v31 }
  0xe9   : > { %6488 = vrot.lane.b32.xlu0 %v6477_v0, %s7107_s7  ;;  %2192 = vmatpush1.bf16.msra.mxu1 %v1435_v3 }
  0xea   : > { %6493 = vrot.lane.b32.xlu1 %v6492_v40, %s7105_s29  ;;  %2193 = vmatprep.subr.bf16.mxu1 %v1580_v37  ;;  %v647_v18 = vsel %vm622_vm0, %v6195_v6, %v11411_v45  ;;  %v648_v42 = vsel %vm622_vm0, %v6196_v25, %v11413_v44  ;;  %v649_v26 = vsel %vm622_vm0, %v11418_v7, %v6195_v6 }
  0xeb   : > { %v650_v0 = vsel %vm622_vm0, %v11417_v46, %v6196_v25  ;;  %v6209_v36 = vpop.permute.xlu0 %6208  ;;  %v718_v34 = vpack.c.bf16 %v648_v42, %v647_v18  ;;  %v7882_v45 = vpop.permute.xlu1 %6213 }
  0xec   : > { %v6211_v37 = vunpack.i.h.bf16 %v6209_v36  ;;  %v6210_v3 = vunpack.i.l.bf16 %v6209_v36  ;;  %v11416_v14 = vunpack.i.h.bf16 %v7882_v45  ;;  %v11415_v44 = vunpack.i.l.bf16 %v7882_v45  ;;  %v1635_v36 = vld [vmem:[%s11357_s2] sm:$0xff] }
  0xed   : > { %6498 = vrot.lane.b32.xlu0 %v6492_v40, %s7106_s30  ;;  %2194 = vmatpush1.bf16.msra.mxu1 %v11447_v43  ;;  %v717_v6 = vpack.c.bf16 %v650_v0, %v649_v26 }
  0xee   : > { %6503 = vrot.lane.b32.xlu1 %v6492_v40, %s7107_s7  ;;  %2273 = vmatprep.subr.bf16.mxu1 %v718_v34  ;;  %v1008_v18 = vsel %vm983_vm1, %v6210_v3, %v11415_v44  ;;  %v1009_v42 = vsel %vm983_vm1, %v6211_v37, %v11416_v14  ;;  %v1636_v44 = vld [vmem:[%s11357_s2 + $0x8] sm:$0xff] }
  0xef   : > { %v7889_v25 = vpop.permute.xlu0 %6218  ;;  %v6224_v0 = vpop.permute.xlu1 %6223  ;;  %v1079_v34 = vpack.c.bf16 %v1009_v42, %v1008_v18 }
  0xf0   : > { %v11424_v26 = vunpack.i.h.bf16 %v7889_v25  ;;  %v11422_v40 = vunpack.i.l.bf16 %v7889_v25  ;;  %5918 = vmatmul.mubr.msk.bf16.vlgmr.msra.gmra.mrb[16].mxu1 %vm1796_vm3, %v7485_v38  ;;  %v6226_v7 = vunpack.i.h.bf16 %v6224_v0  ;;  %v6225_v22 = vunpack.i.l.bf16 %v6224_v0 }
  0xf1   : > { %2274 = vmatpush1.bf16.msra.mxu1 %v717_v6  ;;  %2305 = vmatprep.mubr.bf16.mxu1 %v11451_v20 }
  0xf2   : > { %v1010_v14 = vsel %vm983_vm1, %v11422_v40, %v6210_v3  ;;  %v1011_v46 = vsel %vm983_vm1, %v11424_v26, %v6211_v37  ;;  %2275 = vmatprep.subr.bf16.mxu1 %v1079_v34  ;;  %1783 = vperm.xlu0 %6507, %v1635_v36   ;;  %v1584_v34 = vpack.c.bf16 %v7323_v54, %v7320_v53 }
  0xf3   : > { %v7918_v18 = vpop.permute.xlu0 %6228  ;;  %v1078_v42 = vpack.c.bf16 %v1011_v46, %v1010_v14  ;;  %1788 = vperm.xlu1 %6508, %v1636_v44   ;;  %v7922_v12 = vpop.permute.xlu1 %6233 }
  0xf4   : > { %v11425_v6 = vunpack.i.h.bf16 %v7918_v18  ;;  %v11423_v9 = vunpack.i.l.bf16 %v7918_v18  ;;  %v11436_v3 = vunpack.i.h.bf16 %v7922_v12  ;;  %v11428_v40 = vunpack.i.l.bf16 %v7922_v12 }
  0xf5   : > { %2276 = vmatpush1.bf16.msra.mxu1 %v1078_v42 }
  0xf6   : > { %v1369_v37 = vsel %vm1344_vm2, %v6225_v22, %v11423_v9  ;;  %v1370_v14 = vsel %vm1344_vm2, %v6226_v7, %v11425_v6  ;;  %v1371_v44 = vsel %vm1344_vm2, %v11428_v40, %v6225_v22  ;;  %v1372_v46 = vsel %vm1344_vm2, %v11436_v3, %v6226_v7  ;;  %v7051_v22 = vld [vmem:[%s7165_s28 + $0x118] sm:$0xff] }
  0xf7   : > { %v6239_v36 = vpop.permute.xlu0 %6238  ;;  %v1440_v0 = vpack.c.bf16 %v1370_v14, %v1369_v37  ;;  %v7944_v26 = vpop.permute.xlu1 %6243  ;;  %v1439_v6 = vpack.c.bf16 %v1372_v46, %v1371_v44  ;;  %v7052_v40 = vld [vmem:[%s7165_s28 + $0x158] sm:$0xff] }
  0xf8   : > { %v6241_v42 = vunpack.i.h.bf16 %v6239_v36  ;;  %v6240_v9 = vunpack.i.l.bf16 %v6239_v36  ;;  %11683 = vst [vmem:[#allocation6_spill] sm:$0xff] %v7944_v26  ;;  %v11430_v48 = vunpack.i.h.bf16 %v7944_v26  ;;  %v11431_v57 = vunpack.i.l.bf16 %v7944_v26 }
  0xf9   : > { %2277 = vmatprep.subr.bf16.mxu1 %v1440_v0  ;;  %v1583_v61 = vpack.c.bf16 %v7052_v40, %v7051_v22 }
  0xfa   : > { %2278 = vmatpush1.bf16.msra.mxu1 %v1439_v6  ;;  %v639_v53 = vsel %vm622_vm0, %v6240_v9, %v11431_v57  ;;  %v640_v54 = vsel %vm622_vm0, %v6241_v42, %v11430_v48 }
  0xfb   : > { %v7950_v7 = vpop.permute.xlu0 %6248  ;;  %2279 = vmatprep.subr.bf16.mxu1 %v1584_v34  ;;  %v6254_v14 = vpop.permute.xlu1 %6253  ;;  %v722_v44 = vpack.c.bf16 %v640_v54, %v639_v53 }
  0xfc   : > { %v11433_v37 = vunpack.i.h.bf16 %v7950_v7  ;;  %v11434_v6 = vunpack.i.l.bf16 %v7950_v7  ;;  %v6256_v36 = vunpack.i.h.bf16 %v6254_v14  ;;  %v6255_v0 = vunpack.i.l.bf16 %v6254_v14 }
  0xfe   : > { %v641_v40 = vsel %vm622_vm0, %v11434_v6, %v6240_v9  ;;  %v642_v46 = vsel %vm622_vm0, %v11433_v37, %v6241_v42  ;;  %2280 = vmatpush1.bf16.msra.mxu1 %v1583_v61 }
  0xff   : > { %v7970_v34 = vpop.permute.xlu0 %6258  ;;  %2359 = vmatprep.subr.bf16.mxu1 %v722_v44  ;;  %v721_v22 = vpack.c.bf16 %v642_v46, %v641_v40  ;;  %v7974_v54 = vpop.permute.xlu1 %6263 }
 0x100   : > { %11684 = vst [vmem:[#allocation7_spill] sm:$0xff] %v7970_v34  ;;  %v11435_v48 = vunpack.i.h.bf16 %v7970_v34  ;;  %v11432_v53 = vunpack.i.l.bf16 %v7970_v34  ;;  %v11440_v9 = vunpack.i.h.bf16 %v7974_v54  ;;  %v11441_v57 = vunpack.i.l.bf16 %v7974_v54 }
 0x101   : > { %5920 = vmatmul.mubr.msk.bf16.vlgmr.msra.gmra.mrb[20].mxu1 %vm1796_vm3, %v7485_v38 }
 0x102   : > { %2360 = vmatpush1.bf16.msra.mxu1 %v721_v22  ;;  %v1000_v61 = vsel %vm983_vm1, %v6255_v0, %v11432_v53  ;;  %v1001_v42 = vsel %vm983_vm1, %v6256_v36, %v11435_v48  ;;  %2391 = vmatprep.mubr.bf16.mxu1 %v11451_v20  ;;  %v1002_v14 = vsel %vm983_vm1, %v11441_v57, %v6255_v0 }
 0x103   : > { %v1003_v44 = vsel %vm983_vm1, %v11440_v9, %v6256_v36  ;;  %v6269_v40 = vpop.permute.xlu0 %6268  ;;  %v1083_v46 = vpack.c.bf16 %v1001_v42, %v1000_v61  ;;  %v7997_v37 = vpop.permute.xlu1 %6273 }
 0x104   : > { %v6271_v22 = vunpack.i.h.bf16 %v6269_v40  ;;  %v6270_v53 = vunpack.i.l.bf16 %v6269_v40  ;;  %11685 = vst [vmem:[#allocation8_spill] sm:$0xff] %v7997_v37  ;;  %v1082_v6 = vpack.c.bf16 %v1003_v44, %v1002_v14  ;;  %v11438_v48 = vunpack.i.h.bf16 %v7997_v37 }
 0x105   : > { %v11439_v3 = vunpack.i.l.bf16 %v7997_v37  ;;  %2361 = vmatprep.subr.bf16.mxu1 %v1083_v46 }
 0x106   : > { %2362 = vmatpush1.bf16.msra.mxu1 %v1082_v6  ;;  %v1362_v0 = vsel %vm1344_vm2, %v6271_v22, %v11438_v48 }
 0x107   : > { %v8001_v62 = vpop.permute.xlu0 %6278  ;;  %v1361_v36 = vsel %vm1344_vm2, %v6270_v53, %v11439_v3 }
 0x108   : > { %v11445_v61 = vunpack.i.h.bf16 %v8001_v62  ;;  %v11443_v42 = vunpack.i.l.bf16 %v8001_v62  ;;  %v6284_v14 = vpop.permute.xlu1 %6283  ;;  %v1444_v6 = vpack.c.bf16 %v1362_v0, %v1361_v36 }
 0x109   : > { %v6286_v46 = vunpack.i.h.bf16 %v6284_v14  ;;  %v6285_v48 = vunpack.i.l.bf16 %v6284_v14 }
 0x10a   : > { %v1363_v44 = vsel %vm1344_vm2, %v11443_v42, %v6270_v53  ;;  %v1364_v40 = vsel %vm1344_vm2, %v11445_v61, %v6271_v22  ;;  %2363 = vmatprep.subr.bf16.mxu1 %v1444_v6  ;;  %v7053_v42 = vld [vmem:[%s7165_s28 + $0x138] sm:$0xff] }
 0x10b   : > { %v8021_v3 = vpop.permute.xlu0 %6288  ;;  %v1443_v9 = vpack.c.bf16 %v1364_v40, %v1363_v44  ;;  %v1587_v22 = vpack.c.bf16 %v7054_v16, %v7053_v42 }
 0x10c   : > { %11686 = vst [vmem:[#allocation9_spill] sm:$0xff] %v8021_v3  ;;  %v11449_v57 = vunpack.i.h.bf16 %v8021_v3  ;;  %v11446_v36 = vunpack.i.l.bf16 %v8021_v3  ;;  %v8025_v0 = vpop.permute.xlu1 %6293 }
 0x10d   : > { %11687 = vst [vmem:[#allocation10_spill] sm:$0xff] %v8025_v0  ;;  %v11455_v63 = vunpack.i.h.bf16 %v8025_v0  ;;  %v11456_v53 = vunpack.i.l.bf16 %v8025_v0  ;;  %2364 = vmatpush1.bf16.msra.mxu1 %v1443_v9 }
 0x10e   : > { %2365 = vmatprep.subr.bf16.mxu1 %v11447_v43  ;;  %v631_v14 = vsel %vm622_vm0, %v6285_v48, %v11446_v36  ;;  %v632_v6 = vsel %vm622_vm0, %v6286_v46, %v11449_v57 }
 0x10f   : > { %v633_v9 = vsel %vm622_vm0, %v11456_v53, %v6285_v48  ;;  %v634_v16 = vsel %vm622_vm0, %v11455_v63, %v6286_v46  ;;  %v6299_v42 = vpop.permute.xlu0 %6298  ;;  %v726_v44 = vpack.c.bf16 %v632_v6, %v631_v14 }
 0x110   : > { %v6301_v40 = vunpack.i.h.bf16 %v6299_v42  ;;  %v6300_v61 = vunpack.i.l.bf16 %v6299_v42  ;;  %v8048_v36 = vpop.permute.xlu1 %6303  ;;  %v725_v17 = vpack.c.bf16 %v634_v16, %v633_v9  ;;  %v11690_v9 = vmov 0  }
 0x111   : > { %11688 = vst [vmem:[#allocation11_spill] sm:$0xff] %v8048_v36  ;;  %v11453_v43 = vunpack.i.h.bf16 %v8048_v36  ;;  %v11454_v57 = vunpack.i.l.bf16 %v8048_v36  ;;  %2366 = vmatpush1.bf16.msra.mxu1 %v1587_v22  ;;  %v7056_v36 = vld [vmem:[%s7165_s28 + $0x1d8] sm:$0xff] }
 0x112   : > { %2445 = vmatprep.subr.bf16.mxu1 %v726_v44 }
 0x113   : > { %v8052_v20 = vpop.permute.xlu0 %6308  ;;  %v992_v48 = vsel %vm983_vm1, %v6300_v61, %v11454_v57  ;;  %v993_v46 = vsel %vm983_vm1, %v6301_v40, %v11453_v43 }
 0x114   : > { %11689 = vst [vmem:[#allocation12_spill] sm:$0xff] %v8052_v20  ;;  %v11458_v14 = vunpack.i.h.bf16 %v8052_v20  ;;  %v11457_v6 = vunpack.i.l.bf16 %v8052_v20  ;;  %v6314_v42 = vpop.permute.xlu1 %6313  ;;  %5922 = vmatmul.mubr.msk.bf16.vlgmr.msra.gmra.mrb[24].mxu1 %vm1796_vm3, %v7485_v38  ;;  %v1087_v22 = vpack.c.bf16 %v993_v46, %v992_v48  ;;  %v7058_v20 = vld [vmem:[%s7165_s28 + $0x1d0] sm:$0xff] }
 0x115   : > { %2446 = vmatpush1.bf16.msra.mxu1 %v725_v17  ;;  %2477 = vmatprep.mubr.bf16.mxu1 %v11690_v9  ;;  %v6316_v43 = vunpack.i.h.bf16 %v6314_v42  ;;  %v6315_v57 = vunpack.i.l.bf16 %v6314_v42 }
 0x116   : > { %v994_v16 = vsel %vm983_vm1, %v11457_v6, %v6300_v61  ;;  %v995_v44 = vsel %vm983_vm1, %v11458_v14, %v6301_v40  ;;  %2447 = vmatprep.subr.bf16.mxu1 %v1087_v22  ;;  %v7055_v14 = vld [vmem:[%s7165_s28 + $0x198] sm:$0xff] }
 0x117   : > { %v8075_v63 = vpop.permute.xlu0 %6318  ;;  %v1086_v17 = vpack.c.bf16 %v995_v44, %v994_v16 }
 0x118   : > { %11691 = vst [vmem:[#allocation13_spill] sm:$0xff] %v8075_v63  ;;  %v11470_v48 = vunpack.i.h.bf16 %v8075_v63  ;;  %v11461_v46 = vunpack.i.l.bf16 %v8075_v63  ;;  %v8079_v53 = vpop.permute.xlu1 %6323 }
 0x119   : > { %v11478_v61 = vunpack.i.h.bf16 %v8079_v53  ;;  %v11477_v6 = vunpack.i.l.bf16 %v8079_v53  ;;  %2448 = vmatpush1.bf16.msra.mxu1 %v1086_v17 }
 0x11a   : > { %v1353_v40 = vsel %vm1344_vm2, %v6315_v57, %v11461_v46  ;;  %v1354_v42 = vsel %vm1344_vm2, %v6316_v43, %v11470_v48  ;;  %v1592_v46 = vpack.c.bf16 %v7056_v36, %v7055_v14  ;;  %v7057_v48 = vld [vmem:[%s7165_s28 + $0x190] sm:$0xff] }
 0x11b   : > { %v1355_v22 = vsel %vm1344_vm2, %v11477_v6, %v6315_v57  ;;  %v1356_v16 = vsel %vm1344_vm2, %v11478_v61, %v6316_v43  ;;  %v6329_v44 = vpop.permute.xlu0 %6328  ;;  %v1448_v17 = vpack.c.bf16 %v1354_v42, %v1353_v40  ;;  %v1591_v26 = vpack.c.bf16 %v7058_v20, %v7057_v48 }
 0x11c   : > { %v6331_v3 = vunpack.i.h.bf16 %v6329_v44  ;;  %v6330_v63 = vunpack.i.l.bf16 %v6329_v44  ;;  %v6334_v37 = vpop.permute.xlu1 %6333  ;;  %v1447_v34 = vpack.c.bf16 %v1356_v16, %v1355_v22  ;;  %v11692_v6 = vunpack.i.l.bf16 %v7351_v8 }
 0x11d   : > { %2449 = vmatprep.subr.bf16.mxu1 %v1448_v17  ;;  %v6336_v0 = vunpack.i.h.bf16 %v6334_v37  ;;  %v6335_v57 = vunpack.i.l.bf16 %v6334_v37  ;;  %v11693_v40 = vunpack.i.h.bf16 %v7351_v8  ;;  %v11695_v61 = vunpack.i.h.bf16 %v7395_v60 }
 0x11e   : > { %2450 = vmatpush1.bf16.msra.mxu1 %v1447_v34  ;;  %v691_v43 = vsel %vm622_vm0, %v6330_v63, %v11692_v6 }
 0x11f   : > { %v692_v36 = vsel %vm622_vm0, %v6331_v3, %v11693_v40  ;;  %v6339_v14 = vpop.permute.xlu0 %6338  ;;  %2451 = vmatprep.subr.bf16.mxu1 %v1592_v46 }
 0x120   : > { %v696_v42 = vpack.c.bf16 %v692_v36, %v691_v43  ;;  %v6341_v22 = vunpack.i.h.bf16 %v6339_v14  ;;  %v6340_v16 = vunpack.i.l.bf16 %v6339_v14  ;;  %v8111_v44 = vpop.permute.xlu1 %6343 }
 0x121   : > { %v11481_v20 = vunpack.i.h.bf16 %v8111_v44  ;;  %v11484_v37 = vunpack.i.l.bf16 %v8111_v44 }
 0x122   : > { %1800 = vmatprep.subr.bf16.mxu0 %v696_v42  ;;  %2452 = vmatpush1.bf16.msra.mxu1 %v1591_v26  ;;  %v693_v34 = vsel %vm622_vm0, %v6340_v16, %v6330_v63  ;;  %v694_v8 = vsel %vm622_vm0, %v6341_v22, %v6331_v3  ;;  %v623_v6 = vsel %vm622_vm0, %v6335_v57, %v6340_v16  ;;  %v11694_v16 = vunpack.i.l.bf16 %v7395_v60 }
 0x123   : > { %v624_v48 = vsel %vm622_vm0, %v6336_v0, %v6341_v22  ;;  %v625_v46 = vsel %vm622_vm0, %v11484_v37, %v6335_v57  ;;  %v626_v26 = vsel %vm622_vm0, %v11481_v20, %v6336_v0  ;;  %v6349_v63 = vpop.permute.xlu0 %6348  ;;  %v695_v17 = vpack.c.bf16 %v694_v8, %v693_v34 }
 0x124   : > { %v730_v43 = vpack.c.bf16 %v624_v48, %v623_v6  ;;  %v6351_v3 = vunpack.i.h.bf16 %v6349_v63  ;;  %v6350_v40 = vunpack.i.l.bf16 %v6349_v63  ;;  %v6354_v36 = vpop.permute.xlu1 %6353  ;;  %v729_v14 = vpack.c.bf16 %v626_v26, %v625_v46 }
 0x125   : > { %1801 = vmatpush1.bf16.msra.mxu0 %v695_v17  ;;  %v6356_v42 = vunpack.i.h.bf16 %v6354_v36  ;;  %v6355_v22 = vunpack.i.l.bf16 %v6354_v36  ;;  %5924 = vmatmul.mubr.msk.bf16.vlgmr.msra.gmra.mrb[28].mxu1 %vm1796_vm3, %v7485_v38 }
 0x126   : > { %2531 = vmatprep.subr.bf16.mxu1 %v730_v43  ;;  %v1052_v57 = vsel %vm983_vm1, %v6350_v40, %v11694_v16  ;;  %v1053_v0 = vsel %vm983_vm1, %v6351_v3, %v11695_v61  ;;  %2563 = vmatprep.mubr.bf16.mxu1 %v11690_v9 }
 0x127   : > { %v6359_v34 = vpop.permute.xlu0 %6358  ;;  %v1057_v8 = vpack.c.bf16 %v1053_v0, %v1052_v57  ;;  %2532 = vmatpush1.bf16.msra.mxu1 %v729_v14 }
 0x128   : > { %v6361_v6 = vunpack.i.h.bf16 %v6359_v34  ;;  %v6360_v48 = vunpack.i.l.bf16 %v6359_v34  ;;  %v8142_v46 = vpop.permute.xlu1 %6363 }
 0x129   : > { %v11479_v26 = vunpack.i.h.bf16 %v8142_v46  ;;  %v11480_v63 = vunpack.i.l.bf16 %v8142_v46  ;;  %1802 = vmatprep.subr.bf16.mxu0 %v1057_v8 }
 0x12a   : > { %v1054_v60 = vsel %vm983_vm1, %v6360_v48, %v6350_v40  ;;  %v1055_v38 = vsel %vm983_vm1, %v6361_v6, %v6351_v3  ;;  %v984_v61 = vsel %vm983_vm1, %v6355_v22, %v6360_v48  ;;  %v985_v17 = vsel %vm983_vm1, %v6356_v42, %v6361_v6 }
 0x12b   : > { %v986_v43 = vsel %vm983_vm1, %v11480_v63, %v6355_v22  ;;  %v987_v36 = vsel %vm983_vm1, %v11479_v26, %v6356_v42  ;;  %v6369_v40 = vpop.permute.xlu0 %6368  ;;  %v1056_v14 = vpack.c.bf16 %v1055_v38, %v1054_v60  ;;  %v1091_v16 = vpack.c.bf16 %v985_v17, %v984_v61  ;;  %v7061_v26 = vld [vmem:[%s7165_s28 + $0x1b8] sm:$0xff] }
 0x12c   : > { %v6371_v3 = vunpack.i.h.bf16 %v6369_v40  ;;  %v6370_v57 = vunpack.i.l.bf16 %v6369_v40  ;;  %v6374_v0 = vpop.permute.xlu1 %6373  ;;  %v1090_v34 = vpack.c.bf16 %v987_v36, %v986_v43  ;;  %v11696_v22 = vunpack.i.l.bf16 %v7425_v47 }
 0x12d   : > { %1803 = vmatpush1.bf16.msra.mxu0 %v1056_v14  ;;  %2533 = vmatprep.subr.bf16.mxu1 %v1091_v16  ;;  %v6376_v8 = vunpack.i.h.bf16 %v6374_v0  ;;  %v6375_v6 = vunpack.i.l.bf16 %v6374_v0  ;;  %v11697_v48 = vunpack.i.h.bf16 %v7425_v47  ;;  %v7059_v16 = vld [vmem:[%s7165_s28] sm:$0xff]  ;;  %v7062_v47 = vld [vmem:[%s7165_s28 + $0x1f8] sm:$0xff] }
 0x12e   : > { %v1413_v42 = vsel %vm1344_vm2, %v6370_v57, %v11696_v22  ;;  %2534 = vmatpush1.bf16.msra.mxu1 %v1090_v34  ;;  %v7060_v0 = vld [vmem:[%s7165_s28 + $0x40] sm:$0xff]  ;;  %v1596_v63 = vpack.c.bf16 %v7062_v47, %v7061_v26 }
 0x12f   : > { %v1414_v60 = vsel %vm1344_vm2, %v6371_v3, %v11697_v48  ;;  %v6379_v38 = vpop.permute.xlu0 %6378  ;;  %v1562_v22 = vpack.c.bf16 %v7060_v0, %v7059_v16 }
 0x130   : > { %v1418_v61 = vpack.c.bf16 %v1414_v60, %v1413_v42  ;;  %v6381_v17 = vunpack.i.h.bf16 %v6379_v38  ;;  %v6380_v43 = vunpack.i.l.bf16 %v6379_v38  ;;  %v8170_v36 = vpop.permute.xlu1 %6383 }
 0x131   : > { %v11483_v40 = vunpack.i.h.bf16 %v8170_v36  ;;  %v11482_v14 = vunpack.i.l.bf16 %v8170_v36 }
 0x132   : > { %1804 = vmatprep.subr.bf16.mxu0 %v1418_v61  ;;  %v1415_v34 = vsel %vm1344_vm2, %v6380_v43, %v6370_v57  ;;  %v1416_v42 = vsel %vm1344_vm2, %v6381_v17, %v6371_v3  ;;  %v1345_v48 = vsel %vm1344_vm2, %v6375_v6, %v6380_v43  ;;  %v1346_v60 = vsel %vm1344_vm2, %v6376_v8, %v6381_v17 }
 0x133   : > { %v1347_v38 = vsel %vm1344_vm2, %v11482_v14, %v6375_v6  ;;  %v1348_v26 = vsel %vm1344_vm2, %v11483_v40, %v6376_v8  ;;  %v6389_v57 = vpop.permute.xlu0 %6388  ;;  %v1417_v3 = vpack.c.bf16 %v1416_v42, %v1415_v34  ;;  %v1452_v61 = vpack.c.bf16 %v1346_v60, %v1345_v48  ;;  %v7063_v8 = vld [vmem:[%s7165_s28 + $0x1b0] sm:$0xff] }
 0x134   : > { %v6391_v16 = vunpack.i.h.bf16 %v6389_v57  ;;  %v6390_v43 = vunpack.i.l.bf16 %v6389_v57  ;;  %v6394_v0 = vpop.permute.xlu1 %6393  ;;  %v1451_v47 = vpack.c.bf16 %v1348_v26, %v1347_v38  ;;  %v11698_v6 = vunpack.i.l.bf16 %v7452_v19  ;;  %v7064_v40 = vld [vmem:[%s7165_s28 + $0x1f0] sm:$0xff] }
 0x135   : > { %v6396_v17 = vunpack.i.h.bf16 %v6394_v0  ;;  %v6395_v20 = vunpack.i.l.bf16 %v6394_v0  ;;  %1805 = vmatpush1.bf16.msra.mxu0 %v1417_v3  ;;  %2535 = vmatprep.subr.bf16.mxu1 %v1452_v61  ;;  %v1595_v37 = vpack.c.bf16 %v7064_v40, %v7063_v8  ;;  %v11699_v42 = vunpack.i.h.bf16 %v7452_v19 }
 0x136   : > { %2536 = vmatpush1.bf16.msra.mxu1 %v1451_v47  ;;  %1806 = vmatprep.subr.bf16.mxu0 %v1562_v22  ;;  %v683_v14 = vsel %vm622_vm0, %v6390_v43, %v11698_v6  ;;  %v11700_v60 = vunpack.i.h.bf16 %v7361_v28  ;;  %v11701_v38 = vunpack.i.l.bf16 %v7361_v28  ;;  %v11703_v19 = vunpack.i.l.bf16 %v7500_v29 }
 0x137   : > { %v6399_v34 = vpop.permute.xlu0 %6398  ;;  %2537 = vmatprep.subr.bf16.mxu1 %v1596_v63  ;;  %v684_v48 = vsel %vm622_vm0, %v6391_v16, %v11699_v42  ;;  %v11702_v63 = vmov 0.0|0.0   ;;  %v11704_v47 = vunpack.i.h.bf16 %v7500_v29  ;;  %v11706_v8 = vunpack.i.l.bf16 %v7388_v52  ;;  %v8234_v29 = vld [vmem:[%s11356_s1] sm:$0xff]  }
 0x138   : > { %v686_v22 = vsel %vm622_vm0, %v11700_v60, %v6391_v16  ;;  %v685_v26 = vsel %vm622_vm0, %v11701_v38, %v6390_v43  ;;  %v6404_v57 = vpop.permute.xlu1 %6403  ;;  %v700_v3 = vpack.c.bf16 %v684_v48, %v683_v14  ;;  %v6401_v40 = vunpack.i.h.bf16 %v6399_v34 }
 0x139   : > { %v6400_v61 = vunpack.i.l.bf16 %v6399_v34  ;;  %1807 = vmatpush1.bf16.msra.mxu0 %v11702_v63  ;;  %v1044_v0 = vsel %vm983_vm1, %v6395_v20, %v11703_v19  ;;  %v1045_v16 = vsel %vm983_vm1, %v6396_v17, %v11704_v47  ;;  %v699_v43 = vpack.c.bf16 %v686_v22, %v685_v26 }
 0x13a   : > { %1886 = vmatprep.subr.bf16.mxu0 %v700_v3  ;;  %2538 = vmatpush1.bf16.msra.mxu1 %v1595_v37  ;;  %v11705_v14 = vunpack.i.h.bf16 %v7388_v52  ;;  %v1046_v34 = vsel %vm983_vm1, %v11706_v8, %v6395_v20  ;;  %v1061_v37 = vpack.c.bf16 %v1045_v16, %v1044_v0  ;;  %v11707_v52 = vunpack.i.l.bf16 %v7535_v41 }
 0x13b   : > { %v6409_v28 = vpop.permute.xlu0 %6408  ;;  %v11709_v38 = vunpack.i.l.bf16 %v7418_v49  ;;  %v6406_v47 = vunpack.i.h.bf16 %v6404_v57  ;;  %v6405_v16 = vunpack.i.l.bf16 %v6404_v57 }
 0x13c   : > { %v1047_v6 = vsel %vm983_vm1, %v11705_v14, %v6396_v17  ;;  %v8229_v42 = vpop.permute.xlu1 %6413  ;;  %5909 = vmatmul.mubr.msk.bf16.vlgmr.msra.gmra.mrb[0].mxu0 %vm1796_vm3, %v8234_v29  ;;  %v1405_v20 = vsel %vm1344_vm2, %v6400_v61, %v11707_v52  ;;  %v11708_v17 = vunpack.i.h.bf16 %v7535_v41  ;;  %v11710_v41 = vunpack.i.h.bf16 %v7418_v49  ;;  %v7067_v14 = vld [vmem:[%s7165_s28 + $0x60] sm:$0xff]  ;;  %v7069_v49 = vld [vmem:[%s7165_s28 + $0x58] sm:$0xff] }
 0x13d   : > { %1887 = vmatpush1.bf16.msra.mxu0 %v699_v43  ;;  %5926 = vmatmul.mubr.msk.bf16.vlgmr.msra.gmra.mrb[32].mxu1 %vm1796_vm3, %v8234_v29  ;;  %v1060_v22 = vpack.c.bf16 %v1047_v6, %v1046_v34  ;;  %v1407_v26 = vsel %vm1344_vm2, %v11709_v38, %v6400_v61  ;;  %v7066_v43 = vld [vmem:[%s7165_s28 + $0x20] sm:$0xff]  ;;  %v7068_v61 = vld [vmem:[%s7165_s28 + $0x18] sm:$0xff] }
 0x13e   : > { %v1406_v48 = vsel %vm1344_vm2, %v6401_v40, %v11708_v17  ;;  %1888 = vmatprep.subr.bf16.mxu0 %v1061_v37  ;;  %1918 = vmatprep.mubr.bf16.mxu0 %v11690_v9  ;;  %v1408_v3 = vsel %vm1344_vm2, %v11710_v41, %v6401_v40  ;;  %v1566_v6 = vpack.c.bf16 %v7067_v14, %v7066_v43  ;;  %v6411_v17 = vunpack.i.h.bf16 %v6409_v28 }
 0x13f   : > { %v8249_v60 = vpop.permute.xlu0 %6418  ;;  %4442 = vmatprep.mubr.bf16.mxu1 %v11690_v9  ;;  %v1422_v0 = vpack.c.bf16 %v1406_v48, %v1405_v20  ;;  %v1421_v34 = vpack.c.bf16 %v1408_v3, %v1407_v26  ;;  %v1565_v52 = vpack.c.bf16 %v7069_v49, %v7068_v61  ;;  %v6410_v40 = vunpack.i.l.bf16 %v6409_v28 }
 0x140   : > { %v8260_v19 = vpop.permute.xlu1 %6423  ;;  %v11711_v20 = vunpack.i.l.bf16 %v7567_v55  ;;  %v11712_v48 = vunpack.i.h.bf16 %v7567_v55  ;;  %v11713_v26 = vunpack.i.h.bf16 %v7448_v50  ;;  %v11714_v28 = vunpack.i.l.bf16 %v7448_v50 }
 0x141   : > { %1889 = vmatpush1.bf16.msra.mxu0 %v1060_v22  ;;  %v6416_v55 = vunpack.i.h.bf16 %v8229_v42  ;;  %v6415_v14 = vunpack.i.l.bf16 %v8229_v42  ;;  %v11717_v49 = vunpack.i.l.bf16 %v7480_v51 }
 0x142   : > { %1890 = vmatprep.subr.bf16.mxu0 %v1422_v0  ;;  %v675_v57 = vsel %vm622_vm0, %v6405_v16, %v11711_v20  ;;  %v676_v22 = vsel %vm622_vm0, %v6406_v47, %v11712_v48  ;;  %v678_v41 = vsel %vm622_vm0, %v11713_v26, %v6406_v47  ;;  %v677_v3 = vsel %vm622_vm0, %v11714_v28, %v6405_v16 }
 0x143   : > { %v8264_v8 = vpop.permute.xlu0 %6428  ;;  %v704_v43 = vpack.c.bf16 %v676_v22, %v675_v57  ;;  %v11716_v47 = vunpack.i.h.bf16 %v7601_v21  ;;  %v703_v61 = vpack.c.bf16 %v678_v41, %v677_v3  ;;  %v1038_v42 = vsel %vm983_vm1, %v11717_v49, %v6410_v40 }
 0x144   : > { %v8266_v37 = vpop.permute.xlu1 %6433  ;;  %v11719_v48 = vunpack.i.l.bf16 %v7640_v11  ;;  %v11720_v26 = vunpack.i.h.bf16 %v7640_v11  ;;  %v11721_v41 = vunpack.i.h.bf16 %v7530_v59  ;;  %v11722_v3 = vunpack.i.l.bf16 %v7530_v59 }
 0x145   : > { %1891 = vmatpush1.bf16.msra.mxu0 %v1421_v34  ;;  %v1037_v50 = vsel %vm983_vm1, %v6411_v17, %v11716_v47  ;;  %v6420_v47 = vunpack.i.l.bf16 %v8249_v60 }
 0x146   : > { %1892 = vmatprep.subr.bf16.mxu0 %v1566_v6  ;;  %v11715_v6 = vunpack.i.l.bf16 %v7601_v21  ;;  %v1397_v22 = vsel %vm1344_vm2, %v6415_v14, %v11719_v48  ;;  %v1400_v28 = vsel %vm1344_vm2, %v11721_v41, %v6416_v55  ;;  %v1399_v11 = vsel %vm1344_vm2, %v11722_v3, %v6415_v14 }
 0x147   : > { %v8278_v38 = vpop.permute.xlu0 %6438  ;;  %v6425_v14 = vunpack.i.l.bf16 %v8260_v19  ;;  %v6430_v3 = vunpack.i.l.bf16 %v8264_v8 }
 0x148   : > { %v8288_v0 = vpop.permute.xlu1 %6443  ;;  %v1036_v34 = vsel %vm983_vm1, %v6410_v40, %v11715_v6 }
 0x149   : > { %1893 = vmatpush1.bf16.msra.mxu0 %v1565_v52  ;;  %v11718_v52 = vunpack.i.h.bf16 %v7480_v51  ;;  %v1065_v21 = vpack.c.bf16 %v1037_v50, %v1036_v34  ;;  %v1398_v51 = vsel %vm1344_vm2, %v6416_v55, %v11720_v26  ;;  %v6421_v34 = vunpack.i.h.bf16 %v8249_v60  ;;  %v7070_v55 = vld [vmem:[%s7165_s28 + $0x38] sm:$0xff] }
 0x14a   : > { %1972 = vmatprep.subr.bf16.mxu0 %v704_v43  ;;  %v1426_v6 = vpack.c.bf16 %v1398_v51, %v1397_v22  ;;  %v11725_v26 = vunpack.i.l.bf16 %v7559_v56  ;;  %v11726_v51 = vunpack.i.h.bf16 %v7559_v56 }
 0x14b   : > { %v8300_v16 = vpop.permute.xlu0 %6448  ;;  %v1039_v20 = vsel %vm983_vm1, %v11718_v52, %v6411_v17  ;;  %v6426_v52 = vunpack.i.h.bf16 %v8260_v19 }
 0x14c   : > { %v8310_v57 = vpop.permute.xlu1 %6453  ;;  %5911 = vmatmul.mubr.msk.bf16.vlgmr.msra.gmra.mrb[4].mxu0 %vm1796_vm3, %v8234_v29  ;;  %v1064_v40 = vpack.c.bf16 %v1039_v20, %v1038_v42  ;;  %v7071_v42 = vld [vmem:[%s7165_s28 + $0x78] sm:$0xff]  ;;  %v11723_v20 = vunpack.i.l.bf16 %v7666_v1  ;;  %v669_v19 = vsel %vm622_vm0, %v11725_v26, %v6420_v47 }
 0x14d   : > { %1973 = vmatpush1.bf16.msra.mxu0 %v703_v61  ;;  %2004 = vmatprep.mubr.bf16.mxu0 %v11690_v9  ;;  %v1425_v61 = vpack.c.bf16 %v1400_v28, %v1399_v11  ;;  %v1569_v59 = vpack.c.bf16 %v7071_v42, %v7070_v55  ;;  %v6431_v28 = vunpack.i.h.bf16 %v8264_v8  ;;  %v11730_v55 = vunpack.i.l.bf16 %v7597_v35 }
 0x14e   : > { %1974 = vmatprep.subr.bf16.mxu0 %v1065_v21  ;;  %v667_v60 = vsel %vm622_vm0, %v6420_v47, %v11723_v20  ;;  %v11724_v21 = vunpack.i.h.bf16 %v7666_v1 }
 0x14f   : > { %v8323_v17 = vpop.permute.xlu0 %6458  ;;  %v1030_v42 = vsel %vm983_vm1, %v11730_v55, %v6425_v14  ;;  %v7073_v55 = vld [vmem:[%s7165_s28 + $0xd8] sm:$0xff] }
 0x150   : > { %v8333_v43 = vpop.permute.xlu1 %6463  ;;  %v668_v48 = vsel %vm622_vm0, %v6421_v34, %v11724_v21 }
 0x151   : > { %1975 = vmatpush1.bf16.msra.mxu0 %v1064_v40  ;;  %v670_v40 = vsel %vm622_vm0, %v11726_v51, %v6421_v34  ;;  %v708_v1 = vpack.c.bf16 %v668_v48, %v667_v60  ;;  %v11731_v60 = vunpack.i.l.bf16 %v7733_v15  ;;  %v11733_v48 = vunpack.i.l.bf16 %v7630_v5 }
 0x152   : > { %1976 = vmatprep.subr.bf16.mxu0 %v1426_v6  ;;  %v11728_v6 = vunpack.i.h.bf16 %v7704_v58  ;;  %v707_v47 = vpack.c.bf16 %v670_v40, %v669_v19  ;;  %v6436_v19 = vunpack.i.h.bf16 %v8266_v37  ;;  %v11734_v40 = vunpack.i.h.bf16 %v7630_v5 }
 0x153   : > { %v8337_v50 = vpop.permute.xlu0 %6468  ;;  %v1389_v21 = vsel %vm1344_vm2, %v6430_v3, %v11731_v60  ;;  %v1391_v26 = vsel %vm1344_vm2, %v11733_v48, %v6430_v3  ;;  %v11735_v5 = vunpack.i.l.bf16 %v8111_v44  ;;  %v7075_v60 = vld [vmem:[%s7165_s28 + $0xd0] sm:$0xff] }
 0x154   : > { %v8339_v49 = vpop.permute.xlu1 %6473  ;;  %v1029_v56 = vsel %vm983_vm1, %v6426_v52, %v11728_v6 }
 0x155   : > { %1977 = vmatpush1.bf16.msra.mxu0 %v1425_v61  ;;  %v11729_v61 = vunpack.i.h.bf16 %v7597_v35 }
 0x156   : > { %1978 = vmatprep.subr.bf16.mxu0 %v11702_v63  ;;  %v11727_v63 = vunpack.i.l.bf16 %v7704_v58 }
 0x157   : > { %v8354_v22 = vpop.permute.xlu0 %6478  ;;  %v1031_v8 = vsel %vm983_vm1, %v11729_v61, %v6426_v52  ;;  %v11732_v52 = vunpack.i.h.bf16 %v7733_v15 }
 0x158   : > { %v8364_v41 = vpop.permute.xlu1 %6483  ;;  %v1028_v11 = vsel %vm983_vm1, %v6425_v14, %v11727_v63  ;;  %v1068_v15 = vpack.c.bf16 %v1031_v8, %v1030_v42  ;;  %v7072_v8 = vld [vmem:[%s7165_s28 + $0x98] sm:$0xff] }
 0x159   : > { %1979 = vmatpush1.bf16.msra.mxu0 %v1569_v59  ;;  %v1069_v58 = vpack.c.bf16 %v1029_v56, %v1028_v11  ;;  %v1390_v35 = vsel %vm1344_vm2, %v6431_v28, %v11732_v52  ;;  %v6435_v56 = vunpack.i.l.bf16 %v8266_v37  ;;  %v1574_v42 = vpack.c.bf16 %v7073_v55, %v7072_v8 }
 0x15a   : > { %2058 = vmatprep.subr.bf16.mxu0 %v708_v1  ;;  %v1392_v1 = vsel %vm1344_vm2, %v11734_v40, %v6431_v28  ;;  %v1430_v3 = vpack.c.bf16 %v1390_v35, %v1389_v21  ;;  %v11736_v21 = vunpack.i.h.bf16 %v8111_v44  ;;  %v6441_v35 = vunpack.i.h.bf16 %v8278_v38 }
 0x15b   : > { %v8376_v34 = vpop.permute.xlu0 %6488  ;;  %v1429_v48 = vpack.c.bf16 %v1392_v1, %v1391_v26  ;;  %v11737_v40 = vunpack.i.l.bf16 %v8142_v46  ;;  %v6440_v44 = vunpack.i.l.bf16 %v8278_v38  ;;  %v11739_v1 = vunpack.i.l.bf16 %v8170_v36 }
 0x15c   : > { %v8386_v59 = vpop.permute.xlu1 %6493  ;;  %5913 = vmatmul.mubr.msk.bf16.vlgmr.msra.gmra.mrb[8].mxu0 %vm1796_vm3, %v8234_v29  ;;  %v11740_v55 = vunpack.i.h.bf16 %v8170_v36  ;;  %v11741_v38 = vunpack.i.l.bf16 %v7765_v39 }
 0x15d   : > { %v6495_v20 = vunpack.i.l.bf16 %v8386_v59  ;;  %2059 = vmatpush1.bf16.msra.mxu0 %v707_v47  ;;  %2090 = vmatprep.mubr.bf16.mxu0 %v11690_v9  ;;  %v6496_v14 = vunpack.i.h.bf16 %v8386_v59 }
 0x15e   : > { %2060 = vmatprep.subr.bf16.mxu0 %v1069_v58  ;;  %v7074_v58 = vld [vmem:[%s7165_s28 + $0x90] sm:$0xff] }
 0x15f   : > { %v8406_v51 = vpop.permute.xlu0 %6498  ;;  %v8425_v28 = vsel %vm622_vm0, %v6495_v20, %v11735_v5  ;;  %v1573_v37 = vpack.c.bf16 %v7075_v60, %v7074_v58  ;;  %v8437_v52 = vsel %vm622_vm0, %v6496_v14, %v11736_v21  ;;  %v11738_v5 = vunpack.i.h.bf16 %v8142_v46 }
 0x160   : > { %v6501_v63 = vunpack.i.h.bf16 %v8406_v51  ;;  %v6500_v11 = vunpack.i.l.bf16 %v8406_v51  ;;  %v8414_v6 = vpop.permute.xlu1 %6503  ;;  %v659_v58 = vsel %vm622_vm0, %v6435_v56, %v11741_v38  ;;  %v11742_v60 = vunpack.i.h.bf16 %v7765_v39  ;;  %v11813_v51 = vld [vmem:[#allocation13_spill] sm:$0xff] }
 0x161   : > { %v11486_v47 = vunpack.i.h.bf16 %v8414_v6  ;;  %v11485_v61 = vunpack.i.l.bf16 %v8414_v6  ;;  %2061 = vmatpush1.bf16.msra.mxu0 %v1068_v15  ;;  %v728_v15 = vpack.c.bf16 %v8437_v52, %v8425_v28  ;;  %v6446_v38 = vunpack.i.h.bf16 %v8288_v0 }
 0x162   : > { %2062 = vmatprep.subr.bf16.mxu0 %v1430_v3  ;;  %v8448_v3 = vsel %vm983_vm1, %v6500_v11, %v11737_v40  ;;  %v8457_v26 = vsel %vm983_vm1, %v6501_v63, %v11738_v5  ;;  %v660_v21 = vsel %vm622_vm0, %v6436_v19, %v11742_v60  ;;  %v11743_v5 = vunpack.i.h.bf16 %v7662_v30 }
 0x163   : > { %v8465_v8 = vsel %vm1344_vm2, %v11485_v61, %v11739_v1  ;;  %v8473_v46 = vsel %vm1344_vm2, %v11486_v47, %v11740_v55  ;;  %v11744_v1 = vunpack.i.l.bf16 %v7662_v30  ;;  %v712_v55 = vpack.c.bf16 %v660_v21, %v659_v58  ;;  %v7091_v47 = vld [vmem:[%s7165_s28 + $0x1c0] sm:$0xff] }
 0x164   : > { %v6445_v60 = vunpack.i.l.bf16 %v8288_v0  ;;  %v11745_v61 = vunpack.i.l.bf16 %v7797_v33  ;;  %v11746_v40 = vunpack.i.h.bf16 %v7797_v33  ;;  %v11748_v0 = vunpack.i.h.bf16 %v7693_v23 }
 0x165   : > { %2063 = vmatpush1.bf16.msra.mxu0 %v1429_v48  ;;  %v662_v48 = vsel %vm622_vm0, %v11743_v5, %v6436_v19  ;;  %v661_v39 = vsel %vm622_vm0, %v11744_v1, %v6435_v56  ;;  %v11747_v56 = vunpack.i.l.bf16 %v7693_v23  ;;  %v11811_v28 = vpack.c.bf16 %v8457_v26, %v8448_v3 }
 0x166   : > { %2064 = vmatprep.subr.bf16.mxu0 %v1574_v42  ;;  %v1020_v42 = vsel %vm983_vm1, %v6440_v44, %v11745_v61  ;;  %v1021_v19 = vsel %vm983_vm1, %v6441_v35, %v11746_v40  ;;  %v711_v30 = vpack.c.bf16 %v662_v48, %v661_v39  ;;  %v11749_v61 = vunpack.i.l.bf16 %v7832_v32 }
 0x167   : > { %v1022_v58 = vsel %vm983_vm1, %v11747_v56, %v6440_v44  ;;  %v1073_v33 = vpack.c.bf16 %v1021_v19, %v1020_v42  ;;  %v11750_v40 = vunpack.i.h.bf16 %v7832_v32  ;;  %v11751_v44 = vunpack.i.h.bf16 %v7728_v27  ;;  %v7076_v42 = vld [vmem:[%s7165_s28 + $0xb8] sm:$0xff] }
 0x168   : > { %v1381_v21 = vsel %vm1344_vm2, %v6445_v60, %v11749_v61  ;;  %v11752_v48 = vunpack.i.l.bf16 %v7728_v27  ;;  %v6451_v39 = vunpack.i.h.bf16 %v8300_v16  ;;  %v7077_v19 = vld [vmem:[%s7165_s28 + $0xf8] sm:$0xff]  ;;  %v6456_v27 = vunpack.i.h.bf16 %v8310_v57 }
 0x169   : > { %2065 = vmatpush1.bf16.msra.mxu0 %v1573_v37  ;;  %v1023_v37 = vsel %vm983_vm1, %v11748_v0, %v6441_v35  ;;  %v1382_v23 = vsel %vm1344_vm2, %v6446_v38, %v11750_v40  ;;  %v1384_v5 = vsel %vm1344_vm2, %v11751_v44, %v6446_v38  ;;  %v7079_v0 = vld [vmem:[%s7165_s28 + $0xf0] sm:$0xff]  ;;  %v11753_v38 = vlaneseq }
 0x16a   : > { %2144 = vmatprep.subr.bf16.mxu0 %v712_v55  ;;  %v1072_v35 = vpack.c.bf16 %v1023_v37, %v1022_v58  ;;  %v1383_v1 = vsel %vm1344_vm2, %v11752_v48, %v6445_v60  ;;  %v1434_v32 = vpack.c.bf16 %v1382_v23, %v1381_v21  ;;  %v6450_v55 = vunpack.i.l.bf16 %v8300_v16  ;;  %v7078_v58 = vld [vmem:[%s7165_s28 + $0xb0] sm:$0xff] }
 0x16b   : > { %v1433_v56 = vpack.c.bf16 %v1384_v5, %v1383_v1  ;;  %v1577_v37 = vpack.c.bf16 %v7079_v0, %v7078_v58  ;;  %v6455_v60 = vunpack.i.l.bf16 %v8310_v57  ;;  %v11754_v61 = vunpack.i.l.bf16 %v7860_v31 }
 0x16c   : > { %5915 = vmatmul.mubr.msk.bf16.vlgmr.msra.gmra.mrb[12].mxu0 %vm1796_vm3, %v8234_v29  ;;  %v11755_v21 = vunpack.i.h.bf16 %v7860_v31  ;;  %v11756_v23 = vunpack.i.l.bf16 %v7757_v13  ;;  %v11757_v44 = vunpack.i.h.bf16 %v7757_v13  ;;  %v6460_v5 = vunpack.i.l.bf16 %v8323_v17 }
 0x16d   : > { %2145 = vmatpush1.bf16.msra.mxu0 %v711_v30  ;;  %2176 = vmatprep.mubr.bf16.mxu0 %v11690_v9  ;;  %v1578_v30 = vpack.c.bf16 %v7077_v19, %v7076_v42  ;;  %v651_v16 = vsel %vm622_vm0, %v6450_v55, %v11754_v61  ;;  %v6461_v31 = vunpack.i.h.bf16 %v8323_v17  ;;  %v8577_v19 = vld [vmem:[%s11358_s3] sm:$0xff] }
 0x16e   : > { %2146 = vmatprep.subr.bf16.mxu0 %v1073_v33  ;;  %v8539_v33 = vshrl.u32 %v11753_v38, 7  ;;  %v652_v40 = vsel %vm622_vm0, %v6451_v39, %v11755_v21  ;;  %v654_v57 = vsel %vm622_vm0, %v11757_v44, %v6451_v39 }
 0x16f   : > { %v716_v48 = vpack.c.bf16 %v652_v40, %v651_v16  ;;  %v11764_v16 = vunpack.i.l.bf16 %v7922_v12 }
 0x170   : > { %v8561_v1 = vsub.s32 2, %v8539_v33  ;;  %v8580_v17 = vsub.s32 3, %v8539_v33 }
 0x171   : > { %2147 = vmatpush1.bf16.msra.mxu0 %v1072_v35  ;;  %v653_v35 = vsel %vm622_vm0, %v11756_v23, %v6450_v55  ;;  %v11760_v55 = vunpack.i.h.bf16 %v7889_v25  ;;  %v8572_v39 = vpop.permute.xlu0 %1783  ;;  %v1373_v21 = vsel %vm1344_vm2, %v6460_v5, %v11764_v16  ;;  %v11769_v16 = vunpack.i.h.bf16 %v7824_v2 }
 0x172   : > { %2148 = vmatprep.subr.bf16.mxu0 %v1434_v32  ;;  %11758 = vst [vmem:[#allocation14_spill] sm:$0xff] %v8561_v1  ;;  %v11759_v32 = vunpack.i.l.bf16 %v7889_v25  ;;  %11761 = vst [vmem:[#allocation15_spill] sm:$0xff] %v8580_v17  ;;  %v11763_v25 = vunpack.i.l.bf16 %v7793_v24  ;;  %v715_v0 = vpack.c.bf16 %v654_v57, %v653_v35  ;;  %v8590_v38 = vpop.permute.xlu1 %1788  ;;  %v8610_v44 = vrot.slane %v8577_v19, %v8580_v17 }
 0x173   : > { %v1013_v13 = vsel %vm983_vm1, %v6456_v27, %v11760_v55 }
 0x174   : > { %v1012_v42 = vsel %vm983_vm1, %v6455_v60, %v11759_v32  ;;  %v1014_v58 = vsel %vm983_vm1, %v11763_v25, %v6455_v60  ;;  %v11766_v60 = vunpack.i.h.bf16 %v7922_v12  ;;  %11767 = vst [vmem:[#allocation17_spill] sm:$0xff] %v8610_v44  ;;  %v6465_v32 = vunpack.i.l.bf16 %v8333_v43 }
 0x175   : > { %2149 = vmatpush1.bf16.msra.mxu0 %v1433_v56  ;;  %v1077_v61 = vpack.c.bf16 %v1013_v13, %v1012_v42  ;;  %v11768_v13 = vunpack.i.l.bf16 %v7824_v2  ;;  %v6470_v2 = vunpack.i.l.bf16 %v8337_v50 }
 0x176   : > { %2150 = vmatprep.subr.bf16.mxu0 %v1578_v30  ;;  %v11762_v30 = vunpack.i.h.bf16 %v7793_v24  ;;  %v8601_v24 = vrot.slane %v8577_v19, %v8561_v1  ;;  %v1374_v23 = vsel %vm1344_vm2, %v6461_v31, %v11766_v60  ;;  %v7080_v60 = vld [vmem:[%s7165_s28 + $0x110] sm:$0xff] }
 0x178   : > { %v1015_v56 = vsel %vm983_vm1, %v11762_v30, %v6456_v27  ;;  %11765 = vst [vmem:[#allocation16_spill] sm:$0xff] %v8601_v24  ;;  %v1375_v30 = vsel %vm1344_vm2, %v11768_v13, %v6460_v5 }
 0x179   : > { %2151 = vmatpush1.bf16.msra.mxu0 %v1577_v37  ;;  %v1076_v25 = vpack.c.bf16 %v1015_v56, %v1014_v58 }
 0x17a   : > { %2230 = vmatprep.subr.bf16.mxu0 %v716_v48  ;;  %v6466_v48 = vunpack.i.h.bf16 %v8333_v43  ;;  %v1376_v43 = vsel %vm1344_vm2, %v11769_v16, %v6461_v31  ;;  %v7083_v31 = vld [vmem:[%s7165_s28 + $0x148] sm:$0xff] }
 0x17b   : > { %v1877_v37 = vpop.f32.mrb[0].mxu1 }
 0x17c   : > { %5917 = vmatmul.mubr.msk.bf16.vlgmr.msra.gmra.mrb[16].mxu0 %vm1796_vm3, %v8234_v29  ;;  %v1879_v40 = vpop.f32.mrb[1].mxu1  ;;  %v1878_v27 = vadd.f32 %v1877_v37, %v8572_v39 }
 0x17d   : > { %2231 = vmatpush1.bf16.msra.mxu0 %v715_v0  ;;  %2262 = vmatprep.mubr.bf16.mxu0 %v11690_v9  ;;  %v1881_v35 = vpop.f32.mrb[2].mxu1  ;;  %v1880_v57 = vadd.f32 %v1879_v40, %v8572_v39 }
 0x17e   : > { %2232 = vmatprep.subr.bf16.mxu0 %v1077_v61  ;;  %v1883_v12 = vpop.f32.mrb[3].mxu1  ;;  %v1882_v42 = vadd.f32 %v1881_v35, %v8590_v38  ;;  %v2576_v55 = vmax.f32 %v1878_v27, 0.0  ;;  %v1438_v61 = vpack.c.bf16 %v1374_v23, %v1373_v21  ;;  %v7081_v35 = vld [vmem:[%s7165_s28 + $0x150] sm:$0xff] }
 0x17f   : > { %v1884_v0 = vadd.f32 %v1883_v12, %v8590_v38  ;;  %v2577_v37 = vmax.f32 %v1880_v57, 0.0  ;;  %v1582_v5 = vpack.c.bf16 %v7081_v35, %v7080_v60  ;;  %v6471_v57 = vunpack.i.h.bf16 %v8337_v50  ;;  %v7082_v12 = vld [vmem:[%s7165_s28 + $0x108] sm:$0xff] }
 0x180   : > { %v2612_v40 = vmax.f32 %v1882_v42, 0.0  ;;  %v8626_v27 = vmul.f32 %v8601_v24, %v2576_v55  ;;  %v1581_v21 = vpack.c.bf16 %v7083_v31, %v7082_v12  ;;  %v1437_v42 = vpack.c.bf16 %v1376_v43, %v1375_v30 }
 0x181   : > { %2233 = vmatpush1.bf16.msra.mxu0 %v1076_v25  ;;  %v2613_v56 = vmax.f32 %v1884_v0, 0.0  ;;  %v8631_v58 = vmul.f32 %v8610_v44, %v2577_v37  ;;  %v11770_v55 = vunpack.i.l.bf16 %v7950_v7  ;;  %v11771_v25 = vunpack.i.h.bf16 %v7950_v7 }
 0x182   : > { %2234 = vmatprep.subr.bf16.mxu0 %v1438_v61  ;;  %v8638_v23 = vmul.f32 %v8601_v24, %v2612_v40  ;;  %v11772_v43 = vunpack.i.h.bf16 %v7856_v10  ;;  %v11773_v40 = vunpack.i.l.bf16 %v7856_v10  ;;  %v6475_v35 = vunpack.i.l.bf16 %v8339_v49 }
 0x183   : > { %v643_v13 = vsel %vm622_vm0, %v6465_v32, %v11770_v55  ;;  %v644_v0 = vsel %vm622_vm0, %v6466_v48, %v11771_v25  ;;  %v8649_v50 = vmul.f32 %v8610_v44, %v2613_v56  ;;  %v6476_v12 = vunpack.i.h.bf16 %v8339_v49 }
 0x184   : > { %v8653_v37 = vpack.i.bf16 %v8638_v23, %v8626_v27  ;;  %v646_v61 = vsel %vm622_vm0, %v11772_v43, %v6466_v48  ;;  %v645_v60 = vsel %vm622_vm0, %v11773_v40, %v6465_v32  ;;  %v720_v56 = vpack.c.bf16 %v644_v0, %v643_v13 }
 0x185   : > { %2235 = vmatpush1.bf16.msra.mxu0 %v1437_v42  ;;  %v8659_v16 = vpack.i.bf16 %v8649_v50, %v8631_v58  ;;  %v11775_v42 = vunpack.i.h.bf16 %v7974_v54  ;;  %v8684_v10 = vsub.s32 6, %v8539_v33  ;;  %v8687_v32 = vsub.s32 7, %v8539_v33 }
 0x186   : > { %2236 = vmatprep.subr.bf16.mxu0 %v1582_v5  ;;  %6515 = vrot.lane.b32.xlu0 %v8653_v37, %s7111_s18  ;;  %v11774_v5 = vunpack.i.l.bf16 %v7974_v54  ;;  %v719_v55 = vpack.c.bf16 %v646_v61, %v645_v60  ;;  %v11778_v49 = vunpack.i.l.bf16 %v7882_v45  ;;  %v11779_v13 = vunpack.i.h.bf16 %v7882_v45 }
 0x187   : > { %v1005_v48 = vsel %vm983_vm1, %v6471_v57, %v11775_v42  ;;  %11776 = vst [vmem:[#allocation18_spill] sm:$0xff] %v8684_v10  ;;  %11777 = vst [vmem:[#allocation19_spill] sm:$0xff] %v8687_v32  ;;  %v11780_v0 = vunpack.i.l.bf16 %v8001_v62  ;;  %v11781_v40 = vunpack.i.h.bf16 %v8001_v62 }
 0x188   : > { %v1004_v31 = vsel %vm983_vm1, %v6470_v2, %v11774_v5  ;;  %v1007_v54 = vsel %vm983_vm1, %v11779_v13, %v6471_v57  ;;  %v8711_v57 = vrot.slane %v8577_v19, %v8684_v10 }
 0x189   : > { %2237 = vmatpush1.bf16.msra.mxu0 %v1581_v21  ;;  %v1006_v21 = vsel %vm983_vm1, %v11778_v49, %v6470_v2  ;;  %v1081_v25 = vpack.c.bf16 %v1005_v48, %v1004_v31  ;;  %v1365_v43 = vsel %vm1344_vm2, %v6475_v35, %v11780_v0  ;;  %v1366_v2 = vsel %vm1344_vm2, %v6476_v12, %v11781_v40 }
 0x18a   : > { %2316 = vmatprep.subr.bf16.mxu0 %v720_v56  ;;  %11782 = vst [vmem:[#allocation20_spill] sm:$0xff] %v8711_v57  ;;  %v11783_v56 = vunpack.i.h.bf16 %v7918_v18  ;;  %v11784_v31 = vunpack.i.l.bf16 %v7918_v18  ;;  %v8724_v48 = vrot.slane %v8577_v19, %v8687_v32  ;;  %v6481_v49 = vunpack.i.h.bf16 %v8354_v22 }
 0x18b   : > { %v1080_v13 = vpack.c.bf16 %v1007_v54, %v1006_v21  ;;  %v7085_v21 = vld [vmem:[%s7165_s28 + $0x170] sm:$0xff] }
 0x18c   : > { %5919 = vmatmul.mubr.msk.bf16.vlgmr.msra.gmra.mrb[20].mxu0 %vm1796_vm3, %v8234_v29  ;;  %v1963_v61 = vpop.f32.mrb[4].mxu1  ;;  %v1368_v5 = vsel %vm1344_vm2, %v11783_v56, %v6476_v12  ;;  %v1367_v62 = vsel %vm1344_vm2, %v11784_v31, %v6475_v35  ;;  %11785 = vst [vmem:[#allocation21_spill] sm:$0xff] %v8724_v48  ;;  %v6480_v35 = vunpack.i.l.bf16 %v8354_v22  ;;  %v7084_v31 = vld [vmem:[%s7165_s28 + $0x130] sm:$0xff]  ;;  %v6486_v22 = vunpack.i.h.bf16 %v8364_v41 }
 0x18d   : > { %2317 = vmatpush1.bf16.msra.mxu0 %v719_v55  ;;  %2348 = vmatprep.mubr.bf16.mxu0 %v11690_v9  ;;  %v1964_v45 = vadd.f32 %v1963_v61, %v8572_v39  ;;  %v1965_v60 = vpop.f32.mrb[5].mxu1  ;;  %v1586_v54 = vpack.c.bf16 %v7085_v21, %v7084_v31  ;;  %v1441_v30 = vpack.c.bf16 %v1368_v5, %v1367_v62  ;;  %v11789_v21 = vld [vmem:[#allocation6_spill] sm:$0xff] }
 0x18e   : > { %2318 = vmatprep.subr.bf16.mxu0 %v1081_v25  ;;  %v1966_v42 = vadd.f32 %v1965_v60, %v8572_v39  ;;  %v1967_v55 = vpop.f32.mrb[6].mxu1  ;;  %v1442_v25 = vpack.c.bf16 %v1366_v2, %v1365_v43  ;;  %v7086_v43 = vld [vmem:[%s7165_s28 + $0x128] sm:$0xff] }
 0x18f   : > { %v2580_v0 = vmax.f32 %v1964_v45, 0.0  ;;  %v1968_v12 = vadd.f32 %v1967_v55, %v8590_v38  ;;  %v1969_v18 = vpop.f32.mrb[7].mxu1  ;;  %v7087_v2 = vld [vmem:[%s7165_s28 + $0x168] sm:$0xff] }
 0x190   : > { %v2581_v61 = vmax.f32 %v1966_v42, 0.0  ;;  %v1970_v40 = vadd.f32 %v1969_v18, %v8590_v38  ;;  %v1585_v42 = vpack.c.bf16 %v7087_v2, %v7086_v43  ;;  %v11790_v43 = vunpack.i.l.bf16 %v11789_v21 }
 0x191   : > { %2319 = vmatpush1.bf16.msra.mxu0 %v1080_v13  ;;  %v8731_v60 = vmul.f32 %v8711_v57, %v2580_v0  ;;  %v2616_v56 = vmax.f32 %v1968_v12, 0.0  ;;  %v6485_v0 = vunpack.i.l.bf16 %v8364_v41  ;;  %v11786_v12 = vld [vmem:[#allocation10_spill] sm:$0xff] }
 0x192   : > { %2320 = vmatprep.subr.bf16.mxu0 %v1442_v25  ;;  %v8736_v45 = vmul.f32 %v8724_v48, %v2581_v61  ;;  %v2617_v55 = vmax.f32 %v1970_v40, 0.0  ;;  %v11787_v18 = vunpack.i.l.bf16 %v11786_v12  ;;  %v11788_v61 = vunpack.i.h.bf16 %v11786_v12 }
 0x193   : > { %v8742_v13 = vmul.f32 %v8711_v57, %v2616_v56 }
 0x194   : > { %v635_v25 = vsel %vm622_vm0, %v6480_v35, %v11787_v18  ;;  %v636_v40 = vsel %vm622_vm0, %v6481_v49, %v11788_v61  ;;  %v8754_v5 = vmul.f32 %v8724_v48, %v2617_v55  ;;  %v11791_v55 = vunpack.i.h.bf16 %v11789_v21  ;;  %v11792_v61 = vld [vmem:[#allocation12_spill] sm:$0xff] }
 0x195   : > { %2321 = vmatpush1.bf16.msra.mxu0 %v1441_v30  ;;  %v8758_v62 = vpack.i.bf16 %v8742_v13, %v8731_v60  ;;  %v637_v30 = vsel %vm622_vm0, %v11790_v43, %v6480_v35  ;;  %v724_v12 = vpack.c.bf16 %v636_v40, %v635_v25  ;;  %v6490_v18 = vunpack.i.l.bf16 %v8376_v34  ;;  %v11795_v43 = vld [vmem:[#allocation7_spill] sm:$0xff] }
 0x196   : > { %2322 = vmatprep.subr.bf16.mxu0 %v1586_v54  ;;  %v8764_v56 = vpack.i.bf16 %v8754_v5, %v8736_v45  ;;  %v638_v2 = vsel %vm622_vm0, %v11791_v55, %v6481_v49  ;;  %v6491_v54 = vunpack.i.h.bf16 %v8376_v34  ;;  %v11793_v41 = vunpack.i.l.bf16 %v11792_v61 }
 0x197   : > { %v11794_v7 = vunpack.i.h.bf16 %v11792_v61  ;;  %v723_v21 = vpack.c.bf16 %v638_v2, %v637_v30  ;;  %v11796_v49 = vunpack.i.h.bf16 %v11795_v43  ;;  %v11797_v34 = vunpack.i.l.bf16 %v11795_v43 }
 0x198   : > { %v996_v31 = vsel %vm983_vm1, %v6485_v0, %v11793_v41  ;;  %v11798_v41 = vunpack.i.l.bf16 %v8079_v53  ;;  %v11799_v30 = vunpack.i.h.bf16 %v8079_v53 }
 0x199   : > { %2323 = vmatpush1.bf16.msra.mxu0 %v1585_v42  ;;  %v997_v35 = vsel %vm983_vm1, %v6486_v22, %v11794_v7  ;;  %v999_v25 = vsel %vm983_vm1, %v11796_v49, %v6486_v22  ;;  %v998_v42 = vsel %vm983_vm1, %v11797_v34, %v6485_v0  ;;  %v8808_v0 = vld [vmem:[%s11358_s3 + $0x8] sm:$0xff] }
 0x19a   : > { %2402 = vmatprep.subr.bf16.mxu0 %v724_v12  ;;  %v1085_v40 = vpack.c.bf16 %v997_v35, %v996_v31  ;;  %v1357_v7 = vsel %vm1344_vm2, %v6490_v18, %v11798_v41  ;;  %v1358_v22 = vsel %vm1344_vm2, %v6491_v54, %v11799_v30  ;;  %v11800_v31 = vld [vmem:[#allocation8_spill] sm:$0xff]  ;;  %v1084_v12 = vpack.c.bf16 %v999_v25, %v998_v42  ;;  %v7089_v42 = vld [vmem:[%s7165_s28 + $0x1c8] sm:$0xff] }
 0x19b   : > { %v11801_v55 = vunpack.i.l.bf16 %v11800_v31  ;;  %v11802_v61 = vunpack.i.h.bf16 %v11800_v31  ;;  %v8821_v49 = vrot.slane %v8808_v0, %v8561_v1  ;;  %v8906_v26 = vrot.slane %v8808_v0, %v8684_v10 }
 0x19c   : > { %5921 = vmatmul.mubr.msk.bf16.vlgmr.msra.gmra.mrb[24].mxu0 %vm1796_vm3, %v8234_v29 }
 0x19d   : > { %2403 = vmatpush1.bf16.msra.mxu0 %v723_v21  ;;  %2434 = vmatprep.mubr.bf16.mxu0 %v11690_v9  ;;  %v1359_v2 = vsel %vm1344_vm2, %v11801_v55, %v6490_v18  ;;  %v1360_v35 = vsel %vm1344_vm2, %v11802_v61, %v6491_v54  ;;  %v1446_v21 = vpack.c.bf16 %v1358_v22, %v1357_v7  ;;  %v7088_v54 = vld [vmem:[%s7165_s28 + $0x188] sm:$0xff] }
 0x19e   : > { %2404 = vmatprep.subr.bf16.mxu0 %v1085_v40  ;;  %11803 = vst [vmem:[#allocation10_spill] sm:$0xff] %v8821_v49  ;;  %v8826_v18 = vrot.slane %v8808_v0, %v8580_v17  ;;  %v1590_v41 = vpack.c.bf16 %v7089_v42, %v7088_v54  ;;  %v1445_v31 = vpack.c.bf16 %v1360_v35, %v1359_v2  ;;  %v11805_v2 = vld [vmem:[#allocation9_spill] sm:$0xff]  ;;  %11817 = vst [vmem:[#allocation12_spill] sm:$0xff] %v8906_v26 }
 0x19f   : > { %v2049_v53 = vpop.f32.mrb[8].mxu1  ;;  %v11806_v35 = vunpack.i.h.bf16 %v11805_v2 }
 0x1a0   : > { %v2050_v43 = vadd.f32 %v2049_v53, %v8572_v39  ;;  %v2051_v34 = vpop.f32.mrb[9].mxu1  ;;  %11804 = vst [vmem:[#allocation6_spill] sm:$0xff] %v8826_v18 }
 0x1a1   : > { %2405 = vmatpush1.bf16.msra.mxu0 %v1084_v12  ;;  %v2052_v40 = vadd.f32 %v2051_v34, %v8572_v39  ;;  %v2053_v25 = vpop.f32.mrb[10].mxu1  ;;  %v7090_v34 = vld [vmem:[%s7165_s28 + $0x180] sm:$0xff] }
 0x1a2   : > { %2406 = vmatprep.subr.bf16.mxu0 %v1446_v21  ;;  %v2584_v7 = vmax.f32 %v2050_v43, 0.0  ;;  %v2054_v30 = vadd.f32 %v2053_v25, %v8590_v38  ;;  %v2055_v22 = vpop.f32.mrb[11].mxu1  ;;  %v1589_v36 = vpack.c.bf16 %v7091_v47, %v7090_v34  ;;  %v11807_v25 = vunpack.i.l.bf16 %v11805_v2 }
 0x1a3   : > { %v2585_v55 = vmax.f32 %v2052_v40, 0.0  ;;  %v2056_v12 = vadd.f32 %v2055_v22, %v8590_v38  ;;  %v630_v40 = vsel %vm622_vm0, %v11806_v35, %v6496_v14  ;;  %v11818_v35 = vpack.c.bf16 %v8473_v46, %v8465_v8  ;;  %v7094_v46 = vld [vmem:[%s7165_s28 + $0x1a0] sm:$0xff] }
 0x1a4   : > { %v8833_v53 = vmul.f32 %v8821_v49, %v2584_v7  ;;  %v2620_v61 = vmax.f32 %v2054_v30, 0.0  ;;  %v629_v47 = vsel %vm622_vm0, %v11807_v25, %v6495_v20  ;;  %v11808_v30 = vld [vmem:[#allocation11_spill] sm:$0xff] }
 0x1a5   : > { %2407 = vmatpush1.bf16.msra.mxu0 %v1445_v31  ;;  %v8838_v21 = vmul.f32 %v8826_v18, %v2585_v55  ;;  %v2621_v54 = vmax.f32 %v2056_v12, 0.0  ;;  %v727_v20 = vpack.c.bf16 %v630_v40, %v629_v47  ;;  %v11809_v22 = vunpack.i.l.bf16 %v11808_v30  ;;  %v7093_v40 = vld [vmem:[%s7165_s28 + $0x1e8] sm:$0xff] }
 0x1a6   : > { %2408 = vmatprep.subr.bf16.mxu0 %v1590_v41  ;;  %v8841_v43 = vmul.f32 %v8821_v49, %v2620_v61  ;;  %v11810_v31 = vunpack.i.h.bf16 %v11808_v30  ;;  %v11816_v61 = vunpack.i.l.bf16 %v11813_v51 }
 0x1a7   : > { %v8856_v42 = vmul.f32 %v8826_v18, %v2621_v54 }
 0x1a8   : > { %v8860_v41 = vpack.i.bf16 %v8841_v43, %v8833_v53  ;;  %v991_v55 = vsel %vm983_vm1, %v11810_v31, %v6501_v63  ;;  %v11815_v63 = vunpack.i.l.bf16 %v8414_v6 }
 0x1a9   : > { %2409 = vmatpush1.bf16.msra.mxu0 %v1589_v36  ;;  %v8866_v14 = vpack.i.bf16 %v8856_v42, %v8838_v21  ;;  %v990_v36 = vsel %vm983_vm1, %v11809_v22, %v6500_v11  ;;  %v11812_v11 = vunpack.i.h.bf16 %v8414_v6  ;;  %v7092_v6 = vld [vmem:[%s7165_s28 + $0x1a8] sm:$0xff] }
 0x1aa   : > { %2488 = vmatprep.subr.bf16.mxu0 %v728_v15  ;;  %v1088_v52 = vpack.c.bf16 %v991_v55, %v990_v36  ;;  %v11814_v15 = vunpack.i.h.bf16 %v11813_v51  ;;  %v1351_v34 = vsel %vm1344_vm2, %v11816_v61, %v11815_v63  ;;  %v1594_v25 = vpack.c.bf16 %v7093_v40, %v7092_v6  ;;  %v8952_v6 = vld [vmem:[%s11358_s3 + $0x10] sm:$0xff] }
 0x1ac   : > { %5923 = vmatmul.mubr.msk.bf16.vlgmr.msra.gmra.mrb[28].mxu0 %vm1796_vm3, %v8234_v29  ;;  %v1352_v12 = vsel %vm1344_vm2, %v11814_v15, %v11812_v11 }
 0x1ad   : > { %2489 = vmatpush1.bf16.msra.mxu0 %v727_v20  ;;  %2520 = vmatprep.mubr.bf16.mxu0 %v11690_v9  ;;  %v8916_v20 = vrot.slane %v8808_v0, %v8687_v32  ;;  %v1449_v22 = vpack.c.bf16 %v1352_v12, %v1351_v34 }
 0x1ae   : > { %2490 = vmatprep.subr.bf16.mxu0 %v11811_v28 }
 0x1af   : > { %11819 = vst [vmem:[#allocation7_spill] sm:$0xff] %v8916_v20 }
 0x1b0   : > { %v2135_v54 = vpop.f32.mrb[12].mxu1 }
 0x1b1   : > { %2491 = vmatpush1.bf16.msra.mxu0 %v1088_v52  ;;  %v2136_v3 = vadd.f32 %v2135_v54, %v8572_v39  ;;  %v2137_v2 = vpop.f32.mrb[13].mxu1  ;;  %v7095_v52 = vld [vmem:[%s7165_s28 + $0x1e0] sm:$0xff]  ;;  %s7112_s28 = smov 4  }
 0x1b2   : > { %2492 = vmatprep.subr.bf16.mxu0 %v11818_v35  ;;  %v2138_v47 = vadd.f32 %v2137_v2, %v8572_v39  ;;  %v2139_v30 = vpop.f32.mrb[14].mxu1  ;;  %v1593_v11 = vpack.c.bf16 %v7095_v52, %v7094_v46 }
 0x1b3   : > { %v2588_v36 = vmax.f32 %v2136_v3, 0.0  ;;  %v2140_v31 = vadd.f32 %v2139_v30, %v8590_v38  ;;  %v2141_v55 = vpop.f32.mrb[15].mxu1 }
 0x1b4   : > { %v2589_v28 = vmax.f32 %v2138_v47, 0.0  ;;  %v2142_v8 = vadd.f32 %v2141_v55, %v8590_v38  ;;  %v8957_v47 = vrot.slane %v8952_v6, %v8561_v1 }
 0x1b5   : > { %2493 = vmatpush1.bf16.msra.mxu0 %v1449_v22  ;;  %v8923_v51 = vmul.f32 %v8906_v26, %v2588_v36  ;;  %v2624_v15 = vmax.f32 %v2140_v31, 0.0 }
 0x1b6   : > { %2494 = vmatprep.subr.bf16.mxu0 %v1594_v25  ;;  %v8926_v63 = vmul.f32 %v8916_v20, %v2589_v28  ;;  %v2625_v12 = vmax.f32 %v2142_v8, 0.0  ;;  %11824 = vst [vmem:[#allocation22_spill] sm:$0xff] %v8957_v47 }
 0x1b7   : > { %11820 = vst [vmem:[#allocation8_spill] sm:$0xff] %v8923_v51  ;;  %v8929_v61 = vmul.f32 %v8906_v26, %v2624_v15 }
 0x1b8   : > { %11821 = vst [vmem:[#allocation9_spill] sm:$0xff] %v8926_v63  ;;  %v8932_v34 = vmul.f32 %v8916_v20, %v2625_v12 }
 0x1b9   : > { %11822 = vst [vmem:[#allocation11_spill] sm:$0xff] %v8929_v61  ;;  %2495 = vmatpush1.bf16.msra.mxu0 %v1593_v11  ;;  %v8936_v54 = vpack.i.bf16 %v8929_v61, %v8923_v51 }
 0x1ba   : > { %11823 = vst [vmem:[#allocation13_spill] sm:$0xff] %v8932_v34  ;;  %v8942_v2 = vpack.i.bf16 %v8932_v34, %v8926_v63 }
 0x1bc   : > { %5925 = vmatmul.mubr.msk.bf16.vlgmr.msra.gmra.mrb[32].mxu0 %vm1796_vm3, %v8234_v29  ;;  %v8962_v29 = vrot.slane %v8952_v6, %v8580_v17 }
 0x1bd   : > { %4399 = vmatprep.mubr.bf16.mxu0 %v11690_v9 }
 0x1be   : > { %11825 = vst [vmem:[#allocation23_spill] sm:$0xff] %v8962_v29 }
 0x1c3   : > { %v2221_v40 = vpop.f32.mrb[16].mxu1 }
 0x1c4   : > { %v2222_v25 = vadd.f32 %v2221_v40, %v8572_v39  ;;  %v2223_v30 = vpop.f32.mrb[17].mxu1 }
 0x1c5   : > { %v2224_v22 = vadd.f32 %v2223_v30, %v8572_v39  ;;  %v2225_v36 = vpop.f32.mrb[18].mxu1 }
 0x1c6   : > { %v2592_v31 = vmax.f32 %v2222_v25, 0.0  ;;  %v2226_v55 = vadd.f32 %v2225_v36, %v8590_v38  ;;  %v2227_v28 = vpop.f32.mrb[19].mxu1 }
 0x1c7   : > { %v2593_v8 = vmax.f32 %v2224_v22, 0.0  ;;  %v2228_v46 = vadd.f32 %v2227_v28, %v8590_v38 }
 0x1c8   : > { %v8967_v52 = vmul.f32 %v8957_v47, %v2592_v31  ;;  %v2628_v11 = vmax.f32 %v2226_v55, 0.0 }
 0x1c9   : > { %v8970_v15 = vmul.f32 %v8962_v29, %v2593_v8  ;;  %v2629_v12 = vmax.f32 %v2228_v46, 0.0  ;;  %v8993_v8 = vrot.slane %v8952_v6, %v8684_v10 }
 0x1ca   : > { %11826 = vst [vmem:[#allocation24_spill] sm:$0xff] %v8967_v52  ;;  %v8973_v40 = vmul.f32 %v8957_v47, %v2628_v11 }
 0x1cb   : > { %11827 = vst [vmem:[#allocation25_spill] sm:$0xff] %v8970_v15  ;;  %v8976_v30 = vmul.f32 %v8962_v29, %v2629_v12  ;;  %11830 = vst [vmem:[#allocation28_spill] sm:$0xff] %v8993_v8  ;;  %v8998_v12 = vrot.slane %v8952_v6, %v8687_v32 }
 0x1cc   : > { %11828 = vst [vmem:[#allocation26_spill] sm:$0xff] %v8973_v40  ;;  %v8980_v25 = vpack.i.bf16 %v8973_v40, %v8967_v52 }
 0x1cd   : > { %11829 = vst [vmem:[#allocation27_spill] sm:$0xff] %v8976_v30  ;;  %v8986_v36 = vpack.i.bf16 %v8976_v30, %v8970_v15  ;;  %11831 = vst [vmem:[#allocation29_spill] sm:$0xff] %v8998_v12 }
 0x1d4   : > { %v2307_v55 = vpop.f32.mrb[20].mxu1 }
 0x1d5   : > { %v2308_v28 = vadd.f32 %v2307_v55, %v8572_v39  ;;  %v2309_v46 = vpop.f32.mrb[21].mxu1 }
 0x1d6   : > { %v2310_v11 = vadd.f32 %v2309_v46, %v8572_v39  ;;  %v2311_v22 = vpop.f32.mrb[22].mxu1 }
 0x1d7   : > { %v2596_v3 = vmax.f32 %v2308_v28, 0.0  ;;  %v2312_v35 = vadd.f32 %v2311_v22, %v8590_v38  ;;  %v2313_v7 = vpop.f32.mrb[23].mxu1 }
 0x1d8   : > { %v2597_v31 = vmax.f32 %v2310_v11, 0.0  ;;  %v2314_v59 = vadd.f32 %v2313_v7, %v8590_v38 }
 0x1d9   : > { %v9003_v55 = vmul.f32 %v8993_v8, %v2596_v3  ;;  %v2632_v20 = vmax.f32 %v2312_v35, 0.0 }
 0x1da   : > { %v9006_v26 = vmul.f32 %v8998_v12, %v2597_v31  ;;  %v2633_v46 = vmax.f32 %v2314_v59, 0.0 }
 0x1db   : > { %11832 = vst [vmem:[#allocation30_spill] sm:$0xff] %v9003_v55  ;;  %v9009_v29 = vmul.f32 %v8993_v8, %v2632_v20  ;;  %v9029_v20 = vld [vmem:[%s11358_s3 + $0x18] sm:$0xff] }
 0x1dc   : > { %11833 = vst [vmem:[#allocation31_spill] sm:$0xff] %v9006_v26  ;;  %v9012_v47 = vmul.f32 %v8998_v12, %v2633_v46  ;;  %v9034_v28 = vrot.slane %v9029_v20, %v8561_v1  ;;  %v9039_v7 = vrot.slane %v9029_v20, %v8580_v17 }
 0x1dd   : > { %11834 = vst [vmem:[#allocation32_spill] sm:$0xff] %v9009_v29  ;;  %v9016_v22 = vpack.i.bf16 %v9009_v29, %v9003_v55 }
 0x1de   : > { %11835 = vst [vmem:[#allocation33_spill] sm:$0xff] %v9012_v47  ;;  %v9022_v3 = vpack.i.bf16 %v9012_v47, %v9006_v26  ;;  %11836 = vst [vmem:[#allocation34_spill] sm:$0xff] %v9034_v28 }
 0x1df   : > { %11837 = vst [vmem:[#allocation35_spill] sm:$0xff] %v9039_v7 }
 0x1e7   : > { %v2393_v35 = vpop.f32.mrb[24].mxu1 }
 0x1e8   : > { %v2394_v31 = vadd.f32 %v2393_v35, %v8572_v39  ;;  %v2395_v11 = vpop.f32.mrb[25].mxu1 }
 0x1e9   : > { %v2396_v46 = vadd.f32 %v2395_v11, %v8572_v39  ;;  %v2397_v59 = vpop.f32.mrb[26].mxu1 }
 0x1ea   : > { %v2600_v12 = vmax.f32 %v2394_v31, 0.0  ;;  %v2398_v8 = vadd.f32 %v2397_v59, %v8590_v38  ;;  %v2399_v18 = vpop.f32.mrb[27].mxu1 }
 0x1eb   : > { %v2601_v49 = vmax.f32 %v2396_v46, 0.0  ;;  %v2400_v48 = vadd.f32 %v2399_v18, %v8590_v38 }
 0x1ec   : > { %v9044_v35 = vmul.f32 %v9034_v28, %v2600_v12  ;;  %v2636_v57 = vmax.f32 %v2398_v8, 0.0  ;;  %v9070_v12 = vrot.slane %v9029_v20, %v8684_v10 }
 0x1ed   : > { %v9047_v44 = vmul.f32 %v9039_v7, %v2601_v49  ;;  %v2637_v11 = vmax.f32 %v2400_v48, 0.0 }
 0x1ee   : > { %11838 = vst [vmem:[#allocation36_spill] sm:$0xff] %v9044_v35  ;;  %v9050_v24 = vmul.f32 %v9034_v28, %v2636_v57  ;;  %11842 = vst [vmem:[#allocation40_spill] sm:$0xff] %v9070_v12 }
 0x1ef   : > { %11839 = vst [vmem:[#allocation37_spill] sm:$0xff] %v9047_v44  ;;  %v9053_v55 = vmul.f32 %v9039_v7, %v2637_v11  ;;  %v9075_v11 = vrot.slane %v9029_v20, %v8687_v32 }
 0x1f0   : > { %11840 = vst [vmem:[#allocation38_spill] sm:$0xff] %v9050_v24  ;;  %v9057_v59 = vpack.i.bf16 %v9050_v24, %v9044_v35 }
 0x1f1   : > { %11841 = vst [vmem:[#allocation39_spill] sm:$0xff] %v9053_v55  ;;  %v9063_v8 = vpack.i.bf16 %v9053_v55, %v9047_v44  ;;  %11843 = vst [vmem:[#allocation41_spill] sm:$0xff] %v9075_v11 }
 0x1f8   : > { %v2479_v49 = vpop.f32.mrb[28].mxu1 }
 0x1f9   : > { %v2480_v57 = vadd.f32 %v2479_v49, %v8572_v39  ;;  %v2481_v31 = vpop.f32.mrb[29].mxu1 }
 0x1fa   : > { %v2482_v46 = vadd.f32 %v2481_v31, %v8572_v39  ;;  %v2483_v18 = vpop.f32.mrb[30].mxu1 }
 0x1fb   : > { %v2604_v7 = vmax.f32 %v2480_v57, 0.0  ;;  %v2484_v28 = vadd.f32 %v2483_v18, %v8590_v38  ;;  %v2485_v35 = vpop.f32.mrb[31].mxu1 }
 0x1fc   : > { %v2605_v48 = vmax.f32 %v2482_v46, 0.0  ;;  %v2486_v24 = vadd.f32 %v2485_v35, %v8590_v38 }
 0x1fd   : > { %v9080_v49 = vmul.f32 %v9070_v12, %v2604_v7  ;;  %v2640_v10 = vmax.f32 %v2484_v28, 0.0  ;;  %v9107_v28 = vsub.s32 1, %v8539_v33 }
 0x1fe   : > { %v9083_v44 = vmul.f32 %v9075_v11, %v2605_v48  ;;  %v2641_v31 = vmax.f32 %v2486_v24, 0.0  ;;  %v9112_v48 = vld [vmem:[%s11358_s3 + $0x20] sm:$0xf] }
 0x1ff   : > { %11844 = vst [vmem:[#allocation42_spill] sm:$0xff] %v9080_v49  ;;  %v9086_v55 = vmul.f32 %v9070_v12, %v2640_v10  ;;  %v9104_v10 = vsub.s32 0, %v8539_v33  ;;  %11849 = vst [vmem:[#allocation47_spill] sm:$0xff] %v9107_v28  ;;  %v9122_v12 = vrot.slane %v8577_v19, %v9107_v28 }
 0x200   : > { %11845 = vst [vmem:[#allocation43_spill] sm:$0xff] %v9083_v44  ;;  %v9089_v32 = vmul.f32 %v9075_v11, %v2641_v31 }
 0x201   : > { %11846 = vst [vmem:[#allocation44_spill] sm:$0xff] %v9086_v55  ;;  %v9093_v18 = vpack.i.bf16 %v9086_v55, %v9080_v49  ;;  %11848 = vst [vmem:[#allocation46_spill] sm:$0xff] %v9104_v10  ;;  %v9117_v31 = vrot.slane %v8577_v19, %v9104_v10  ;;  %v9127_v55 = vrot.slane %v9112_v48, %v8561_v1 }
 0x202   : > { %11847 = vst [vmem:[#allocation45_spill] sm:$0xff] %v9089_v32  ;;  %v9097_v35 = vpack.i.bf16 %v9089_v32, %v9083_v44  ;;  %11851 = vst [vmem:[#allocation49_spill] sm:$0xff] %v9122_v12 }
 0x203   : > { %11850 = vst [vmem:[#allocation48_spill] sm:$0xff] %v9117_v31  ;;  %11852 = vst [vmem:[#allocation50_spill] sm:$0xff] %v9127_v55 }
 0x20f   : > { %v1834_v57 = vpop.f32.mrb[0].mxu0 }
 0x210   : > { %v1835_v46 = vadd.f32 %v1834_v57, %v8572_v39  ;;  %v1836_v7 = vpop.f32.mrb[1].mxu0  ;;  %v2565_v24 = vpop.f32.mrb[32].mxu1 }
 0x211   : > { %v1837_v11 = vadd.f32 %v1836_v7, %v8572_v39  ;;  %v2566_v49 = vadd.f32 %v2565_v24, %v8572_v39  ;;  %v1838_v44 = vpop.f32.mrb[2].mxu0  ;;  %v2567_v57 = vpop.f32.mrb[33].mxu1  ;;  %v9133_v7 = vrot.slane %v9112_v48, %v8580_v17 }
 0x212   : > { %v2574_v32 = vmax.f32 %v1835_v46, 0.0  ;;  %v1839_v29 = vadd.f32 %v1838_v44, %v8590_v38  ;;  %v2568_v26 = vadd.f32 %v2567_v57, %v8572_v39  ;;  %v1840_v47 = vpop.f32.mrb[3].mxu0  ;;  %v2569_v52 = vpop.f32.mrb[34].mxu1 }
 0x213   : > { %11853 = vst [vmem:[#allocation51_spill] sm:$0xff] %v9133_v7  ;;  %v2575_v40 = vmax.f32 %v1837_v11, 0.0  ;;  %v2608_v15 = vmax.f32 %v2566_v49, 0.0  ;;  %v1841_v24 = vadd.f32 %v1840_v47, %v8590_v38  ;;  %v2570_v1 = vadd.f32 %v2569_v52, %v8590_v38  ;;  %v2571_v30 = vpop.f32.mrb[35].mxu1 }
 0x214   : > { %v2610_v51 = vmax.f32 %v1839_v29, 0.0  ;;  %v2609_v61 = vmax.f32 %v2568_v26, 0.0  ;;  %v2572_v46 = vadd.f32 %v2571_v30, %v8590_v38  ;;  %v9142_v17 = vmul.f32 %v9117_v31, %v2574_v32 }
 0x215   : > { %v9139_v44 = vmul.f32 %v9127_v55, %v2608_v15  ;;  %v2611_v57 = vmax.f32 %v1841_v24, 0.0  ;;  %v2644_v63 = vmax.f32 %v2570_v1, 0.0  ;;  %v9148_v47 = vmul.f32 %v9122_v12, %v2575_v40 }
 0x216   : > { %v9145_v11 = vmul.f32 %v9117_v31, %v2610_v51  ;;  %v2645_v49 = vmax.f32 %v2572_v46, 0.0  ;;  %v9151_v29 = vmul.f32 %v9133_v7, %v2609_v61  ;;  %v9189_v46 = vsub.s32 4, %v8539_v33 }
 0x217   : > { %11854 = vst [vmem:[#allocation52_spill] sm:$0xff] %v9139_v44  ;;  %v9154_v26 = vmul.f32 %v9122_v12, %v2611_v57  ;;  %v9157_v52 = vmul.f32 %v9127_v55, %v2644_v63 }
 0x218   : > { %11855 = vst [vmem:[#allocation53_spill] sm:$0xff] %v9151_v29  ;;  %v9160_v1 = vmul.f32 %v9133_v7, %v2645_v49  ;;  %v6519_v32 = vpack.i.bf16 %v9145_v11, %v9142_v17  ;;  %11858 = vst [vmem:[#allocation56_spill] sm:$0xff] %v9189_v46  ;;  %v9192_v49 = vsub.s32 5, %v8539_v33  ;;  %v9198_v55 = vrot.slane %v8577_v19, %v9189_v46 }
 0x219   : > { %11856 = vst [vmem:[#allocation54_spill] sm:$0xff] %v9157_v52  ;;  %v6539_v51 = vpack.i.bf16 %v9154_v26, %v9148_v47  ;;  %v9168_v15 = vpack.i.bf16 %v9157_v52, %v9139_v44 }
 0x21a   : > { %11857 = vst [vmem:[#allocation55_spill] sm:$0xff] %v9160_v1  ;;  %6520 = vrot.lane.b32.xlu0 %v6519_v32, %s7112_s28  ;;  %6510 = vrot.lane.b32.xlu1 %v6519_v32, %s7111_s18  ;;  %v9174_v63 = vpack.i.bf16 %v9160_v1, %v9151_v29  ;;  %11859 = vst [vmem:[#allocation57_spill] sm:$0xff] %v9192_v49 }
 0x21b   : > { %11860 = vst [vmem:[#allocation58_spill] sm:$0xff] %v9198_v55 }
 0x21e   : > { %6535 = vrot.lane.b32.xlu0 %v8653_v37, %s7106_s30  ;;  %6525 = vrot.lane.b32.xlu1 %v8653_v37, %s7112_s28 }
 0x21f   : > { %v1920_v57 = vpop.f32.mrb[4].mxu0 }
 0x220   : > { %v1921_v40 = vadd.f32 %v1920_v57, %v8572_v39  ;;  %v1922_v61 = vpop.f32.mrb[5].mxu0  ;;  %v9205_v57 = vrot.slane %v8577_v19, %v9192_v49 }
 0x221   : > { %v1923_v30 = vadd.f32 %v1922_v61, %v8572_v39  ;;  %v1924_v7 = vpop.f32.mrb[6].mxu0 }
 0x222   : > { %v2578_v24 = vmax.f32 %v1921_v40, 0.0  ;;  %v1925_v37 = vadd.f32 %v1924_v7, %v8590_v38  ;;  %v1926_v12 = vpop.f32.mrb[7].mxu0  ;;  %6540 = vrot.lane.b32.xlu0 %v6539_v51, %s7111_s18  ;;  %6530 = vrot.lane.b32.xlu1 %v6519_v32, %s7106_s30  ;;  %11861 = vst [vmem:[#allocation59_spill] sm:$0xff] %v9205_v57 }
 0x223   : > { %v2579_v33 = vmax.f32 %v1923_v30, 0.0  ;;  %v1927_v61 = vadd.f32 %v1926_v12, %v8590_v38  ;;  %v9241_v30 = vrot.slane %v8808_v0, %v9104_v10 }
 0x224   : > { %v2614_v31 = vmax.f32 %v1925_v37, 0.0  ;;  %v9209_v44 = vmul.f32 %v9198_v55, %v2578_v24 }
 0x225   : > { %v2615_v40 = vmax.f32 %v1927_v61, 0.0  ;;  %v9219_v7 = vmul.f32 %v9205_v57, %v2579_v33  ;;  %11865 = vst [vmem:[#allocation63_spill] sm:$0xff] %v9241_v30 }
 0x226   : > { %11862 = vst [vmem:[#allocation60_spill] sm:$0xff] %v9209_v44  ;;  %v9212_v52 = vmul.f32 %v9198_v55, %v2614_v31  ;;  %6555 = vrot.lane.b32.xlu0 %v8659_v16, %s7112_s28  ;;  %6545 = vrot.lane.b32.xlu1 %v8659_v16, %s7111_s18 }
 0x227   : > { %11864 = vst [vmem:[#allocation62_spill] sm:$0xff] %v9219_v7  ;;  %v9222_v19 = vmul.f32 %v9205_v57, %v2615_v40 }
 0x228   : > { %11863 = vst [vmem:[#allocation61_spill] sm:$0xff] %v9212_v52  ;;  %v6569_v12 = vpack.i.bf16 %v9212_v52, %v9209_v44 }
 0x229   : > { %v6599_v31 = vpack.i.bf16 %v9222_v19, %v9219_v7 }
 0x22a   : > { %6560 = vrot.lane.b32.xlu0 %v6539_v51, %s7106_s30  ;;  %6550 = vrot.lane.b32.xlu1 %v6539_v51, %s7112_s28 }
 0x22e   : > { %6570 = vrot.lane.b32.xlu0 %v6569_v12, %s7111_s18  ;;  %6565 = vrot.lane.b32.xlu1 %v8659_v16, %s7106_s30 }
 0x22f   : > { %v2006_v24 = vpop.f32.mrb[8].mxu0 }
 0x230   : > { %v2007_v37 = vadd.f32 %v2006_v24, %v8572_v39  ;;  %v2008_v33 = vpop.f32.mrb[9].mxu0  ;;  %v9249_v24 = vrot.slane %v8808_v0, %v9107_v28 }
 0x231   : > { %v2009_v61 = vadd.f32 %v2008_v33, %v8572_v39  ;;  %v2010_v40 = vpop.f32.mrb[10].mxu0 }
 0x232   : > { %v2582_v32 = vmax.f32 %v2007_v37, 0.0  ;;  %v2011_v57 = vadd.f32 %v2010_v40, %v8590_v38  ;;  %v2012_v51 = vpop.f32.mrb[11].mxu0  ;;  %6575 = vrot.lane.b32.xlu0 %v8758_v62, %s7111_s18  ;;  %6600 = vrot.lane.b32.xlu1 %v6599_v31, %s7111_s18  ;;  %11866 = vst [vmem:[#allocation64_spill] sm:$0xff] %v9249_v24 }
 0x233   : > { %v2583_v16 = vmax.f32 %v2009_v61, 0.0  ;;  %v2013_v33 = vadd.f32 %v2012_v51, %v8590_v38 }
 0x234   : > { %v2618_v37 = vmax.f32 %v2011_v57, 0.0  ;;  %v9253_v29 = vmul.f32 %v9241_v30, %v2582_v32 }
 0x235   : > { %v2619_v55 = vmax.f32 %v2013_v33, 0.0  ;;  %v9262_v61 = vmul.f32 %v9249_v24, %v2583_v16  ;;  %v9285_v33 = vrot.slane %v8808_v0, %v9189_v46 }
 0x236   : > { %11867 = vst [vmem:[#allocation65_spill] sm:$0xff] %v9253_v29  ;;  %v9256_v40 = vmul.f32 %v9241_v30, %v2618_v37  ;;  %6580 = vrot.lane.b32.xlu0 %v6569_v12, %s7112_s28  ;;  %6605 = vrot.lane.b32.xlu1 %v8764_v56, %s7111_s18 }
 0x237   : > { %11869 = vst [vmem:[#allocation67_spill] sm:$0xff] %v9262_v61  ;;  %v9265_v1 = vmul.f32 %v9249_v24, %v2619_v55  ;;  %11871 = vst [vmem:[#allocation69_spill] sm:$0xff] %v9285_v33 }
 0x238   : > { %11868 = vst [vmem:[#allocation66_spill] sm:$0xff] %v9256_v40  ;;  %v6629_v57 = vpack.i.bf16 %v9256_v40, %v9253_v29 }
 0x239   : > { %11870 = vst [vmem:[#allocation68_spill] sm:$0xff] %v9265_v1  ;;  %v6659_v51 = vpack.i.bf16 %v9265_v1, %v9262_v61 }
 0x23a   : > { %6585 = vrot.lane.b32.xlu0 %v8758_v62, %s7112_s28  ;;  %6610 = vrot.lane.b32.xlu1 %v6599_v31, %s7112_s28 }
 0x23e   : > { %6590 = vrot.lane.b32.xlu0 %v6569_v12, %s7106_s30  ;;  %6615 = vrot.lane.b32.xlu1 %v8764_v56, %s7112_s28 }
 0x23f   : > { %v2092_v55 = vpop.f32.mrb[12].mxu0 }
 0x240   : > { %v2093_v16 = vadd.f32 %v2092_v55, %v8572_v39  ;;  %v2094_v37 = vpop.f32.mrb[13].mxu0  ;;  %v9293_v55 = vrot.slane %v8808_v0, %v9192_v49 }
 0x241   : > { %v2095_v32 = vadd.f32 %v2094_v37, %v8572_v39  ;;  %v2096_v24 = vpop.f32.mrb[14].mxu0 }
 0x242   : > { %v2586_v30 = vmax.f32 %v2093_v16, 0.0  ;;  %v2097_v29 = vadd.f32 %v2096_v24, %v8590_v38  ;;  %v2098_v40 = vpop.f32.mrb[15].mxu0  ;;  %6595 = vrot.lane.b32.xlu0 %v8758_v62, %s7106_s30  ;;  %6620 = vrot.lane.b32.xlu1 %v6599_v31, %s7106_s30  ;;  %11872 = vst [vmem:[#allocation70_spill] sm:$0xff] %v9293_v55  ;;  %v9333_v31 = vrot.slane %v8952_v6, %v9104_v10 }
 0x243   : > { %v2587_v12 = vmax.f32 %v2095_v32, 0.0  ;;  %v2099_v37 = vadd.f32 %v2098_v40, %v8590_v38 }
 0x244   : > { %v2622_v16 = vmax.f32 %v2097_v29, 0.0  ;;  %v9297_v1 = vmul.f32 %v9285_v33, %v2586_v30  ;;  %11877 = vst [vmem:[#allocation75_spill] sm:$0xff] %v9333_v31 }
 0x245   : > { %v2623_v61 = vmax.f32 %v2099_v37, 0.0  ;;  %v9306_v62 = vmul.f32 %v9293_v55, %v2587_v12 }
 0x246   : > { %11873 = vst [vmem:[#allocation71_spill] sm:$0xff] %v9297_v1  ;;  %v9300_v24 = vmul.f32 %v9285_v33, %v2622_v16  ;;  %6630 = vrot.lane.b32.xlu0 %v6629_v57, %s7111_s18  ;;  %6625 = vrot.lane.b32.xlu1 %v8764_v56, %s7106_s30 }
 0x247   : > { %11875 = vst [vmem:[#allocation73_spill] sm:$0xff] %v9306_v62  ;;  %v9309_v0 = vmul.f32 %v9293_v55, %v2623_v61 }
 0x248   : > { %11874 = vst [vmem:[#allocation72_spill] sm:$0xff] %v9300_v24  ;;  %v9313_v29 = vpack.i.bf16 %v9300_v24, %v9297_v1 }
 0x249   : > { %11876 = vst [vmem:[#allocation74_spill] sm:$0xff] %v9309_v0  ;;  %v9319_v30 = vpack.i.bf16 %v9309_v0, %v9306_v62 }
 0x24a   : > { %6635 = vrot.lane.b32.xlu0 %v8860_v41, %s7111_s18  ;;  %6660 = vrot.lane.b32.xlu1 %v6659_v51, %s7111_s18 }
 0x24e   : > { %6640 = vrot.lane.b32.xlu0 %v6629_v57, %s7112_s28  ;;  %6665 = vrot.lane.b32.xlu1 %v8866_v14, %s7111_s18 }
 0x24f   : > { %v2178_v40 = vpop.f32.mrb[16].mxu0 }
 0x250   : > { %v2179_v61 = vadd.f32 %v2178_v40, %v8572_v39  ;;  %v2180_v32 = vpop.f32.mrb[17].mxu0  ;;  %v9341_v40 = vrot.slane %v8952_v6, %v9107_v28 }
 0x251   : > { %v2181_v12 = vadd.f32 %v2180_v32, %v8572_v39  ;;  %v2182_v37 = vpop.f32.mrb[18].mxu0 }
 0x252   : > { %v2590_v16 = vmax.f32 %v2179_v61, 0.0  ;;  %v2183_v56 = vadd.f32 %v2182_v37, %v8590_v38  ;;  %v2184_v55 = vpop.f32.mrb[19].mxu0  ;;  %6645 = vrot.lane.b32.xlu0 %v8860_v41, %s7112_s28  ;;  %6670 = vrot.lane.b32.xlu1 %v6659_v51, %s7112_s28  ;;  %11878 = vst [vmem:[#allocation76_spill] sm:$0xff] %v9341_v40 }
 0x253   : > { %v2591_v33 = vmax.f32 %v2181_v12, 0.0  ;;  %v2185_v32 = vadd.f32 %v2184_v55, %v8590_v38 }
 0x254   : > { %v2626_v61 = vmax.f32 %v2183_v56, 0.0  ;;  %v9345_v24 = vmul.f32 %v9333_v31, %v2590_v16 }
 0x255   : > { %v2627_v1 = vmax.f32 %v2185_v32, 0.0  ;;  %v9354_v12 = vmul.f32 %v9341_v40, %v2591_v33 }
 0x256   : > { %11879 = vst [vmem:[#allocation77_spill] sm:$0xff] %v9345_v24  ;;  %v9348_v37 = vmul.f32 %v9333_v31, %v2626_v61  ;;  %6650 = vrot.lane.b32.xlu0 %v6629_v57, %s7106_s30  ;;  %6675 = vrot.lane.b32.xlu1 %v8866_v14, %s7112_s28  ;;  %v9382_v57 = vrot.slane %v8952_v6, %v9189_v46 }
 0x257   : > { %11881 = vst [vmem:[#allocation79_spill] sm:$0xff] %v9354_v12  ;;  %v9357_v62 = vmul.f32 %v9341_v40, %v2627_v1 }
 0x258   : > { %11880 = vst [vmem:[#allocation78_spill] sm:$0xff] %v9348_v37  ;;  %v9361_v55 = vpack.i.bf16 %v9348_v37, %v9345_v24  ;;  %11883 = vst [vmem:[#allocation81_spill] sm:$0xff] %v9382_v57 }
 0x259   : > { %11882 = vst [vmem:[#allocation80_spill] sm:$0xff] %v9357_v62  ;;  %v9367_v16 = vpack.i.bf16 %v9357_v62, %v9354_v12 }
 0x25a   : > { %6655 = vrot.lane.b32.xlu0 %v8860_v41, %s7106_s30  ;;  %6680 = vrot.lane.b32.xlu1 %v6659_v51, %s7106_s30 }
 0x25e   : > { %6690 = vrot.lane.b32.xlu0 %v9313_v29, %s7111_s18  ;;  %6685 = vrot.lane.b32.xlu1 %v8866_v14, %s7106_s30 }
 0x25f   : > { %v2264_v1 = vpop.f32.mrb[20].mxu0 }
 0x260   : > { %v2265_v33 = vadd.f32 %v2264_v1, %v8572_v39  ;;  %v2266_v32 = vpop.f32.mrb[21].mxu0  ;;  %v9391_v1 = vrot.slane %v8952_v6, %v9192_v49 }
 0x261   : > { %v2267_v61 = vadd.f32 %v2266_v32, %v8572_v39  ;;  %v2268_v56 = vpop.f32.mrb[22].mxu0 }
 0x262   : > { %v2594_v40 = vmax.f32 %v2265_v33, 0.0  ;;  %v2269_v41 = vadd.f32 %v2268_v56, %v8590_v38  ;;  %v2270_v51 = vpop.f32.mrb[23].mxu0  ;;  %6705 = vrot.lane.b32.xlu0 %v9174_v63, %s7112_s28  ;;  %6695 = vrot.lane.b32.xlu1 %v9319_v30, %s7111_s18  ;;  %11884 = vst [vmem:[#allocation82_spill] sm:$0xff] %v9391_v1 }
 0x263   : > { %v2595_v14 = vmax.f32 %v2267_v61, 0.0  ;;  %v2271_v33 = vadd.f32 %v2270_v51, %v8590_v38 }
 0x264   : > { %v2630_v32 = vmax.f32 %v2269_v41, 0.0  ;;  %v9395_v24 = vmul.f32 %v9382_v57, %v2594_v40 }
 0x265   : > { %v2631_v31 = vmax.f32 %v2271_v33, 0.0  ;;  %v9405_v61 = vmul.f32 %v9391_v1, %v2595_v14 }
 0x266   : > { %11885 = vst [vmem:[#allocation83_spill] sm:$0xff] %v9395_v24  ;;  %v9398_v56 = vmul.f32 %v9382_v57, %v2630_v32  ;;  %6710 = vrot.lane.b32.xlu0 %v8936_v54, %s7111_s18  ;;  %6700 = vrot.lane.b32.xlu1 %v9174_v63, %s7111_s18  ;;  %v9434_v57 = vrot.slane %v9029_v20, %v9104_v10 }
 0x267   : > { %11887 = vst [vmem:[#allocation85_spill] sm:$0xff] %v9405_v61  ;;  %v9408_v6 = vmul.f32 %v9391_v1, %v2631_v31 }
 0x268   : > { %11886 = vst [vmem:[#allocation84_spill] sm:$0xff] %v9398_v56  ;;  %v9412_v41 = vpack.i.bf16 %v9398_v56, %v9395_v24  ;;  %11889 = vst [vmem:[#allocation87_spill] sm:$0xff] %v9434_v57 }
 0x269   : > { %11888 = vst [vmem:[#allocation86_spill] sm:$0xff] %v9408_v6  ;;  %v9418_v51 = vpack.i.bf16 %v9408_v6, %v9405_v61 }
 0x26a   : > { %6720 = vrot.lane.b32.xlu0 %v9313_v29, %s7112_s28  ;;  %6715 = vrot.lane.b32.xlu1 %v8942_v2, %s7111_s18 }
 0x26e   : > { %6735 = vrot.lane.b32.xlu0 %v8936_v54, %s7112_s28  ;;  %6725 = vrot.lane.b32.xlu1 %v9174_v63, %s7106_s30 }
 0x26f   : > { %v2350_v31 = vpop.f32.mrb[24].mxu0 }
 0x270   : > { %v2351_v14 = vadd.f32 %v2350_v31, %v8572_v39  ;;  %v2352_v32 = vpop.f32.mrb[25].mxu0  ;;  %v9443_v31 = vrot.slane %v9029_v20, %v9107_v28 }
 0x271   : > { %v2353_v40 = vadd.f32 %v2352_v32, %v8572_v39  ;;  %v2354_v1 = vpop.f32.mrb[26].mxu0 }
 0x272   : > { %v2598_v33 = vmax.f32 %v2351_v14, 0.0  ;;  %v2355_v24 = vadd.f32 %v2354_v1, %v8590_v38  ;;  %v2356_v56 = vpop.f32.mrb[27].mxu0  ;;  %6745 = vrot.lane.b32.xlu0 %v9313_v29, %s7106_s30  ;;  %6730 = vrot.lane.b32.xlu1 %v9319_v30, %s7112_s28  ;;  %11890 = vst [vmem:[#allocation88_spill] sm:$0xff] %v9443_v31 }
 0x273   : > { %v2599_v63 = vmax.f32 %v2353_v40, 0.0  ;;  %v2357_v14 = vadd.f32 %v2356_v56, %v8590_v38 }
 0x274   : > { %v2634_v32 = vmax.f32 %v2355_v24, 0.0  ;;  %v9447_v6 = vmul.f32 %v9434_v57, %v2598_v33 }
 0x275   : > { %v2635_v61 = vmax.f32 %v2357_v14, 0.0  ;;  %v9457_v29 = vmul.f32 %v9443_v31, %v2599_v63 }
 0x276   : > { %11891 = vst [vmem:[#allocation89_spill] sm:$0xff] %v9447_v6  ;;  %v9450_v1 = vmul.f32 %v9434_v57, %v2634_v32  ;;  %6755 = vrot.lane.b32.xlu0 %v8936_v54, %s7106_s30  ;;  %6740 = vrot.lane.b32.xlu1 %v8942_v2, %s7112_s28 }
 0x277   : > { %11893 = vst [vmem:[#allocation91_spill] sm:$0xff] %v9457_v29  ;;  %v9460_v40 = vmul.f32 %v9443_v31, %v2635_v61  ;;  %v9486_v31 = vrot.slane %v9029_v20, %v9189_v46 }
 0x278   : > { %11892 = vst [vmem:[#allocation90_spill] sm:$0xff] %v9450_v1  ;;  %v9464_v24 = vpack.i.bf16 %v9450_v1, %v9447_v6 }
 0x279   : > { %11894 = vst [vmem:[#allocation92_spill] sm:$0xff] %v9460_v40  ;;  %v9470_v33 = vpack.i.bf16 %v9460_v40, %v9457_v29  ;;  %11895 = vst [vmem:[#allocation93_spill] sm:$0xff] %v9486_v31 }
 0x27a   : > { %6765 = vrot.lane.b32.xlu0 %v9361_v55, %s7111_s18  ;;  %6750 = vrot.lane.b32.xlu1 %v9319_v30, %s7106_s30 }
 0x27e   : > { %6775 = vrot.lane.b32.xlu0 %v8980_v25, %s7111_s18  ;;  %6760 = vrot.lane.b32.xlu1 %v8942_v2, %s7106_s30 }
 0x27f   : > { %v2436_v61 = vpop.f32.mrb[28].mxu0 }
 0x280   : > { %v2437_v63 = vadd.f32 %v2436_v61, %v8572_v39  ;;  %v2438_v14 = vpop.f32.mrb[29].mxu0  ;;  %v9495_v61 = vrot.slane %v9029_v20, %v9192_v49 }
 0x281   : > { %v2439_v32 = vadd.f32 %v2438_v14, %v8572_v39  ;;  %v2440_v56 = vpop.f32.mrb[30].mxu0 }
 0x282   : > { %v2602_v54 = vmax.f32 %v2437_v63, 0.0  ;;  %v2441_v30 = vadd.f32 %v2440_v56, %v8590_v38  ;;  %v2442_v57 = vpop.f32.mrb[31].mxu0  ;;  %6785 = vrot.lane.b32.xlu0 %v9361_v55, %s7112_s28  ;;  %6770 = vrot.lane.b32.xlu1 %v9367_v16, %s7111_s18  ;;  %11896 = vst [vmem:[#allocation94_spill] sm:$0xff] %v9495_v61 }
 0x283   : > { %v2603_v2 = vmax.f32 %v2439_v32, 0.0  ;;  %v2443_v63 = vadd.f32 %v2442_v57, %v8590_v38  ;;  %v9514_v57 = vpop.permute.xlu0 %6515 }
 0x284   : > { %v2638_v14 = vmax.f32 %v2441_v30, 0.0  ;;  %v9499_v46 = vmul.f32 %v9486_v31, %v2602_v54 }
 0x285   : > { %v2639_v6 = vmax.f32 %v2443_v63, 0.0  ;;  %v9509_v32 = vmul.f32 %v9495_v61, %v2603_v2 }
 0x286   : > { %11897 = vst [vmem:[#allocation95_spill] sm:$0xff] %v9499_v46  ;;  %v9502_v56 = vmul.f32 %v9486_v31, %v2638_v14  ;;  %6795 = vrot.lane.b32.xlu0 %v8980_v25, %s7112_s28  ;;  %6780 = vrot.lane.b32.xlu1 %v8986_v36, %s7111_s18 }
 0x287   : > { %11899 = vst [vmem:[#allocation97_spill] sm:$0xff] %v9509_v32  ;;  %v9512_v20 = vmul.f32 %v9495_v61, %v2639_v6 }
 0x288   : > { %11898 = vst [vmem:[#allocation96_spill] sm:$0xff] %v9502_v56  ;;  %v9518_v54 = vpack.i.bf16 %v9502_v56, %v9499_v46 }
 0x289   : > { %11900 = vst [vmem:[#allocation98_spill] sm:$0xff] %v9512_v20  ;;  %v9524_v63 = vpack.i.bf16 %v9512_v20, %v9509_v32  ;;  %v9548_v32 = vrot.slane %v9112_v48, %v9104_v10  ;;  %v6517_v10 = vunpack.i.l.bf16 %v9514_v57 }
 0x28a   : > { %6805 = vrot.lane.b32.xlu0 %v9361_v55, %s7106_s30  ;;  %6790 = vrot.lane.b32.xlu1 %v9367_v16, %s7112_s28 }
 0x28b   : > { %11901 = vst [vmem:[#allocation99_spill] sm:$0xff] %v9548_v32 }
 0x28c   : > { %v9532_v6 = vpop.permute.xlu0 %6520  ;;  %v9534_v14 = vpop.permute.xlu1 %6510 }
 0x28d   : > { %v11617_v29 = vunpack.i.l.bf16 %v9534_v14 }
 0x28e   : > { %6815 = vrot.lane.b32.xlu0 %v8980_v25, %s7106_s30  ;;  %6800 = vrot.lane.b32.xlu1 %v8986_v36, %s7112_s28 }
 0x28f   : > { %v2522_v30 = vpop.f32.mrb[32].mxu0 }
 0x290   : > { %v2523_v61 = vadd.f32 %v2522_v30, %v8572_v39  ;;  %v2524_v2 = vpop.f32.mrb[33].mxu0  ;;  %v9541_v31 = vpop.permute.xlu0 %6535  ;;  %v6518_v30 = vunpack.i.h.bf16 %v9514_v57 }
 0x291   : > { %v2525_v55 = vadd.f32 %v2524_v2, %v8572_v39  ;;  %v9544_v49 = vpop.permute.xlu1 %6525  ;;  %v2526_v46 = vpop.f32.mrb[34].mxu0  ;;  %v9558_v2 = vrot.slane %v9112_v48, %v9107_v28  ;;  %v11622_v48 = vunpack.i.h.bf16 %v9534_v14 }
 0x292   : > { %v2606_v56 = vmax.f32 %v2523_v61, 0.0  ;;  %v2527_v25 = vadd.f32 %v2526_v46, %v8590_v38  ;;  %v2528_v20 = vpop.f32.mrb[35].mxu0  ;;  %6825 = vrot.lane.b32.xlu0 %v9412_v41, %s7111_s18  ;;  %6810 = vrot.lane.b32.xlu1 %v9367_v16, %s7106_s30 }
 0x293   : > { %v2607_v39 = vmax.f32 %v2525_v55, 0.0  ;;  %11902 = vst [vmem:[#allocation100_spill] sm:$0xff] %v9558_v2  ;;  %v2529_v61 = vadd.f32 %v2528_v20, %v8590_v38  ;;  %v6528_v38 = vunpack.i.h.bf16 %v9544_v49 }
 0x294   : > { %v2642_v1 = vmax.f32 %v2527_v25, 0.0  ;;  %v6541_v46 = vpop.permute.xlu0 %6540  ;;  %v9569_v28 = vmul.f32 %v9548_v32, %v2606_v56  ;;  %v6527_v25 = vunpack.i.l.bf16 %v9544_v49 }
 0x295   : > { %v2643_v16 = vmax.f32 %v2529_v61, 0.0  ;;  %v6543_v40 = vunpack.i.h.bf16 %v6541_v46  ;;  %v6542_v37 = vunpack.i.l.bf16 %v6541_v46  ;;  %v9565_v55 = vpop.permute.xlu1 %6530  ;;  %v9580_v57 = vmul.f32 %v9558_v2, %v2607_v39 }
 0x296   : > { %11903 = vst [vmem:[#allocation101_spill] sm:$0xff] %v9569_v28  ;;  %v9573_v20 = vmul.f32 %v9548_v32, %v2642_v1  ;;  %6835 = vrot.lane.b32.xlu0 %v9016_v22, %s7111_s18  ;;  %6820 = vrot.lane.b32.xlu1 %v8986_v36, %s7106_s30 }
 0x297   : > { %11905 = vst [vmem:[#allocation103_spill] sm:$0xff] %v9580_v57  ;;  %v9584_v61 = vmul.f32 %v9558_v2, %v2643_v16  ;;  %v3260_v1 = vsel %vm3191_vm4, %v11617_v29, %v6542_v37  ;;  %v3259_v56 = vsel %vm3191_vm4, %v6543_v40, %v6518_v30  ;;  %v3261_v36 = vsel %vm3191_vm4, %v11622_v48, %v6543_v40 }
 0x298   : > { %11904 = vst [vmem:[#allocation102_spill] sm:$0xff] %v9573_v20  ;;  %v9592_v46 = vpop.permute.xlu0 %6555  ;;  %v9600_v49 = vpack.i.bf16 %v9573_v20, %v9569_v28  ;;  %v3265_v29 = vpack.c.bf16 %v3261_v36, %v3260_v1  ;;  %v3258_v40 = vsel %vm3191_vm4, %v6542_v37, %v6517_v10  ;;  %v6538_v28 = vunpack.i.h.bf16 %v9541_v31 }
 0x299   : > { %11906 = vst [vmem:[#allocation104_spill] sm:$0xff] %v9584_v61  ;;  %v11624_v16 = vunpack.i.l.bf16 %v9592_v46  ;;  %v6546_v2 = vpop.permute.xlu1 %6545  ;;  %v9606_v32 = vpack.i.bf16 %v9584_v61, %v9580_v57  ;;  %v11907_v0 = vunpack.i.h.bf16 %v9592_v46 }
 0x29a   : > { %v6548_v12 = vunpack.i.h.bf16 %v6546_v2  ;;  %v6547_v62 = vunpack.i.l.bf16 %v6546_v2  ;;  %6845 = vrot.lane.b32.xlu0 %v9412_v41, %s7112_s28  ;;  %6830 = vrot.lane.b32.xlu1 %v9418_v51, %s7111_s18 }
 0x29b   : > { %4367 = vmatprep.subr.bf16.mxu0 %v3265_v29  ;;  %v3617_v1 = vsel %vm3552_vm5, %v6527_v25, %v11624_v16  ;;  %v3618_v37 = vsel %vm3552_vm5, %v6528_v38, %v11907_v0 }
 0x29c   : > { %v9620_v48 = vpop.permute.xlu0 %6560  ;;  %v3256_v2 = vsel %vm3191_vm4, %v6517_v10, %v6547_v62  ;;  %v3257_v39 = vsel %vm3191_vm4, %v6518_v30, %v6548_v12  ;;  %v3266_v10 = vpack.c.bf16 %v3259_v56, %v3258_v40  ;;  %v3628_v29 = vpack.c.bf16 %v3618_v37, %v3617_v1 }
 0x29d   : > { %v9632_v16 = vpop.permute.xlu1 %6550  ;;  %v3267_v44 = vpack.c.bf16 %v3257_v39, %v3256_v2  ;;  %v11630_v0 = vunpack.i.l.bf16 %v9620_v48  ;;  %v6537_v40 = vunpack.i.l.bf16 %v9541_v31  ;;  %v12076_v4 = vld [vmem:[#allocation101_spill] sm:$0xff] }
 0x29e   : > { %v11632_v36 = vunpack.i.h.bf16 %v9632_v16  ;;  %v11628_v57 = vunpack.i.l.bf16 %v9632_v16  ;;  %6855 = vrot.lane.b32.xlu0 %v9016_v22, %s7112_s28  ;;  %6840 = vrot.lane.b32.xlu1 %v9022_v3, %s7111_s18 }
 0x29f   : > { %4410 = vmatprep.subr.bf16.mxu1 %v3267_v44  ;;  %v3979_v31 = vsel %vm983_vm1, %v11630_v0, %v6537_v40 }
 0x2a0   : > { %v3619_v39 = vsel %vm3552_vm5, %v11628_v57, %v6527_v25  ;;  %v3620_v2 = vsel %vm3552_vm5, %v11632_v36, %v6528_v38  ;;  %4411 = vmatpush1.bf16.msra.mxu1 %v3266_v10  ;;  %v9651_v56 = vpop.permute.xlu0 %6570  ;;  %v11908_v38 = vunpack.i.h.bf16 %v9620_v48 }
 0x2a1   : > { %v11631_v44 = vunpack.i.h.bf16 %v9651_v56  ;;  %v11629_v1 = vunpack.i.l.bf16 %v9651_v56  ;;  %v9656_v37 = vpop.permute.xlu1 %6565  ;;  %4412 = vmatprep.subr.bf16.mxu1 %v3628_v29  ;;  %v3627_v30 = vpack.c.bf16 %v3620_v2, %v3619_v39 }
 0x2a2   : > { %v6568_v25 = vunpack.i.h.bf16 %v9656_v37  ;;  %v6567_v57 = vunpack.i.l.bf16 %v9656_v37  ;;  %6865 = vrot.lane.b32.xlu0 %v9412_v41, %s7106_s30  ;;  %6850 = vrot.lane.b32.xlu1 %v9418_v51, %s7112_s28  ;;  %v3980_v29 = vsel %vm983_vm1, %v11908_v38, %v6538_v28 }
 0x2a3   : > { %v9676_v10 = vsel %vm3191_vm4, %v6547_v62, %v11629_v1  ;;  %v9682_v41 = vsel %vm3191_vm4, %v6548_v12, %v11631_v44  ;;  %v3987_v12 = vpack.c.bf16 %v3980_v29, %v3979_v31 }
 0x2a4   : > { %4413 = vmatpush1.bf16.msra.mxu1 %v3627_v30  ;;  %v6576_v39 = vpop.permute.xlu0 %6575  ;;  %v3977_v2 = vsel %vm983_vm1, %v6537_v40, %v6567_v57  ;;  %v3978_v38 = vsel %vm983_vm1, %v6538_v28, %v6568_v25 }
 0x2a5   : > { %v9694_v1 = vpop.permute.xlu1 %6600  ;;  %v3988_v0 = vpack.c.bf16 %v3978_v38, %v3977_v2  ;;  %v6578_v30 = vunpack.i.h.bf16 %v6576_v39  ;;  %v6577_v40 = vunpack.i.l.bf16 %v6576_v39 }
 0x2a6   : > { %6875 = vrot.lane.b32.xlu0 %v9016_v22, %s7106_s30  ;;  %6860 = vrot.lane.b32.xlu1 %v9022_v3, %s7112_s28  ;;  %v11633_v44 = vunpack.i.h.bf16 %v9694_v1  ;;  %v11634_v36 = vunpack.i.l.bf16 %v9694_v1  ;;  %v11909_v22 = vpack.c.bf16 %v8649_v50, %v8631_v58  ;;  %v11910_v50 = vunpack.i.l.bf16 %v9592_v46 }
 0x2a7   : > { %4414 = vmatprep.subr.bf16.mxu1 %v3988_v0 }
 0x2a8   : > { %4415 = vmatpush1.bf16.msra.mxu1 %v3987_v12  ;;  %v9702_v28 = vpop.permute.xlu0 %6580  ;;  %v3251_v0 = vsel %vm3191_vm4, %v11633_v44, %v6578_v30  ;;  %v3250_v58 = vsel %vm3191_vm4, %v11634_v36, %v6577_v40  ;;  %v11912_v44 = vpack.c.bf16 %v8638_v23, %v8626_v27 }
 0x2a9   : > { %v11635_v62 = vunpack.i.h.bf16 %v9702_v28  ;;  %v11636_v2 = vunpack.i.l.bf16 %v9702_v28  ;;  %v9706_v38 = vpop.permute.xlu1 %6605  ;;  %4416 = vmatprep.subr.bf16.mxu1 %v11909_v22  ;;  %v9744_v22 = vld [vmem:[%s11356_s1 + $0x8] sm:$0xff]   ;;  %v3270_v27 = vpack.c.bf16 %v3251_v0, %v3250_v58 }
 0x2aa   : > { %v11640_v31 = vunpack.i.h.bf16 %v9706_v38  ;;  %v11637_v29 = vunpack.i.l.bf16 %v9706_v38  ;;  %6885 = vrot.lane.b32.xlu0 %v9464_v24, %s7111_s18  ;;  %6870 = vrot.lane.b32.xlu1 %v9418_v51, %s7106_s30  ;;  %v11911_v51 = vunpack.i.h.bf16 %v9592_v46 }
 0x2ab   : > { %v9731_v39 = vsel %vm3552_vm5, %v11910_v50, %v11636_v2 }
 0x2ac   : > { %v9739_v12 = vsel %vm3552_vm5, %v11911_v51, %v11635_v62  ;;  %4417 = vmatpush1.bf16.msra.mxu1 %v11912_v44  ;;  %v6586_v36 = vpop.permute.xlu0 %6585  ;;  %v3248_v50 = vsel %vm3191_vm4, %v6577_v40, %v11637_v29  ;;  %v3249_v46 = vsel %vm3191_vm4, %v6578_v30, %v11640_v31 }
 0x2ad   : > { %v9759_v62 = vpop.permute.xlu1 %6610  ;;  %v3271_v2 = vpack.c.bf16 %v3249_v46, %v3248_v50  ;;  %v6588_v23 = vunpack.i.h.bf16 %v6586_v36  ;;  %v6587_v44 = vunpack.i.l.bf16 %v6586_v36 }
 0x2ae   : > { %6895 = vrot.lane.b32.xlu0 %v9057_v59, %s7111_s18  ;;  %6880 = vrot.lane.b32.xlu1 %v9022_v3, %s7106_s30  ;;  %v11638_v40 = vunpack.i.h.bf16 %v9759_v62  ;;  %v11639_v29 = vunpack.i.l.bf16 %v9759_v62 }
 0x2af   : > { %5929 = vmatmul.mubr.msk.bf16.vlgmr.msra.gmra.mrb[36].mxu1 %vm1796_vm3, %v9744_v22  ;;  %4496 = vmatprep.subr.bf16.mxu1 %v3271_v2 }
 0x2b0   : > { %4497 = vmatpush1.bf16.msra.mxu1 %v3270_v27  ;;  %v9769_v30 = vpop.permute.xlu0 %6590  ;;  %4528 = vmatprep.mubr.bf16.mxu1 %v11690_v9  ;;  %v3612_v2 = vsel %vm3552_vm5, %v11638_v40, %v6588_v23  ;;  %v3611_v46 = vsel %vm3552_vm5, %v11639_v29, %v6587_v44 }
 0x2b1   : > { %v11643_v50 = vunpack.i.h.bf16 %v9769_v30  ;;  %v11641_v3 = vunpack.i.l.bf16 %v9769_v30  ;;  %v9774_v0 = vpop.permute.xlu1 %6615  ;;  %v3631_v37 = vpack.c.bf16 %v3612_v2, %v3611_v46  ;;  %v11913_v46 = vunpack.i.l.bf16 %v9706_v38 }
 0x2b2   : > { %v11645_v36 = vunpack.i.h.bf16 %v9774_v0  ;;  %v6617_v58 = vunpack.i.l.bf16 %v9774_v0  ;;  %6905 = vrot.lane.b32.xlu0 %v9464_v24, %s7112_s28  ;;  %6890 = vrot.lane.b32.xlu1 %v9470_v33, %s7111_s18 }
 0x2b3   : > { %v9796_v27 = vsel %vm983_vm1, %v6567_v57, %v11641_v3  ;;  %v9804_v51 = vsel %vm983_vm1, %v6568_v25, %v11643_v50 }
 0x2b4   : > { %v6596_v40 = vpop.permute.xlu0 %6595  ;;  %v3609_v29 = vsel %vm3552_vm5, %v6587_v44, %v6617_v58  ;;  %v3610_v31 = vsel %vm3552_vm5, %v6588_v23, %v11645_v36 }
 0x2b5   : > { %v9814_v3 = vpop.permute.xlu1 %6620  ;;  %v3632_v20 = vpack.c.bf16 %v3610_v31, %v3609_v29  ;;  %v6598_v25 = vunpack.i.h.bf16 %v6596_v40  ;;  %v6597_v44 = vunpack.i.l.bf16 %v6596_v40 }
 0x2b6   : > { %6915 = vrot.lane.b32.xlu0 %v9057_v59, %s7112_s28  ;;  %6900 = vrot.lane.b32.xlu1 %v9063_v8, %s7111_s18  ;;  %v11646_v50 = vunpack.i.h.bf16 %v9814_v3  ;;  %v11647_v61 = vunpack.i.l.bf16 %v9814_v3 }
 0x2b7   : > { %4498 = vmatprep.subr.bf16.mxu1 %v3632_v20 }
 0x2b8   : > { %4499 = vmatpush1.bf16.msra.mxu1 %v3631_v37  ;;  %v9822_v23 = vpop.permute.xlu0 %6630  ;;  %v3972_v20 = vsel %vm983_vm1, %v11646_v50, %v6598_v25  ;;  %v3971_v40 = vsel %vm983_vm1, %v11647_v61, %v6597_v44  ;;  %v11914_v37 = vunpack.i.h.bf16 %v9706_v38 }
 0x2b9   : > { %v11652_v57 = vunpack.i.h.bf16 %v9822_v23  ;;  %v11649_v31 = vunpack.i.l.bf16 %v9822_v23  ;;  %v9826_v29 = vpop.permute.xlu1 %6625  ;;  %v3991_v7 = vpack.c.bf16 %v3972_v20, %v3971_v40 }
 0x2ba   : > { %v11653_v2 = vunpack.i.l.bf16 %v9826_v29  ;;  %6925 = vrot.lane.b32.xlu0 %v9464_v24, %s7106_s30  ;;  %6910 = vrot.lane.b32.xlu1 %v9470_v33, %s7112_s28 }
 0x2bb   : > { %v9848_v24 = vsel %vm3191_vm4, %v11913_v46, %v11649_v31  ;;  %v9856_v50 = vsel %vm3191_vm4, %v11914_v37, %v11652_v57  ;;  %v11915_v46 = vunpack.i.h.bf16 %v9826_v29 }
 0x2bc   : > { %v6636_v61 = vpop.permute.xlu0 %6635  ;;  %v3969_v52 = vsel %vm983_vm1, %v6597_v44, %v11653_v2 }
 0x2bd   : > { %v3970_v31 = vsel %vm983_vm1, %v6598_v25, %v11915_v46  ;;  %v9868_v34 = vpop.permute.xlu1 %6660  ;;  %v6638_v37 = vunpack.i.h.bf16 %v6636_v61  ;;  %v6637_v36 = vunpack.i.l.bf16 %v6636_v61 }
 0x2be   : > { %v3992_v38 = vpack.c.bf16 %v3970_v31, %v3969_v52  ;;  %6935 = vrot.lane.b32.xlu0 %v9057_v59, %s7106_s30  ;;  %6920 = vrot.lane.b32.xlu1 %v9063_v8, %s7112_s28  ;;  %v11656_v57 = vunpack.i.h.bf16 %v9868_v34  ;;  %v11658_v44 = vunpack.i.l.bf16 %v9868_v34  ;;  %v11916_v59 = vpack.c.bf16 %v8754_v5, %v8736_v45 }
 0x2c0   : > { %4500 = vmatprep.subr.bf16.mxu1 %v3992_v38  ;;  %v9876_v2 = vpop.permute.xlu0 %6640  ;;  %v3242_v45 = vsel %vm3191_vm4, %v11658_v44, %v6637_v36  ;;  %v11918_v38 = vpack.c.bf16 %v8742_v13, %v8731_v60 }
 0x2c1   : > { %4501 = vmatpush1.bf16.msra.mxu1 %v3991_v7  ;;  %v11654_v25 = vunpack.i.h.bf16 %v9876_v2  ;;  %v11655_v52 = vunpack.i.l.bf16 %v9876_v2  ;;  %v9880_v31 = vpop.permute.xlu1 %6665  ;;  %v3243_v7 = vsel %vm3191_vm4, %v11656_v57, %v6638_v37  ;;  %v11921_v57 = vunpack.i.h.bf16 %v9826_v29 }
 0x2c2   : > { %4502 = vmatprep.subr.bf16.mxu1 %v11916_v59  ;;  %v11660_v61 = vunpack.i.h.bf16 %v9880_v31  ;;  %v11662_v20 = vunpack.i.l.bf16 %v9880_v31  ;;  %6945 = vrot.lane.b32.xlu0 %v9518_v54, %s7111_s18 }
 0x2c3   : > { %6930 = vrot.lane.b32.xlu1 %v9470_v33, %s7106_s30  ;;  %v9903_v5 = vsel %vm3552_vm5, %v6617_v58, %v11655_v52  ;;  %v11917_v33 = vunpack.i.h.bf16 %v9774_v0  ;;  %v3274_v52 = vpack.c.bf16 %v3243_v7, %v3242_v45 }
 0x2c4   : > { %v6646_v59 = vpop.permute.xlu0 %6645  ;;  %v3240_v58 = vsel %vm3191_vm4, %v6637_v36, %v11662_v20  ;;  %v3241_v0 = vsel %vm3191_vm4, %v6638_v37, %v11660_v61 }
 0x2c5   : > { %v9911_v40 = vsel %vm3552_vm5, %v11917_v33, %v11654_v25  ;;  %4503 = vmatpush1.bf16.msra.mxu1 %v11918_v38  ;;  %v9926_v33 = vpop.permute.xlu1 %6670  ;;  %v3275_v25 = vpack.c.bf16 %v3241_v0, %v3240_v58  ;;  %v6648_v60 = vunpack.i.h.bf16 %v6646_v59  ;;  %v6647_v13 = vunpack.i.l.bf16 %v6646_v59 }
 0x2c6   : > { %6955 = vrot.lane.b32.xlu0 %v9093_v18, %s7111_s18  ;;  %v11657_v38 = vunpack.i.h.bf16 %v9926_v33  ;;  %v11659_v36 = vunpack.i.l.bf16 %v9926_v33  ;;  %v11919_v0 = vunpack.i.l.bf16 %v9826_v29 }
 0x2c7   : > { %6940 = vrot.lane.b32.xlu1 %v9063_v8, %s7106_s30  ;;  %4582 = vmatprep.subr.bf16.mxu1 %v3275_v25 }
 0x2c8   : > { %5931 = vmatmul.mubr.msk.bf16.vlgmr.msra.gmra.mrb[40].mxu1 %vm1796_vm3, %v9744_v22  ;;  %v9936_v37 = vpop.permute.xlu0 %6650  ;;  %v3604_v25 = vsel %vm3552_vm5, %v11657_v38, %v6648_v60 }
 0x2c9   : > { %4583 = vmatpush1.bf16.msra.mxu1 %v3274_v52  ;;  %4614 = vmatprep.mubr.bf16.mxu1 %v11690_v9  ;;  %v11663_v7 = vunpack.i.h.bf16 %v9936_v37  ;;  %v11661_v45 = vunpack.i.l.bf16 %v9936_v37  ;;  %v9941_v8 = vpop.permute.xlu1 %6675  ;;  %v3603_v52 = vsel %vm3552_vm5, %v11659_v36, %v6647_v13 }
 0x2ca   : > { %v11665_v59 = vunpack.i.h.bf16 %v9941_v8  ;;  %v11664_v58 = vunpack.i.l.bf16 %v9941_v8  ;;  %6965 = vrot.lane.b32.xlu0 %v9518_v54, %s7112_s28  ;;  %v3635_v20 = vpack.c.bf16 %v3604_v25, %v3603_v52 }
 0x2cb   : > { %6950 = vrot.lane.b32.xlu1 %v9524_v63, %s7111_s18  ;;  %v9963_v46 = vsel %vm983_vm1, %v11919_v0, %v11661_v45  ;;  %v9971_v38 = vsel %vm983_vm1, %v11921_v57, %v11663_v7 }
 0x2cc   : > { %11920 = vst [vmem:[#allocation105_spill] sm:$0xff] %v9963_v46  ;;  %v6656_v36 = vpop.permute.xlu0 %6655  ;;  %v3601_v61 = vsel %vm3552_vm5, %v6647_v13, %v11664_v58  ;;  %v3602_v0 = vsel %vm3552_vm5, %v6648_v60, %v11665_v59  ;;  %v11925_v59 = vunpack.i.h.bf16 %v9880_v31 }
 0x2cd   : > { %v9983_v45 = vpop.permute.xlu1 %6680  ;;  %v3636_v29 = vpack.c.bf16 %v3602_v0, %v3601_v61  ;;  %v6658_v57 = vunpack.i.h.bf16 %v6656_v36  ;;  %v6657_v44 = vunpack.i.l.bf16 %v6656_v36 }
 0x2ce   : > { %6975 = vrot.lane.b32.xlu0 %v9093_v18, %s7112_s28  ;;  %v11666_v7 = vunpack.i.h.bf16 %v9983_v45  ;;  %v11667_v13 = vunpack.i.l.bf16 %v9983_v45 }
 0x2cf   : > { %6960 = vrot.lane.b32.xlu1 %v9097_v35, %s7111_s18  ;;  %4584 = vmatprep.subr.bf16.mxu1 %v3636_v29  ;;  %v11923_v29 = vunpack.i.l.bf16 %v9880_v31 }
 0x2d0   : > { %4585 = vmatpush1.bf16.msra.mxu1 %v3635_v20  ;;  %v9991_v58 = vpop.permute.xlu0 %6690  ;;  %v3964_v20 = vsel %vm983_vm1, %v11666_v7, %v6658_v57  ;;  %v3963_v36 = vsel %vm983_vm1, %v11667_v13, %v6657_v44 }
 0x2d1   : > { %11922 = vst [vmem:[#allocation106_spill] sm:$0xff] %v9991_v58  ;;  %v11672_v60 = vunpack.i.h.bf16 %v9991_v58  ;;  %v11669_v61 = vunpack.i.l.bf16 %v9991_v58  ;;  %v9995_v25 = vpop.permute.xlu1 %6685  ;;  %v3995_v52 = vpack.c.bf16 %v3964_v20, %v3963_v36  ;;  %v11930_v20 = vunpack.i.l.bf16 %v9620_v48 }
 0x2d2   : > { %v11673_v0 = vunpack.i.l.bf16 %v9995_v25  ;;  %6985 = vrot.lane.b32.xlu0 %v9518_v54, %s7106_s30 }
 0x2d3   : > { %6970 = vrot.lane.b32.xlu1 %v9524_v63, %s7112_s28  ;;  %v10017_v54 = vsel %vm3191_vm4, %v11923_v29, %v11669_v61  ;;  %v10025_v7 = vsel %vm3191_vm4, %v11925_v59, %v11672_v60  ;;  %v11926_v29 = vunpack.i.h.bf16 %v9995_v25  ;;  %v6523_v59 = vunpack.i.h.bf16 %v9532_v6 }
 0x2d4   : > { %11924 = vst [vmem:[#allocation107_spill] sm:$0xff] %v10017_v54  ;;  %v10029_v13 = vpop.permute.xlu0 %6705  ;;  %v3961_v46 = vsel %vm983_vm1, %v6657_v44, %v11673_v0  ;;  %v6522_v60 = vunpack.i.l.bf16 %v9532_v6  ;;  %v11927_v0 = vunpack.i.l.bf16 %v9632_v16 }
 0x2d5   : > { %v3962_v61 = vsel %vm983_vm1, %v6658_v57, %v11926_v29  ;;  %v10039_v31 = vpop.permute.xlu1 %6695  ;;  %v11932_v29 = vunpack.i.l.bf16 %v9534_v14 }
 0x2d6   : > { %v3996_v58 = vpack.c.bf16 %v3962_v61, %v3961_v46  ;;  %6995 = vrot.lane.b32.xlu0 %v9093_v18, %s7106_s30  ;;  %v3621_v57 = vsel %vm3552_vm5, %v6522_v60, %v11927_v0  ;;  %v11928_v46 = vunpack.i.h.bf16 %v9632_v16  ;;  %v6533_v61 = vunpack.i.h.bf16 %v9565_v55 }
 0x2d7   : > { %6980 = vrot.lane.b32.xlu1 %v9097_v35, %s7112_s28  ;;  %v6532_v18 = vunpack.i.l.bf16 %v9565_v55 }
 0x2d8   : > { %4586 = vmatprep.subr.bf16.mxu1 %v3996_v58  ;;  %v6711_v44 = vpop.permute.xlu0 %6710  ;;  %v3622_v6 = vsel %vm3552_vm5, %v6523_v59, %v11928_v46  ;;  %v11929_v58 = vpack.c.bf16 %v8856_v42, %v8838_v21  ;;  %v11931_v42 = vunpack.i.h.bf16 %v9620_v48 }
 0x2d9   : > { %4587 = vmatpush1.bf16.msra.mxu1 %v3995_v52  ;;  %v10058_v36 = vpop.permute.xlu1 %6700  ;;  %v6712_v0 = vunpack.i.l.bf16 %v6711_v44  ;;  %v6713_v55 = vunpack.i.h.bf16 %v6711_v44  ;;  %v3626_v46 = vpack.c.bf16 %v3622_v6, %v3621_v57  ;;  %v3981_v21 = vsel %vm983_vm1, %v6532_v18, %v11930_v20 }
 0x2da   : > { %4588 = vmatprep.subr.bf16.mxu1 %v11929_v58  ;;  %7005 = vrot.lane.b32.xlu0 %v9600_v49, %s7111_s18  ;;  %v3982_v58 = vsel %vm983_vm1, %v6533_v61, %v11931_v42  ;;  %v11934_v57 = vunpack.i.h.bf16 %v9534_v14  ;;  %v11935_v6 = vunpack.i.h.bf16 %v10058_v36  ;;  %v11936_v20 = vpack.c.bf16 %v8841_v43, %v8833_v53 }
 0x2db   : > { %6990 = vrot.lane.b32.xlu1 %v9524_v63, %s7106_s30  ;;  %v11933_v63 = vunpack.i.l.bf16 %v10058_v36  ;;  %v11937_v52 = vunpack.i.l.bf16 %v10029_v13  ;;  %v11939_v43 = vunpack.i.l.bf16 %v10039_v31 }
 0x2dc   : > { %v3263_v48 = vsel %vm3191_vm4, %v11935_v6, %v11934_v57  ;;  %v10095_v42 = vpop.permute.xlu0 %6720  ;;  %v11938_v57 = vunpack.i.h.bf16 %v10029_v13 }
 0x2dd   : > { %v3262_v44 = vsel %vm3191_vm4, %v11933_v63, %v11932_v29  ;;  %4589 = vmatpush1.bf16.msra.mxu1 %v11936_v20  ;;  %v3623_v16 = vsel %vm3552_vm5, %v11937_v52, %v6522_v60  ;;  %v11675_v29 = vunpack.i.h.bf16 %v10095_v42  ;;  %v11676_v14 = vunpack.i.l.bf16 %v10095_v42  ;;  %v10103_v63 = vpop.permute.xlu1 %6715 }
 0x2de   : > { %v3264_v54 = vpack.c.bf16 %v3263_v48, %v3262_v44  ;;  %v3624_v53 = vsel %vm3552_vm5, %v11938_v57, %v6523_v59  ;;  %v3234_v6 = vsel %vm3191_vm4, %v11939_v43, %v6712_v0  ;;  %v6718_v20 = vunpack.i.h.bf16 %v10103_v63  ;;  %7010 = vrot.lane.b32.xlu0 %v9168_v15, %s7111_s18 }
 0x2df   : > { %v6717_v60 = vunpack.i.l.bf16 %v10103_v63  ;;  %7000 = vrot.lane.b32.xlu1 %v9097_v35, %s7106_s30  ;;  %v11940_v52 = vunpack.i.h.bf16 %v10039_v31  ;;  %v11941_v44 = vunpack.i.l.bf16 %v9941_v8  ;;  %v11942_v57 = vunpack.i.h.bf16 %v9941_v8  ;;  %v12015_v63 = vld [vmem:[#allocation71_spill] sm:$0xff] }
 0x2e0   : > { %4368 = vmatpush1.bf16.msra.mxu0 %v3264_v54  ;;  %5933 = vmatmul.mubr.msk.bf16.vlgmr.msra.gmra.mrb[44].mxu1 %vm1796_vm3, %v9744_v22  ;;  %v3233_v8 = vsel %vm3191_vm4, %v6713_v55, %v6718_v20  ;;  %v3625_v54 = vpack.c.bf16 %v3624_v53, %v3623_v16 }
 0x2e1   : > { %v3235_v59 = vsel %vm3191_vm4, %v11940_v52, %v6713_v55  ;;  %v10129_v48 = vsel %vm3552_vm5, %v11941_v44, %v11676_v14  ;;  %v10137_v35 = vsel %vm3552_vm5, %v11942_v57, %v11675_v29  ;;  %4369 = vmatprep.subr.bf16.mxu0 %v3626_v46  ;;  %v6736_v52 = vpop.permute.xlu0 %6735  ;;  %v3232_v44 = vsel %vm3191_vm4, %v6712_v0, %v6717_v60  ;;  %v10152_v57 = vpop.permute.xlu1 %6725 }
 0x2e2   : > { %4700 = vmatprep.mubr.bf16.mxu1 %v11690_v9  ;;  %v3279_v29 = vpack.c.bf16 %v3233_v8, %v3232_v44  ;;  %v3278_v14 = vpack.c.bf16 %v3235_v59, %v3234_v6  ;;  %v11677_v46 = vunpack.i.h.bf16 %v10152_v57  ;;  %v11678_v43 = vunpack.i.l.bf16 %v10152_v57  ;;  %7030 = vrot.lane.b32.xlu0 %v9606_v32, %s7112_s28 }
 0x2e3   : > { %7015 = vrot.lane.b32.xlu1 %v9600_v49, %s7112_s28  ;;  %v3986_v0 = vpack.c.bf16 %v3982_v58, %v3981_v21  ;;  %v11946_v44 = vunpack.i.h.bf16 %v9651_v56 }
 0x2e4   : > { %4370 = vmatpush1.bf16.msra.mxu0 %v3625_v54  ;;  %4668 = vmatprep.subr.bf16.mxu1 %v3279_v29  ;;  %v3983_v16 = vsel %vm983_vm1, %v11678_v43, %v6532_v18  ;;  %v3984_v55 = vsel %vm983_vm1, %v11677_v46, %v6533_v61  ;;  %v11943_v18 = vunpack.i.l.bf16 %v9694_v1  ;;  %v11944_v61 = vunpack.i.l.bf16 %v9651_v56 }
 0x2e5   : > { %4371 = vmatprep.subr.bf16.mxu0 %v3986_v0  ;;  %4669 = vmatpush1.bf16.msra.mxu1 %v3278_v14  ;;  %v10168_v53 = vpop.permute.xlu0 %6745  ;;  %v3985_v6 = vpack.c.bf16 %v3984_v55, %v3983_v16  ;;  %v10172_v58 = vpop.permute.xlu1 %6730  ;;  %v11945_v14 = vunpack.i.h.bf16 %v9694_v1  ;;  %v11948_v0 = vunpack.i.h.bf16 %v9995_v25  ;;  %v11954_v46 = vunpack.i.h.bf16 %v9702_v28 }
 0x2e6   : > { %v6748_v59 = vunpack.i.h.bf16 %v10168_v53  ;;  %v6747_v21 = vunpack.i.l.bf16 %v10168_v53  ;;  %7035 = vrot.lane.b32.xlu0 %v9600_v49, %s7106_s30  ;;  %v3252_v29 = vsel %vm3191_vm4, %v11944_v61, %v11943_v18  ;;  %v11947_v49 = vunpack.i.l.bf16 %v9995_v25 }
 0x2e7   : > { %7020 = vrot.lane.b32.xlu1 %v9606_v32, %s7111_s18  ;;  %v3253_v8 = vsel %vm3191_vm4, %v11946_v44, %v11945_v14  ;;  %v6733_v16 = vunpack.i.h.bf16 %v10172_v58  ;;  %v6732_v55 = vunpack.i.l.bf16 %v10172_v58  ;;  %v11949_v18 = vpack.c.bf16 %v9154_v26, %v9148_v47  ;;  %v4204_v26 = vld [vmem:[%s11357_s2 + $0x18] sm:$0xff] }
 0x2e8   : > { %v10196_v54 = vsel %vm983_vm1, %v11947_v49, %v6747_v21  ;;  %v10204_v1 = vsel %vm983_vm1, %v11948_v0, %v6748_v59  ;;  %4372 = vmatpush1.bf16.msra.mxu0 %v3985_v6  ;;  %v3269_v25 = vpack.c.bf16 %v3253_v8, %v3252_v29  ;;  %v6738_v44 = vunpack.i.h.bf16 %v6736_v52 }
 0x2e9   : > { %v3997_v56 = vpack.c.bf16 %v10204_v1, %v10196_v54  ;;  %4373 = vmatprep.subr.bf16.mxu0 %v11949_v18  ;;  %v6756_v61 = vpop.permute.xlu0 %6755  ;;  %v10213_v14 = vpop.permute.xlu1 %6740  ;;  %v6737_v49 = vunpack.i.l.bf16 %v6736_v52  ;;  %v11950_v47 = vpack.c.bf16 %v9145_v11, %v9142_v17  ;;  %v11951_v52 = vunpack.i.l.bf16 %v9759_v62 }
 0x2ea   : > { %v6743_v0 = vunpack.i.h.bf16 %v10213_v14  ;;  %v11679_v6 = vunpack.i.l.bf16 %v10213_v14  ;;  %7045 = vrot.lane.b32.xlu0 %v9168_v15, %s7106_s30  ;;  %v11952_v29 = vunpack.i.l.bf16 %v9702_v28  ;;  %v11953_v18 = vunpack.i.h.bf16 %v9759_v62 }
 0x2eb   : > { %7025 = vrot.lane.b32.xlu1 %v9168_v15, %s7112_s28  ;;  %v3596_v17 = vsel %vm3552_vm5, %v6733_v16, %v6738_v44  ;;  %v3595_v11 = vsel %vm3552_vm5, %v6732_v55, %v6737_v49 }
 0x2ec   : > { %4374 = vmatpush1.bf16.msra.mxu0 %v11950_v47  ;;  %v3613_v8 = vsel %vm3552_vm5, %v11952_v29, %v11951_v52  ;;  %v3614_v15 = vsel %vm3552_vm5, %v11954_v46, %v11953_v18  ;;  %v3593_v62 = vsel %vm3552_vm5, %v6737_v49, %v11679_v6  ;;  %v3594_v28 = vsel %vm3552_vm5, %v6738_v44, %v6743_v0 }
 0x2ed   : > { %4453 = vmatprep.subr.bf16.mxu0 %v3269_v25  ;;  %v10247_v47 = vpop.permute.xlu0 %6765  ;;  %v10257_v46 = vpop.permute.xlu1 %6750  ;;  %v3640_v52 = vpack.c.bf16 %v3594_v28, %v3593_v62  ;;  %v3630_v25 = vpack.c.bf16 %v3614_v15, %v3613_v8  ;;  %v11955_v29 = vunpack.i.l.bf16 %v9814_v3  ;;  %v11956_v18 = vunpack.i.l.bf16 %v9769_v30 }
 0x2ee   : > { %4356 = vperm.xlu0 %6507, %v4204_v26   ;;  %v3639_v43 = vpack.c.bf16 %v3596_v17, %v3595_v11  ;;  %v6753_v6 = vunpack.i.h.bf16 %v10257_v46  ;;  %v6752_v44 = vunpack.i.l.bf16 %v10257_v46  ;;  %v11957_v62 = vpack.c.bf16 %v9682_v41, %v9676_v10  ;;  %v4203_v11 = vld [vmem:[%s11357_s2 + $0x10] sm:$0xff] }
 0x2ef   : > { %5928 = vmatmul.mubr.msk.bf16.vlgmr.msra.gmra.mrb[36].mxu0 %vm1796_vm3, %v9744_v22  ;;  %v3973_v49 = vsel %vm983_vm1, %v11956_v18, %v11955_v29  ;;  %7040 = vrot.lane.b32.xlu1 %v9606_v32, %s7106_s30  ;;  %v11958_v26 = vunpack.i.h.bf16 %v9814_v3  ;;  %v11959_v8 = vunpack.i.h.bf16 %v9769_v30  ;;  %v6758_v28 = vunpack.i.h.bf16 %v6756_v61 }
 0x2f0   : > { %4454 = vmatpush1.bf16.msra.mxu0 %v11957_v62  ;;  %4670 = vmatprep.subr.bf16.mxu1 %v3640_v52  ;;  %v6757_v32 = vunpack.i.l.bf16 %v6756_v61 }
 0x2f1   : > { %v3974_v15 = vsel %vm983_vm1, %v11959_v8, %v11958_v26  ;;  %4455 = vmatprep.subr.bf16.mxu0 %v3630_v25  ;;  %v6776_v17 = vpop.permute.xlu0 %6775  ;;  %4671 = vmatpush1.bf16.msra.mxu1 %v3639_v43  ;;  %v10283_v29 = vpop.permute.xlu1 %6760  ;;  %v3956_v3 = vsel %vm983_vm1, %v6753_v6, %v6758_v28  ;;  %v11960_v43 = vpack.c.bf16 %v9739_v12, %v9731_v39  ;;  %v11962_v8 = vunpack.i.l.bf16 %v9868_v34 }
 0x2f2   : > { %4485 = vmatprep.mubr.bf16.mxu0 %v11690_v9  ;;  %v6763_v10 = vunpack.i.h.bf16 %v10283_v29  ;;  %v6762_v41 = vunpack.i.l.bf16 %v10283_v29  ;;  %v3990_v30 = vpack.c.bf16 %v3974_v15, %v3973_v49  ;;  %v3955_v61 = vsel %vm983_vm1, %v6752_v44, %v6757_v32 }
 0x2f3   : > { %4351 = vperm.xlu1 %6508, %v4203_v11   ;;  %v3999_v26 = vpack.c.bf16 %v3956_v3, %v3955_v61  ;;  %v11961_v12 = vpack.c.bf16 %v9804_v51, %v9796_v27  ;;  %v11963_v15 = vunpack.i.l.bf16 %v9822_v23  ;;  %v11966_v51 = vld [vmem:[#allocation62_spill] sm:$0xff] }
 0x2f4   : > { %4456 = vmatpush1.bf16.msra.mxu0 %v11960_v43  ;;  %v3953_v25 = vsel %vm983_vm1, %v6757_v32, %v6762_v41  ;;  %v3954_v18 = vsel %vm983_vm1, %v6758_v28, %v6763_v10  ;;  %v11964_v28 = vunpack.i.h.bf16 %v9868_v34  ;;  %v11965_v32 = vunpack.i.h.bf16 %v9822_v23 }
 0x2f5   : > { %4457 = vmatprep.subr.bf16.mxu0 %v3990_v30  ;;  %v10299_v52 = vpop.permute.xlu0 %6785  ;;  %v10309_v49 = vpop.permute.xlu1 %6770  ;;  %v4000_v62 = vpack.c.bf16 %v3954_v18, %v3953_v25  ;;  %v3244_v11 = vsel %vm3191_vm4, %v11963_v15, %v11962_v8  ;;  %v11967_v27 = vpack.c.bf16 %v9222_v19, %v11966_v51  ;;  %v6778_v43 = vunpack.i.h.bf16 %v6776_v17  ;;  %v11968_v18 = vld [vmem:[#allocation13_spill] sm:$0xff] }
 0x2f6   : > { %v6773_v39 = vunpack.i.h.bf16 %v10309_v49  ;;  %v3245_v30 = vsel %vm3191_vm4, %v11965_v32, %v11964_v28  ;;  %v6772_v3 = vunpack.i.l.bf16 %v10309_v49  ;;  %v6777_v34 = vunpack.i.l.bf16 %v6776_v17  ;;  %v11972_v28 = vld [vmem:[#allocation60_spill] sm:$0xff] }
 0x2f7   : > { %4672 = vmatprep.subr.bf16.mxu1 %v4000_v62  ;;  %v11969_v62 = vld [vmem:[#allocation9_spill] sm:$0xff]  ;;  %v3273_v15 = vpack.c.bf16 %v3245_v30, %v3244_v11  ;;  %v11974_v51 = vunpack.i.l.bf16 %v9926_v33  ;;  %v11977_v11 = vunpack.i.h.bf16 %v9876_v2  ;;  %v6788_v1 = vunpack.i.h.bf16 %v10299_v52 }
 0x2f8   : > { %4458 = vmatpush1.bf16.msra.mxu0 %v11961_v12  ;;  %4673 = vmatpush1.bf16.msra.mxu1 %v3999_v26  ;;  %v11970_v12 = vpack.c.bf16 %v11968_v18, %v11969_v62  ;;  %v3227_v19 = vsel %vm3191_vm4, %v6773_v39, %v6778_v43  ;;  %v11971_v26 = vld [vmem:[#allocation61_spill] sm:$0xff]  ;;  %v11976_v18 = vunpack.i.h.bf16 %v9926_v33  ;;  %v3226_v62 = vsel %vm3191_vm4, %v6772_v3, %v6777_v34 }
 0x2f9   : > { %4459 = vmatprep.subr.bf16.mxu0 %v11967_v27  ;;  %v6796_v61 = vpop.permute.xlu0 %6795  ;;  %v10331_v25 = vpop.permute.xlu1 %6780  ;;  %v11973_v32 = vpack.c.bf16 %v11971_v26, %v11972_v28  ;;  %v11975_v27 = vunpack.i.l.bf16 %v9876_v2  ;;  %v11979_v26 = vld [vmem:[#allocation8_spill] sm:$0xff] }
 0x2fa   : > { %4674 = vmatprep.subr.bf16.mxu1 %v11970_v12  ;;  %v11682_v23 = vunpack.i.h.bf16 %v10331_v25  ;;  %v6782_v8 = vunpack.i.l.bf16 %v10331_v25  ;;  %v3606_v30 = vsel %vm3552_vm5, %v11977_v11, %v11976_v18  ;;  %v11978_v12 = vld [vmem:[#allocation11_spill] sm:$0xff]  ;;  %v11981_v18 = vunpack.i.l.bf16 %v9983_v45 }
 0x2fb   : > { %v3605_v17 = vsel %vm3552_vm5, %v11975_v27, %v11974_v51  ;;  %v11980_v28 = vpack.c.bf16 %v11978_v12, %v11979_v26  ;;  %v11982_v11 = vunpack.i.l.bf16 %v9936_v37 }
 0x2fc   : > { %4460 = vmatpush1.bf16.msra.mxu0 %v11973_v32  ;;  %v3224_v2 = vsel %vm3191_vm4, %v6777_v34, %v6782_v8  ;;  %v3225_v33 = vsel %vm3191_vm4, %v6778_v43, %v11682_v23  ;;  %v3282_v34 = vpack.c.bf16 %v3227_v19, %v3226_v62  ;;  %v11983_v43 = vpack.c.bf16 %v9856_v50, %v9848_v24 }
 0x2fd   : > { %4539 = vmatprep.subr.bf16.mxu0 %v3273_v15  ;;  %4675 = vmatpush1.bf16.msra.mxu1 %v11980_v28  ;;  %v10364_v32 = vpop.permute.xlu0 %6805  ;;  %v10374_v51 = vpop.permute.xlu1 %6790  ;;  %v3283_v27 = vpack.c.bf16 %v3225_v33, %v3224_v2  ;;  %v3634_v15 = vpack.c.bf16 %v3606_v30, %v3605_v17  ;;  %v3965_v12 = vsel %vm983_vm1, %v11982_v11, %v11981_v18  ;;  %v11984_v17 = vunpack.i.h.bf16 %v9983_v45 }
 0x2fe   : > { %v6793_v26 = vunpack.i.h.bf16 %v10374_v51  ;;  %v6792_v28 = vunpack.i.l.bf16 %v10374_v51  ;;  %v11985_v30 = vunpack.i.h.bf16 %v9936_v37  ;;  %v6798_v62 = vunpack.i.h.bf16 %v6796_v61 }
 0x2ff   : > { %5930 = vmatmul.mubr.msk.bf16.vlgmr.msra.gmra.mrb[40].mxu0 %vm1796_vm3, %v9744_v22  ;;  %4754 = vmatprep.subr.bf16.mxu1 %v3283_v27  ;;  %v6797_v33 = vunpack.i.l.bf16 %v6796_v61  ;;  %v11986_v27 = vpack.c.bf16 %v9911_v40, %v9903_v5  ;;  %v6807_v51 = vunpack.i.l.bf16 %v10364_v32 }
 0x300   : > { %4540 = vmatpush1.bf16.msra.mxu0 %v11983_v43  ;;  %5935 = vmatmul.mubr.msk.bf16.vlgmr.msra.gmra.mrb[48].mxu1 %vm1796_vm3, %v9744_v22  ;;  %v3966_v2 = vsel %vm983_vm1, %v11985_v30, %v11984_v17  ;;  %v3588_v37 = vsel %vm3552_vm5, %v6793_v26, %v6798_v62  ;;  %v11987_v30 = vld [vmem:[#allocation105_spill] sm:$0xff] }
 0x301   : > { %4541 = vmatprep.subr.bf16.mxu0 %v3634_v15  ;;  %v6816_v19 = vpop.permute.xlu0 %6815  ;;  %4755 = vmatpush1.bf16.msra.mxu1 %v3282_v34  ;;  %v10397_v18 = vpop.permute.xlu1 %6800  ;;  %v3994_v45 = vpack.c.bf16 %v3966_v2, %v3965_v12  ;;  %v3587_v61 = vsel %vm3552_vm5, %v6792_v28, %v6797_v33  ;;  %v11988_v2 = vpack.c.bf16 %v9971_v38, %v11987_v30 }
 0x302   : > { %4571 = vmatprep.mubr.bf16.mxu0 %v11690_v9  ;;  %v11680_v50 = vunpack.i.h.bf16 %v10397_v18  ;;  %v11681_v24 = vunpack.i.l.bf16 %v10397_v18  ;;  %4786 = vmatprep.mubr.bf16.mxu1 %v11690_v9  ;;  %v3643_v17 = vpack.c.bf16 %v3588_v37, %v3587_v61  ;;  %v6817_v30 = vunpack.i.l.bf16 %v6816_v19 }
 0x304   : > { %4542 = vmatpush1.bf16.msra.mxu0 %v11986_v27  ;;  %v3585_v11 = vsel %vm3552_vm5, %v6797_v33, %v11681_v24  ;;  %v3586_v12 = vsel %vm3552_vm5, %v6798_v62, %v11680_v50  ;;  %v11989_v33 = vunpack.i.l.bf16 %v10039_v31  ;;  %v11992_v50 = vunpack.i.h.bf16 %v10039_v31 }
 0x305   : > { %4543 = vmatprep.subr.bf16.mxu0 %v3994_v45  ;;  %v10414_v15 = vpop.permute.xlu0 %6825  ;;  %v10424_v34 = vpop.permute.xlu1 %6810  ;;  %v3644_v43 = vpack.c.bf16 %v3586_v12, %v3585_v11  ;;  %v11990_v45 = vld [vmem:[#allocation106_spill] sm:$0xff]  ;;  %v11994_v11 = vld [vmem:[#allocation68_spill] sm:$0xff]  ;;  %v11995_v12 = vld [vmem:[#allocation67_spill] sm:$0xff] }
 0x306   : > { %v6813_v5 = vunpack.i.h.bf16 %v10424_v34  ;;  %v6812_v40 = vunpack.i.l.bf16 %v10424_v34  ;;  %v11991_v27 = vunpack.i.l.bf16 %v11990_v45  ;;  %v11993_v37 = vunpack.i.h.bf16 %v11990_v45  ;;  %v11998_v45 = vld [vmem:[#allocation65_spill] sm:$0xff] }
 0x307   : > { %4756 = vmatprep.subr.bf16.mxu1 %v3644_v43  ;;  %v11996_v24 = vpack.c.bf16 %v11994_v11, %v11995_v12  ;;  %v6818_v43 = vunpack.i.h.bf16 %v6816_v19  ;;  %v6827_v29 = vunpack.i.l.bf16 %v10414_v15 }
 0x308   : > { %4544 = vmatpush1.bf16.msra.mxu0 %v11988_v2  ;;  %v3236_v62 = vsel %vm3191_vm4, %v11991_v27, %v11989_v33  ;;  %v3237_v61 = vsel %vm3191_vm4, %v11993_v37, %v11992_v50  ;;  %4757 = vmatpush1.bf16.msra.mxu1 %v3643_v17  ;;  %v11997_v17 = vld [vmem:[#allocation66_spill] sm:$0xff]  ;;  %v12000_v27 = vunpack.i.l.bf16 %v10095_v42  ;;  %v12001_v37 = vunpack.i.h.bf16 %v10095_v42 }
 0x309   : > { %4545 = vmatprep.subr.bf16.mxu0 %v11996_v24  ;;  %v6836_v38 = vpop.permute.xlu0 %6835  ;;  %v10446_v2 = vpop.permute.xlu1 %6820  ;;  %v3277_v31 = vpack.c.bf16 %v3237_v61, %v3236_v62  ;;  %v3948_v50 = vsel %vm983_vm1, %v6813_v5, %v6818_v43  ;;  %v3947_v24 = vsel %vm983_vm1, %v6812_v40, %v6817_v30  ;;  %v11999_v19 = vpack.c.bf16 %v11997_v17, %v11998_v45  ;;  %v12002_v45 = vld [vmem:[#allocation107_spill] sm:$0xff] }
 0x30a   : > { %v6823_v23 = vunpack.i.h.bf16 %v10446_v2  ;;  %v6822_v33 = vunpack.i.l.bf16 %v10446_v2  ;;  %v3597_v62 = vsel %vm3552_vm5, %v12000_v27, %v6732_v55  ;;  %v3598_v61 = vsel %vm3552_vm5, %v12001_v37, %v6733_v16  ;;  %v12005_v37 = vld [vmem:[#allocation25_spill] sm:$0xff] }
 0x30b   : > { %v4003_v42 = vpack.c.bf16 %v3948_v50, %v3947_v24  ;;  %v3638_v16 = vpack.c.bf16 %v3598_v61, %v3597_v62  ;;  %v6838_v24 = vunpack.i.h.bf16 %v6836_v38  ;;  %v12004_v62 = vld [vmem:[#allocation27_spill] sm:$0xff] }
 0x30c   : > { %4546 = vmatpush1.bf16.msra.mxu0 %v11999_v19  ;;  %v3945_v12 = vsel %vm983_vm1, %v6817_v30, %v6822_v33  ;;  %v3946_v55 = vsel %vm983_vm1, %v6818_v43, %v6823_v23  ;;  %v12003_v19 = vpack.c.bf16 %v10025_v7, %v12002_v45  ;;  %v3957_v43 = vsel %vm983_vm1, %v6747_v21, %v6752_v44 }
 0x30d   : > { %4625 = vmatprep.subr.bf16.mxu0 %v3277_v31  ;;  %v10473_v11 = vpop.permute.xlu0 %6845  ;;  %v10483_v17 = vpop.permute.xlu1 %6830  ;;  %v4004_v58 = vpack.c.bf16 %v3946_v55, %v3945_v12  ;;  %v3958_v30 = vsel %vm983_vm1, %v6748_v59, %v6753_v6  ;;  %v12006_v61 = vpack.c.bf16 %v12004_v62, %v12005_v37  ;;  %v6837_v21 = vunpack.i.l.bf16 %v6836_v38  ;;  %v12008_v55 = vld [vmem:[#allocation26_spill] sm:$0xff] }
 0x30e   : > { %v6833_v31 = vunpack.i.h.bf16 %v10483_v17  ;;  %v6832_v50 = vunpack.i.l.bf16 %v10483_v17  ;;  %v3998_v59 = vpack.c.bf16 %v3958_v30, %v3957_v43  ;;  %v12007_v44 = vpack.c.bf16 %v10137_v35, %v10129_v48 }
 0x30f   : > { %5932 = vmatmul.mubr.msk.bf16.vlgmr.msra.gmra.mrb[44].mxu0 %vm1796_vm3, %v9744_v22  ;;  %4758 = vmatprep.subr.bf16.mxu1 %v4004_v58  ;;  %v6767_v12 = vunpack.i.l.bf16 %v10247_v47  ;;  %v12009_v58 = vld [vmem:[#allocation24_spill] sm:$0xff]  ;;  %v6768_v45 = vunpack.i.h.bf16 %v10247_v47 }
 0x310   : > { %4626 = vmatpush1.bf16.msra.mxu0 %v12003_v19  ;;  %4759 = vmatpush1.bf16.msra.mxu1 %v4003_v42  ;;  %v3219_v6 = vsel %vm3191_vm4, %v6833_v31, %v6838_v24  ;;  %v3218_v38 = vsel %vm3191_vm4, %v6832_v50, %v6837_v21  ;;  %v12010_v42 = vpack.c.bf16 %v12008_v55, %v12009_v58  ;;  %v12014_v55 = vld [vmem:[#allocation72_spill] sm:$0xff] }
 0x311   : > { %4627 = vmatprep.subr.bf16.mxu0 %v3638_v16  ;;  %v6856_v7 = vpop.permute.xlu0 %6855  ;;  %v10504_v27 = vpop.permute.xlu1 %6840  ;;  %4760 = vmatprep.subr.bf16.mxu1 %v12006_v61  ;;  %v3228_v30 = vsel %vm3191_vm4, %v6767_v12, %v6772_v3  ;;  %v3286_v62 = vpack.c.bf16 %v3219_v6, %v3218_v38  ;;  %v3229_v47 = vsel %vm3191_vm4, %v6768_v45, %v6773_v39 }
 0x312   : > { %4657 = vmatprep.mubr.bf16.mxu0 %v11690_v9  ;;  %v6843_v53 = vunpack.i.h.bf16 %v10504_v27  ;;  %v6842_v46 = vunpack.i.l.bf16 %v10504_v27  ;;  %v3230_v3 = vsel %vm3191_vm4, %v6717_v60, %v6767_v12  ;;  %v6858_v6 = vunpack.i.h.bf16 %v6856_v7 }
 0x313   : > { %v6857_v49 = vunpack.i.l.bf16 %v6856_v7  ;;  %v3231_v60 = vsel %vm3191_vm4, %v6718_v20, %v6768_v45  ;;  %v3281_v38 = vpack.c.bf16 %v3229_v47, %v3228_v30  ;;  %v12016_v58 = vpack.c.bf16 %v12014_v55, %v12015_v63 }
 0x314   : > { %4628 = vmatpush1.bf16.msra.mxu0 %v12007_v44  ;;  %4761 = vmatpush1.bf16.msra.mxu1 %v12010_v42  ;;  %v3216_v48 = vsel %vm3191_vm4, %v6837_v21, %v6842_v46  ;;  %v3217_v35 = vsel %vm3191_vm4, %v6838_v24, %v6843_v53  ;;  %v12011_v24 = vld [vmem:[#allocation74_spill] sm:$0xff]  ;;  %v12012_v21 = vld [vmem:[#allocation73_spill] sm:$0xff]  ;;  %v3590_v42 = vsel %vm3552_vm5, %v6788_v1, %v6793_v26  ;;  %v6828_v63 = vunpack.i.h.bf16 %v10414_v15 }
 0x315   : > { %4629 = vmatprep.subr.bf16.mxu0 %v3998_v59  ;;  %v10527_v16 = vpop.permute.xlu0 %6865  ;;  %v10538_v19 = vpop.permute.xlu1 %6850  ;;  %v3287_v43 = vpack.c.bf16 %v3217_v35, %v3216_v48  ;;  %v12013_v59 = vpack.c.bf16 %v12011_v24, %v12012_v21  ;;  %v3592_v24 = vsel %vm3552_vm5, %v6743_v0, %v6788_v1  ;;  %v3951_v1 = vsel %vm983_vm1, %v6762_v41, %v6807_v51 }
 0x316   : > { %v6853_v37 = vunpack.i.h.bf16 %v10538_v19  ;;  %v6852_v61 = vunpack.i.l.bf16 %v10538_v19  ;;  %v3222_v15 = vsel %vm3191_vm4, %v6782_v8, %v6827_v29  ;;  %v12022_v8 = vld [vmem:[#allocation33_spill] sm:$0xff] }
 0x317   : > { %5937 = vmatmul.mubr.msk.bf16.vlgmr.msra.gmra.mrb[52].mxu1 %vm1796_vm3, %v9744_v22  ;;  %4840 = vmatprep.subr.bf16.mxu1 %v3287_v43  ;;  %v3280_v43 = vpack.c.bf16 %v3231_v60, %v3230_v3 }
 0x318   : > { %4630 = vmatpush1.bf16.msra.mxu0 %v3997_v56  ;;  %v6787_v56 = vunpack.i.l.bf16 %v10299_v52  ;;  %4841 = vmatpush1.bf16.msra.mxu1 %v3286_v62  ;;  %v3580_v52 = vsel %vm3552_vm5, %v6853_v37, %v6858_v6  ;;  %v3579_v7 = vsel %vm3552_vm5, %v6852_v61, %v6857_v49  ;;  %v12017_v62 = vunpack.i.l.bf16 %v10213_v14 }
 0x319   : > { %4631 = vmatprep.subr.bf16.mxu0 %v12013_v59  ;;  %v6876_v54 = vpop.permute.xlu0 %6875  ;;  %v10564_v44 = vpop.permute.xlu1 %6860  ;;  %4872 = vmatprep.mubr.bf16.mxu1 %v11690_v9  ;;  %v3647_v21 = vpack.c.bf16 %v3580_v52, %v3579_v7 }
 0x31a   : > { %v6863_v39 = vunpack.i.h.bf16 %v10564_v44  ;;  %v6862_v12 = vunpack.i.l.bf16 %v10564_v44  ;;  %v3589_v20 = vsel %vm3552_vm5, %v6787_v56, %v6792_v28  ;;  %v6808_v28 = vunpack.i.h.bf16 %v10364_v32 }
 0x31b   : > { %v3591_v47 = vsel %vm3552_vm5, %v12017_v62, %v6787_v56  ;;  %v3642_v3 = vpack.c.bf16 %v3590_v42, %v3589_v20  ;;  %v3949_v56 = vsel %vm983_vm1, %v6807_v51, %v6812_v40  ;;  %v12018_v51 = vld [vmem:[#allocation80_spill] sm:$0xff] }
 0x31c   : > { %4632 = vmatpush1.bf16.msra.mxu0 %v12016_v58  ;;  %v3577_v35 = vsel %vm3552_vm5, %v6857_v49, %v6862_v12  ;;  %v3578_v45 = vsel %vm3552_vm5, %v6858_v6, %v6863_v39  ;;  %v3950_v14 = vsel %vm983_vm1, %v6808_v28, %v6813_v5  ;;  %v3641_v0 = vpack.c.bf16 %v3592_v24, %v3591_v47 }
 0x31d   : > { %4711 = vmatprep.subr.bf16.mxu0 %v3281_v38  ;;  %v10592_v48 = vpop.permute.xlu0 %6885  ;;  %v10604_v30 = vpop.permute.xlu1 %6870  ;;  %v3648_v26 = vpack.c.bf16 %v3578_v45, %v3577_v35  ;;  %v6878_v6 = vunpack.i.h.bf16 %v6876_v54  ;;  %v6877_v49 = vunpack.i.l.bf16 %v6876_v54  ;;  %v3952_v34 = vsel %vm983_vm1, %v6763_v10, %v6808_v28 }
 0x31e   : > { %v6873_v32 = vunpack.i.h.bf16 %v10604_v30  ;;  %v6872_v59 = vunpack.i.l.bf16 %v10604_v30  ;;  %v4002_v38 = vpack.c.bf16 %v3950_v14, %v3949_v56  ;;  %v4001_v55 = vpack.c.bf16 %v3952_v34, %v3951_v1  ;;  %v12023_v56 = vld [vmem:[#allocation31_spill] sm:$0xff]  ;;  %v12025_v34 = vld [vmem:[#allocation78_spill] sm:$0xff] }
 0x31f   : > { %5934 = vmatmul.mubr.msk.bf16.vlgmr.msra.gmra.mrb[48].mxu0 %vm1796_vm3, %v9744_v22  ;;  %4842 = vmatprep.subr.bf16.mxu1 %v3648_v26  ;;  %v3220_v45 = vsel %vm3191_vm4, %v6827_v29, %v6832_v50  ;;  %v12019_v26 = vld [vmem:[#allocation79_spill] sm:$0xff]  ;;  %v12021_v50 = vunpack.i.h.bf16 %v10331_v25  ;;  %v6847_v24 = vunpack.i.l.bf16 %v10473_v11  ;;  %v12024_v14 = vpack.c.bf16 %v12022_v8, %v12023_v56 }
 0x320   : > { %4712 = vmatpush1.bf16.msra.mxu0 %v3280_v43  ;;  %4843 = vmatpush1.bf16.msra.mxu1 %v3647_v21  ;;  %v3940_v41 = vsel %vm983_vm1, %v6873_v32, %v6878_v6  ;;  %v3939_v54 = vsel %vm983_vm1, %v6872_v59, %v6877_v49  ;;  %v3221_v43 = vsel %vm3191_vm4, %v6828_v63, %v6833_v31  ;;  %v6848_v31 = vunpack.i.h.bf16 %v10473_v11  ;;  %v12026_v11 = vld [vmem:[#allocation77_spill] sm:$0xff] }
 0x321   : > { %4713 = vmatprep.subr.bf16.mxu0 %v3642_v3  ;;  %v6896_v22 = vpop.permute.xlu0 %6895  ;;  %v10630_v60 = vpop.permute.xlu1 %6880  ;;  %4743 = vmatprep.mubr.bf16.mxu0 %v11690_v9  ;;  %v4007_v42 = vpack.c.bf16 %v3940_v41, %v3939_v54  ;;  %v12020_v62 = vpack.c.bf16 %v12018_v51, %v12019_v26  ;;  %v3223_v17 = vsel %vm3191_vm4, %v12021_v50, %v6828_v63  ;;  %v6867_v54 = vunpack.i.l.bf16 %v10527_v16  ;;  %v10738_v50 = vld [vmem:[%s11356_s1 + $0x8] sm:$0xff]  }
 0x322   : > { %v6883_v5 = vunpack.i.h.bf16 %v10630_v60  ;;  %v6882_v40 = vunpack.i.l.bf16 %v10630_v60  ;;  %v6898_v21 = vunpack.i.h.bf16 %v6896_v22  ;;  %v3285_v25 = vpack.c.bf16 %v3221_v43, %v3220_v45  ;;  %v12042_v60 = vld [vmem:[#allocation38_spill] sm:$0xff] }
 0x323   : > { %v3581_v41 = vsel %vm3552_vm5, %v6847_v24, %v6852_v61  ;;  %v3284_v61 = vpack.c.bf16 %v3223_v17, %v3222_v15  ;;  %v12031_v43 = vunpack.i.l.bf16 %v10397_v18  ;;  %v12032_v26 = vunpack.i.h.bf16 %v10397_v18 }
 0x324   : > { %4714 = vmatpush1.bf16.msra.mxu0 %v3641_v0  ;;  %v3937_v52 = vsel %vm983_vm1, %v6877_v49, %v6882_v40  ;;  %v3938_v7 = vsel %vm983_vm1, %v6878_v6, %v6883_v5  ;;  %v6897_v0 = vunpack.i.l.bf16 %v6896_v22  ;;  %v3582_v22 = vsel %vm3552_vm5, %v6848_v31, %v6853_v37 }
 0x325   : > { %4715 = vmatprep.subr.bf16.mxu0 %v4002_v38  ;;  %v10648_v10 = vpop.permute.xlu0 %6905  ;;  %v10659_v58 = vpop.permute.xlu1 %6890  ;;  %v4008_v20 = vpack.c.bf16 %v3938_v7, %v3937_v52  ;;  %v12027_v38 = vpack.c.bf16 %v12025_v34, %v12026_v11  ;;  %v12028_v52 = vld [vmem:[#allocation32_spill] sm:$0xff]  ;;  %v12029_v7 = vld [vmem:[#allocation30_spill] sm:$0xff]  ;;  %v3583_v51 = vsel %vm3552_vm5, %v12031_v43, %v6847_v24  ;;  %v3941_v15 = vsel %vm983_vm1, %v6867_v54, %v6872_v59 }
 0x326   : > { %v6893_v35 = vunpack.i.h.bf16 %v10659_v58  ;;  %v6892_v28 = vunpack.i.l.bf16 %v10659_v58  ;;  %v3943_v59 = vsel %vm983_vm1, %v6822_v33, %v6867_v54  ;;  %v6887_v34 = vunpack.i.l.bf16 %v10592_v48 }
 0x327   : > { %4844 = vmatprep.subr.bf16.mxu1 %v4008_v20  ;;  %v6868_v20 = vunpack.i.h.bf16 %v10527_v16  ;;  %v3646_v16 = vpack.c.bf16 %v3582_v22, %v3581_v41  ;;  %v6888_v41 = vunpack.i.h.bf16 %v10592_v48 }
 0x328   : > { %4716 = vmatpush1.bf16.msra.mxu0 %v4001_v55  ;;  %4845 = vmatpush1.bf16.msra.mxu1 %v4007_v42  ;;  %v3211_v49 = vsel %vm3191_vm4, %v6893_v35, %v6898_v21  ;;  %v3210_v29 = vsel %vm3191_vm4, %v6892_v28, %v6897_v0  ;;  %v12030_v55 = vpack.c.bf16 %v12028_v52, %v12029_v7 }
 0x329   : > { %4717 = vmatprep.subr.bf16.mxu0 %v12020_v62  ;;  %v6916_v47 = vpop.permute.xlu0 %6915  ;;  %v10684_v3 = vpop.permute.xlu1 %6900  ;;  %4846 = vmatprep.subr.bf16.mxu1 %v12024_v14  ;;  %v3584_v62 = vsel %vm3552_vm5, %v12032_v26, %v6848_v31  ;;  %v3290_v17 = vpack.c.bf16 %v3211_v49, %v3210_v29  ;;  %v3942_v31 = vsel %vm983_vm1, %v6868_v20, %v6873_v32 }
 0x32a   : > { %v6903_v1 = vunpack.i.h.bf16 %v10684_v3  ;;  %v6902_v6 = vunpack.i.l.bf16 %v10684_v3  ;;  %v3645_v8 = vpack.c.bf16 %v3584_v62, %v3583_v51  ;;  %v6918_v56 = vunpack.i.h.bf16 %v6916_v47 }
 0x32b   : > { %v6917_v14 = vunpack.i.l.bf16 %v6916_v47  ;;  %v3944_v30 = vsel %vm983_vm1, %v6823_v23, %v6868_v20  ;;  %v4006_v49 = vpack.c.bf16 %v3942_v31, %v3941_v15  ;;  %v3214_v48 = vsel %vm3191_vm4, %v6842_v46, %v6887_v34  ;;  %v12036_v15 = vld [vmem:[#allocation84_spill] sm:$0xff] }
 0x32c   : > { %4718 = vmatpush1.bf16.msra.mxu0 %v12027_v38  ;;  %4847 = vmatpush1.bf16.msra.mxu1 %v12030_v55  ;;  %v3208_v19 = vsel %vm3191_vm4, %v6897_v0, %v6902_v6  ;;  %v3209_v37 = vsel %vm3191_vm4, %v6898_v21, %v6903_v1  ;;  %v4005_v38 = vpack.c.bf16 %v3944_v30, %v3943_v59 }
 0x32d   : > { %4797 = vmatprep.subr.bf16.mxu0 %v3285_v25  ;;  %v10714_v63 = vpop.permute.xlu0 %6925  ;;  %v10725_v42 = vpop.permute.xlu1 %6910  ;;  %v3291_v45 = vpack.c.bf16 %v3209_v37, %v3208_v19  ;;  %v3212_v55 = vsel %vm3191_vm4, %v6887_v34, %v6892_v28  ;;  %v3213_v19 = vsel %vm3191_vm4, %v6888_v41, %v6893_v35  ;;  %v12033_v37 = vld [vmem:[#allocation86_spill] sm:$0xff]  ;;  %v6907_v28 = vunpack.i.l.bf16 %v10648_v10 }
 0x32e   : > { %v6913_v18 = vunpack.i.h.bf16 %v10725_v42  ;;  %v6912_v24 = vunpack.i.l.bf16 %v10725_v42  ;;  %v3215_v35 = vsel %vm3191_vm4, %v6843_v53, %v6888_v41  ;;  %v3289_v62 = vpack.c.bf16 %v3213_v19, %v3212_v55  ;;  %v12040_v55 = vld [vmem:[#allocation37_spill] sm:$0xff] }
 0x32f   : > { %5936 = vmatmul.mubr.msk.bf16.vlgmr.msra.gmra.mrb[52].mxu0 %vm1796_vm3, %v10738_v50  ;;  %5939 = vmatmul.mubr.msk.bf16.vlgmr.msra.gmra.mrb[56].mxu1 %vm1796_vm3, %v10738_v50 }
 0x330   : > { %4798 = vmatpush1.bf16.msra.mxu0 %v3284_v61  ;;  %4926 = vmatprep.subr.bf16.mxu1 %v3291_v45  ;;  %v3572_v33 = vsel %vm3552_vm5, %v6913_v18, %v6918_v56  ;;  %v3571_v47 = vsel %vm3552_vm5, %v6912_v24, %v6917_v14  ;;  %v12034_v61 = vld [vmem:[#allocation85_spill] sm:$0xff]  ;;  %v6908_v45 = vunpack.i.h.bf16 %v10648_v10  ;;  %v3573_v27 = vsel %vm3552_vm5, %v6907_v28, %v6912_v24 }
 0x331   : > { %4799 = vmatprep.subr.bf16.mxu0 %v3646_v16  ;;  %v6936_v21 = vpop.permute.xlu0 %6935  ;;  %4927 = vmatpush1.bf16.msra.mxu1 %v3290_v17  ;;  %v10758_v0 = vpop.permute.xlu1 %6920  ;;  %v3651_v29 = vpack.c.bf16 %v3572_v33, %v3571_v47  ;;  %v12035_v20 = vpack.c.bf16 %v12033_v37, %v12034_v61  ;;  %v12037_v17 = vld [vmem:[#allocation83_spill] sm:$0xff]  ;;  %v6927_v24 = vunpack.i.l.bf16 %v10714_v63 }
 0x332   : > { %4829 = vmatprep.mubr.bf16.mxu0 %v11690_v9  ;;  %v6923_v32 = vunpack.i.h.bf16 %v10758_v0  ;;  %v6922_v25 = vunpack.i.l.bf16 %v10758_v0  ;;  %4958 = vmatprep.mubr.bf16.mxu1 %v11690_v9  ;;  %v6938_v43 = vunpack.i.h.bf16 %v6936_v21  ;;  %v6937_v58 = vunpack.i.l.bf16 %v6936_v21 }
 0x333   : > { %v12038_v31 = vpack.c.bf16 %v12036_v15, %v12037_v17  ;;  %v3574_v53 = vsel %vm3552_vm5, %v6908_v45, %v6913_v18  ;;  %v3576_v33 = vsel %vm3552_vm5, %v6863_v39, %v6908_v45  ;;  %v3935_v39 = vsel %vm983_vm1, %v6882_v40, %v6927_v24  ;;  %v12043_v45 = vld [vmem:[#allocation36_spill] sm:$0xff] }
 0x334   : > { %4800 = vmatpush1.bf16.msra.mxu0 %v3645_v8  ;;  %v3569_v23 = vsel %vm3552_vm5, %v6917_v14, %v6922_v25  ;;  %v3570_v11 = vsel %vm3552_vm5, %v6918_v56, %v6923_v32  ;;  %v3288_v56 = vpack.c.bf16 %v3215_v35, %v3214_v48  ;;  %v6928_v14 = vunpack.i.h.bf16 %v10714_v63 }
 0x335   : > { %4801 = vmatprep.subr.bf16.mxu0 %v4006_v49  ;;  %v10773_v2 = vpop.permute.xlu0 %6945  ;;  %v6931_v22 = vpop.permute.xlu1 %6930  ;;  %v3652_v54 = vpack.c.bf16 %v3570_v11, %v3569_v23  ;;  %v3575_v49 = vsel %vm3552_vm5, %v6862_v12, %v6907_v28  ;;  %v3650_v34 = vpack.c.bf16 %v3574_v53, %v3573_v27 }
 0x336   : > { %v6933_v52 = vunpack.i.h.bf16 %v6931_v22  ;;  %v6932_v7 = vunpack.i.l.bf16 %v6931_v22 }
 0x337   : > { %4928 = vmatprep.subr.bf16.mxu1 %v3652_v54 }
 0x338   : > { %4802 = vmatpush1.bf16.msra.mxu0 %v4005_v38  ;;  %4929 = vmatpush1.bf16.msra.mxu1 %v3651_v29  ;;  %v3932_v16 = vsel %vm983_vm1, %v6933_v52, %v6938_v43  ;;  %v3931_v10 = vsel %vm983_vm1, %v6932_v7, %v6937_v58  ;;  %v3933_v63 = vsel %vm983_vm1, %v6927_v24, %v6932_v7  ;;  %v12039_v29 = vld [vmem:[#allocation39_spill] sm:$0xff] }
 0x339   : > { %4803 = vmatprep.subr.bf16.mxu0 %v12035_v20  ;;  %v6956_v42 = vpop.permute.xlu0 %6955  ;;  %v10801_v51 = vpop.permute.xlu1 %6940  ;;  %v4011_v47 = vpack.c.bf16 %v3932_v16, %v3931_v10  ;;  %v3934_v12 = vsel %vm983_vm1, %v6928_v14, %v6933_v52  ;;  %v3649_v38 = vpack.c.bf16 %v3576_v33, %v3575_v49  ;;  %v12041_v19 = vpack.c.bf16 %v12039_v29, %v12040_v55 }
 0x33a   : > { %v6943_v46 = vunpack.i.h.bf16 %v10801_v51  ;;  %v6942_v26 = vunpack.i.l.bf16 %v10801_v51  ;;  %v6958_v41 = vunpack.i.h.bf16 %v6956_v42  ;;  %v6957_v22 = vunpack.i.l.bf16 %v6956_v42 }
 0x33b   : > { %v3936_v52 = vsel %vm983_vm1, %v6883_v5, %v6928_v14  ;;  %v4010_v40 = vpack.c.bf16 %v3934_v12, %v3933_v63  ;;  %v6948_v20 = vunpack.i.h.bf16 %v10773_v2  ;;  %v6947_v42 = vunpack.i.l.bf16 %v10773_v2 }
 0x33c   : > { %4804 = vmatpush1.bf16.msra.mxu0 %v12038_v31  ;;  %v3929_v8 = vsel %vm983_vm1, %v6937_v58, %v6942_v26  ;;  %v3930_v59 = vsel %vm983_vm1, %v6938_v43, %v6943_v46  ;;  %v12044_v5 = vpack.c.bf16 %v12042_v60, %v12043_v45  ;;  %v4009_v35 = vpack.c.bf16 %v3936_v52, %v3935_v39 }
 0x33d   : > { %4883 = vmatprep.subr.bf16.mxu0 %v3289_v62  ;;  %v10820_v21 = vpop.permute.xlu0 %6965  ;;  %v6951_v30 = vpop.permute.xlu1 %6950  ;;  %v4012_v18 = vpack.c.bf16 %v3930_v59, %v3929_v8  ;;  %v3206_v27 = vsel %vm3191_vm4, %v6902_v6, %v6947_v42  ;;  %v3207_v53 = vsel %vm3191_vm4, %v6903_v1, %v6948_v20  ;;  %v12045_v8 = vld [vmem:[#allocation92_spill] sm:$0xff]  ;;  %v12046_v59 = vld [vmem:[#allocation91_spill] sm:$0xff] }
 0x33e   : > { %v6953_v23 = vunpack.i.h.bf16 %v6951_v30  ;;  %v6952_v11 = vunpack.i.l.bf16 %v6951_v30  ;;  %v6968_v24 = vunpack.i.h.bf16 %v10820_v21  ;;  %v6967_v30 = vunpack.i.l.bf16 %v10820_v21  ;;  %v12049_v21 = vld [vmem:[#allocation89_spill] sm:$0xff] }
 0x33f   : > { %5938 = vmatmul.mubr.msk.bf16.vlgmr.msra.gmra.mrb[56].mxu0 %vm1796_vm3, %v10738_v50  ;;  %4930 = vmatprep.subr.bf16.mxu1 %v4012_v18 }
 0x340   : > { %4884 = vmatpush1.bf16.msra.mxu0 %v3288_v56  ;;  %4931 = vmatpush1.bf16.msra.mxu1 %v4011_v47  ;;  %v3203_v37 = vsel %vm3191_vm4, %v6953_v23, %v6958_v41  ;;  %v3202_v61 = vsel %vm3191_vm4, %v6952_v11, %v6957_v22  ;;  %v3204_v17 = vsel %vm3191_vm4, %v6947_v42, %v6952_v11 }
 0x341   : > { %4885 = vmatprep.subr.bf16.mxu0 %v3650_v34  ;;  %v6976_v44 = vpop.permute.xlu0 %6975  ;;  %v10850_v54 = vpop.permute.xlu1 %6960  ;;  %4932 = vmatprep.subr.bf16.mxu1 %v12041_v19  ;;  %v3294_v16 = vpack.c.bf16 %v3203_v37, %v3202_v61  ;;  %v3205_v31 = vsel %vm3191_vm4, %v6948_v20, %v6953_v23  ;;  %v12047_v56 = vpack.c.bf16 %v12045_v8, %v12046_v59  ;;  %v12048_v23 = vld [vmem:[#allocation90_spill] sm:$0xff] }
 0x342   : > { %4915 = vmatprep.mubr.bf16.mxu0 %v11690_v9  ;;  %v6963_v7 = vunpack.i.h.bf16 %v10850_v54  ;;  %v6962_v48 = vunpack.i.l.bf16 %v10850_v54  ;;  %v6978_v18 = vunpack.i.h.bf16 %v6976_v44  ;;  %v6977_v49 = vunpack.i.l.bf16 %v6976_v44 }
 0x343   : > { %v3293_v6 = vpack.c.bf16 %v3205_v31, %v3204_v17  ;;  %v12050_v11 = vpack.c.bf16 %v12048_v23, %v12049_v21  ;;  %v3292_v44 = vpack.c.bf16 %v3207_v53, %v3206_v27  ;;  %v3567_v29 = vsel %vm3552_vm5, %v6922_v25, %v6967_v30 }
 0x344   : > { %4886 = vmatpush1.bf16.msra.mxu0 %v3649_v38  ;;  %4933 = vmatpush1.bf16.msra.mxu1 %v12044_v5  ;;  %v3200_v43 = vsel %vm3191_vm4, %v6957_v22, %v6962_v48  ;;  %v3201_v58 = vsel %vm3191_vm4, %v6958_v41, %v6963_v7  ;;  %v3568_v55 = vsel %vm3552_vm5, %v6923_v32, %v6968_v24 }
 0x345   : > { %4887 = vmatprep.subr.bf16.mxu0 %v4010_v40  ;;  %v10871_v28 = vpop.permute.xlu0 %6985  ;;  %v6971_v62 = vpop.permute.xlu1 %6970  ;;  %v3295_v2 = vpack.c.bf16 %v3201_v58, %v3200_v43  ;;  %v3653_v60 = vpack.c.bf16 %v3568_v55, %v3567_v29  ;;  %v12059_v55 = vld [vmem:[#allocation96_spill] sm:$0xff] }
 0x346   : > { %v6973_v10 = vunpack.i.h.bf16 %v6971_v62  ;;  %v6972_v15 = vunpack.i.l.bf16 %v6971_v62  ;;  %v6987_v38 = vunpack.i.l.bf16 %v10871_v28  ;;  %v6988_v19 = vunpack.i.h.bf16 %v10871_v28 }
 0x347   : > { %5941 = vmatmul.mubr.msk.bf16.vlgmr.msra.gmra.mrb[60].mxu1 %vm1796_vm3, %v10738_v50  ;;  %5012 = vmatprep.subr.bf16.mxu1 %v3295_v2 }
 0x348   : > { %4888 = vmatpush1.bf16.msra.mxu0 %v4009_v35  ;;  %5013 = vmatpush1.bf16.msra.mxu1 %v3294_v16  ;;  %v3564_v47 = vsel %vm3552_vm5, %v6973_v10, %v6978_v18  ;;  %v3563_v34 = vsel %vm3552_vm5, %v6972_v15, %v6977_v49  ;;  %v3565_v63 = vsel %vm3552_vm5, %v6967_v30, %v6972_v15 }
 0x349   : > { %4889 = vmatprep.subr.bf16.mxu0 %v12047_v56  ;;  %v6996_v14 = vpop.permute.xlu0 %6995  ;;  %v10900_v33 = vpop.permute.xlu1 %6980  ;;  %5044 = vmatprep.mubr.bf16.mxu1 %v11690_v9  ;;  %v3566_v12 = vsel %vm3552_vm5, %v6968_v24, %v6973_v10  ;;  %v3655_v37 = vpack.c.bf16 %v3564_v47, %v3563_v34  ;;  %v3927_v0 = vsel %vm983_vm1, %v6942_v26, %v6987_v38  ;;  %v12051_v47 = vld [vmem:[#allocation98_spill] sm:$0xff]  ;;  %v12052_v34 = vld [vmem:[#allocation97_spill] sm:$0xff] }
 0x34a   : > { %v6983_v3 = vunpack.i.h.bf16 %v10900_v33  ;;  %v6982_v1 = vunpack.i.l.bf16 %v10900_v33  ;;  %v3654_v42 = vpack.c.bf16 %v3566_v12, %v3565_v63  ;;  %v3928_v25 = vsel %vm983_vm1, %v6943_v46, %v6988_v19  ;;  %v12056_v12 = vld [vmem:[#allocation45_spill] sm:$0xff] }
 0x34b   : > { %v6998_v45 = vunpack.i.h.bf16 %v6996_v14  ;;  %v6997_v5 = vunpack.i.l.bf16 %v6996_v14  ;;  %v4013_v53 = vpack.c.bf16 %v3928_v25, %v3927_v0  ;;  %v12053_v23 = vpack.c.bf16 %v12051_v47, %v12052_v34 }
 0x34c   : > { %4890 = vmatpush1.bf16.msra.mxu0 %v12050_v11  ;;  %v3561_v41 = vsel %vm3552_vm5, %v6977_v49, %v6982_v1  ;;  %v3562_v22 = vsel %vm3552_vm5, %v6978_v18, %v6983_v3  ;;  %v12055_v11 = vunpack.i.h.bf16 %v10058_v36 }
 0x34d   : > { %4969 = vmatprep.subr.bf16.mxu0 %v3293_v6  ;;  %v10917_v39 = vpop.permute.xlu0 %7005  ;;  %v6991_v52 = vpop.permute.xlu1 %6990  ;;  %v3656_v40 = vpack.c.bf16 %v3562_v22, %v3561_v41 }
 0x34e   : > { %v6993_v61 = vunpack.i.h.bf16 %v6991_v52  ;;  %v6992_v20 = vunpack.i.l.bf16 %v6991_v52  ;;  %v7007_v58 = vunpack.i.l.bf16 %v10917_v39  ;;  %v7008_v46 = vunpack.i.h.bf16 %v10917_v39 }
 0x34f   : > { %5940 = vmatmul.mubr.msk.bf16.vlgmr.msra.gmra.mrb[60].mxu0 %vm1796_vm3, %v10738_v50  ;;  %5014 = vmatprep.subr.bf16.mxu1 %v3656_v40 }
 0x350   : > { %4970 = vmatpush1.bf16.msra.mxu0 %v3292_v44  ;;  %5015 = vmatpush1.bf16.msra.mxu1 %v3655_v37  ;;  %v3925_v43 = vsel %vm983_vm1, %v6987_v38, %v6992_v20  ;;  %v3926_v51 = vsel %vm983_vm1, %v6988_v19, %v6993_v61  ;;  %v3924_v62 = vsel %vm983_vm1, %v6993_v61, %v6998_v45  ;;  %v12057_v44 = vld [vmem:[#allocation43_spill] sm:$0xff] }
 0x351   : > { %4971 = vmatprep.subr.bf16.mxu0 %v3654_v42  ;;  %v7011_v32 = vpop.permute.xlu0 %7010  ;;  %v10946_v28 = vpop.permute.xlu1 %7000  ;;  %5001 = vmatprep.mubr.bf16.mxu0 %v11690_v9  ;;  %v3923_v2 = vsel %vm983_vm1, %v6992_v20, %v6997_v5  ;;  %v4014_v16 = vpack.c.bf16 %v3926_v51, %v3925_v43  ;;  %v3198_v56 = vsel %vm3191_vm4, %v6962_v48, %v7007_v58  ;;  %v12054_v48 = vunpack.i.l.bf16 %v10058_v36  ;;  %v12060_v19 = vld [vmem:[#allocation95_spill] sm:$0xff]  ;;  %v12063_v42 = vld [vmem:[#allocation42_spill] sm:$0xff] }
 0x352   : > { %v7003_v26 = vunpack.i.h.bf16 %v10946_v28  ;;  %v7002_v35 = vunpack.i.l.bf16 %v10946_v28  ;;  %v7013_v10 = vunpack.i.h.bf16 %v7011_v32  ;;  %v7012_v15 = vunpack.i.l.bf16 %v7011_v32 }
 0x353   : > { %v4015_v14 = vpack.c.bf16 %v3924_v62, %v3923_v2  ;;  %v3199_v24 = vsel %vm3191_vm4, %v6963_v7, %v7008_v46  ;;  %v12058_v38 = vpack.c.bf16 %v12056_v12, %v12057_v44  ;;  %v12061_v52 = vpack.c.bf16 %v12059_v55, %v12060_v19  ;;  %v12073_v12 = vld [vmem:[#allocation53_spill] sm:$0xff] }
 0x354   : > { %4972 = vmatpush1.bf16.msra.mxu0 %v3653_v60  ;;  %v3921_v31 = vsel %vm983_vm1, %v6997_v5, %v7002_v35  ;;  %v3922_v27 = vsel %vm983_vm1, %v6998_v45, %v7003_v26  ;;  %v3192_v54 = vsel %vm3191_vm4, %v7012_v15, %v12054_v48  ;;  %v3193_v7 = vsel %vm3191_vm4, %v7013_v10, %v12055_v11  ;;  %v12070_v11 = vld [vmem:[#allocation103_spill] sm:$0xff] }
 0x355   : > { %v7031_v17 = vpop.permute.xlu0 %7030  ;;  %4973 = vmatprep.subr.bf16.mxu0 %v4014_v16  ;;  %v7016_v8 = vpop.permute.xlu1 %7015  ;;  %v4016_v59 = vpack.c.bf16 %v3922_v27, %v3921_v31  ;;  %v3296_v39 = vpack.c.bf16 %v3199_v24, %v3198_v56  ;;  %v3299_v40 = vpack.c.bf16 %v3193_v7, %v3192_v54  ;;  %v12066_v31 = vunpack.i.h.bf16 %v10152_v57  ;;  %v12069_v54 = vld [vmem:[#allocation104_spill] sm:$0xff] }
 0x356   : > { %v7032_v30 = vunpack.i.l.bf16 %v7031_v17  ;;  %v7018_v18 = vunpack.i.h.bf16 %v7016_v8  ;;  %v7017_v49 = vunpack.i.l.bf16 %v7016_v8  ;;  %v7033_v6 = vunpack.i.h.bf16 %v7031_v17 }
 0x357   : > { %5016 = vmatprep.subr.bf16.mxu1 %v4016_v59  ;;  %v12067_v8 = vunpack.i.l.bf16 %v10029_v13  ;;  %v12071_v7 = vpack.c.bf16 %v12069_v54, %v12070_v11 }
 0x358   : > { %4974 = vmatpush1.bf16.msra.mxu0 %v4013_v53  ;;  %5017 = vmatpush1.bf16.msra.mxu1 %v4015_v14  ;;  %v3559_v29 = vsel %vm3552_vm5, %v6982_v1, %v7017_v49  ;;  %v3560_v36 = vsel %vm3552_vm5, %v6983_v3, %v7018_v18  ;;  %v3557_v37 = vsel %vm3552_vm5, %v7017_v49, %v7032_v30  ;;  %v12062_v1 = vld [vmem:[#allocation44_spill] sm:$0xff]  ;;  %v12068_v14 = vunpack.i.h.bf16 %v10029_v13 }
 0x359   : > { %4975 = vmatprep.subr.bf16.mxu0 %v12053_v23  ;;  %v7036_v21 = vpop.permute.xlu0 %7035  ;;  %v7021_v63 = vpop.permute.xlu1 %7020  ;;  %5018 = vmatprep.subr.bf16.mxu1 %v12058_v38  ;;  %v12064_v33 = vpack.c.bf16 %v12062_v1, %v12063_v42  ;;  %v3558_v0 = vsel %vm3552_vm5, %v7018_v18, %v7033_v6  ;;  %v12075_v38 = vld [vmem:[#allocation102_spill] sm:$0xff] }
 0x35a   : > { %v7023_v41 = vunpack.i.h.bf16 %v7021_v63  ;;  %v7022_v22 = vunpack.i.l.bf16 %v7021_v63  ;;  %v7038_v51 = vunpack.i.h.bf16 %v7036_v21  ;;  %v12072_v63 = vld [vmem:[#allocation55_spill] sm:$0xff] }
 0x35b   : > { %v12074_v44 = vpack.c.bf16 %v12072_v63, %v12073_v12 }
 0x35c   : > { %4976 = vmatpush1.bf16.msra.mxu0 %v12061_v52  ;;  %v3195_v61 = vsel %vm3191_vm4, %v7023_v41, %v7013_v10  ;;  %v3194_v20 = vsel %vm3191_vm4, %v7022_v22, %v7012_v15  ;;  %5019 = vmatpush1.bf16.msra.mxu1 %v12064_v33  ;;  %v3196_v3 = vsel %vm3191_vm4, %v7007_v58, %v7022_v22  ;;  %v7037_v10 = vunpack.i.l.bf16 %v7036_v21  ;;  %v12079_v22 = vld [vmem:[#allocation52_spill] sm:$0xff] }
 0x35d   : > { %v7046_v60 = vpop.permute.xlu0 %7045  ;;  %v3298_v32 = vpack.c.bf16 %v3195_v61, %v3194_v20  ;;  %v7026_v5 = vpop.permute.xlu1 %7025  ;;  %5098 = vmatprep.subr.bf16.mxu1 %v3299_v40  ;;  %v3197_v43 = vsel %vm3191_vm4, %v7008_v46, %v7023_v41  ;;  %v3658_v58 = vpack.c.bf16 %v3558_v0, %v3557_v37  ;;  %v12065_v15 = vunpack.i.l.bf16 %v10152_v57  ;;  %v12078_v41 = vld [vmem:[#allocation54_spill] sm:$0xff] }
 0x35e   : > { %v7048_v25 = vunpack.i.h.bf16 %v7046_v60  ;;  %v7047_v45 = vunpack.i.l.bf16 %v7046_v60  ;;  %v7028_v62 = vunpack.i.h.bf16 %v7026_v5  ;;  %v7027_v2 = vunpack.i.l.bf16 %v7026_v5 }
 0x35f   : > { %5942 = vmatmul.mubr.msk.bf16.vlgmr.msra.gmra.mrb[64].mxu0 %vm1796_vm3, %v10738_v50  ;;  %v3297_v16 = vpack.c.bf16 %v3197_v43, %v3196_v3  ;;  %5943 = vmatmul.mubr.msk.bf16.vlgmr.msra.gmra.mrb[64].mxu1 %vm1796_vm3, %v10738_v50  ;;  %v3919_v47 = vsel %vm983_vm1, %v7002_v35, %v7037_v10  ;;  %v3920_v13 = vsel %vm983_vm1, %v7003_v26, %v7038_v51 }
 0x360   : > { %v3913_v17 = vsel %vm983_vm1, %v7047_v45, %v12065_v15  ;;  %v3914_v46 = vsel %vm983_vm1, %v7048_v25, %v12066_v31  ;;  %5087 = vmatprep.mubr.bf16.mxu0 %v11690_v9  ;;  %v3556_v27 = vsel %vm3552_vm5, %v7033_v6, %v7028_v62  ;;  %v3555_v53 = vsel %vm3552_vm5, %v7032_v30, %v7027_v2  ;;  %v12081_v15 = vld [vmem:[#allocation46_spill] sm:$0xff]  ;;  %v12082_v31 = vld [vmem:[#allocation47_spill] sm:$0xff] }
 0x361   : > { %5055 = vmatprep.subr.bf16.mxu0 %v3297_v16  ;;  %5099 = vmatpush1.bf16.msra.mxu1 %v3298_v32  ;;  %v3553_v59 = vsel %vm3552_vm5, %v7027_v2, %v12067_v8  ;;  %v3659_v56 = vpack.c.bf16 %v3556_v27, %v3555_v53  ;;  %v7041_v57 = vpop.permute.xlu1 %7040  ;;  %v3554_v24 = vsel %vm3552_vm5, %v7028_v62, %v12068_v14  ;;  %v11096_v62 = vld [vmem:[%s11359_s4] sm:$0xff] }
 0x362   : > { %5056 = vmatpush1.bf16.msra.mxu0 %v3296_v39  ;;  %5130 = vmatprep.mubr.bf16.mxu1 %v11690_v9  ;;  %v7043_v18 = vunpack.i.h.bf16 %v7041_v57  ;;  %v7042_v49 = vunpack.i.l.bf16 %v7041_v57  ;;  %v3660_v30 = vpack.c.bf16 %v3554_v24, %v3553_v59  ;;  %v3657_v6 = vpack.c.bf16 %v3560_v36, %v3559_v29  ;;  %v12083_v14 = vld [vmem:[#allocation14_spill] sm:$0xff] }
 0x363   : > { %5057 = vmatprep.subr.bf16.mxu0 %v3658_v58  ;;  %v4020_v34 = vpack.c.bf16 %v3914_v46, %v3913_v17  ;;  %v4017_v26 = vpack.c.bf16 %v3920_v13, %v3919_v47  ;;  %v12077_v39 = vpack.c.bf16 %v12075_v38, %v12076_v4  ;;  %v12080_v29 = vpack.c.bf16 %v12078_v41, %v12079_v22 }
 0x364   : > { %v3916_v23 = vsel %vm983_vm1, %v7043_v18, %v7048_v25  ;;  %v3915_v9 = vsel %vm983_vm1, %v7042_v49, %v7047_v45  ;;  %5100 = vmatprep.subr.bf16.mxu1 %v3660_v30  ;;  %v3917_v21 = vsel %vm983_vm1, %v7037_v10, %v7042_v49  ;;  %v3918_v48 = vsel %vm983_vm1, %v7038_v51, %v7043_v18  ;;  %v12084_v18 = vld [vmem:[#allocation48_spill] sm:$0xff] }
 0x365   : > { %v4019_v35 = vpack.c.bf16 %v3916_v23, %v3915_v9  ;;  %5101 = vmatpush1.bf16.msra.mxu1 %v3659_v56  ;;  %v4018_v28 = vpack.c.bf16 %v3918_v48, %v3917_v21  ;;  %v5442_v17 = vrot.slane %v11096_v62, %v12081_v15  ;;  %v5446_v46 = vrot.slane %v11096_v62, %v12082_v31  ;;  %v12087_v21 = vld [vmem:[#allocation15_spill] sm:$0xff] }
 0x366   : > { %5058 = vmatpush1.bf16.msra.mxu0 %v3657_v6  ;;  %5102 = vmatprep.subr.bf16.mxu1 %v4020_v34  ;;  %v5450_v24 = vrot.slane %v11096_v62, %v12083_v14  ;;  %v12085_v6 = vld [vmem:[#allocation16_spill] sm:$0xff]  ;;  %v12086_v34 = vld [vmem:[#allocation49_spill] sm:$0xff]  ;;  %v5454_v48 = vrot.slane %v11096_v62, %v12087_v21 }
 0x367   : > { %5059 = vmatprep.subr.bf16.mxu0 %v4018_v28 }
 0x369   : > { %5103 = vmatpush1.bf16.msra.mxu1 %v4019_v35 }
 0x36a   : > { %5060 = vmatpush1.bf16.msra.mxu0 %v4017_v26  ;;  %5104 = vmatprep.subr.bf16.mxu1 %v12074_v44  ;;  %v12088_v26 = vld [vmem:[#allocation17_spill] sm:$0xff] }
 0x36b   : > { %5061 = vmatprep.subr.bf16.mxu0 %v12071_v7 }
 0x36d   : > { %5105 = vmatpush1.bf16.msra.mxu1 %v12080_v29  ;;  %v11088_v0 = vpop.permute.xlu0 %4356 }
 0x36e   : > { %5062 = vmatpush1.bf16.msra.mxu0 %v12077_v39 }
 0x370   : > { %5945 = vmatmul.mubr.msk.bf16.vlgmr.msra.gmra.mrb[68].mxu1 %vm1796_vm3, %v10738_v50 }
 0x371   : > { %5944 = vmatmul.mubr.msk.bf16.vlgmr.msra.gmra.mrb[68].mxu0 %vm1796_vm3, %v10738_v50 }
 0x372   : > { %v11085_v3 = vpop.permute.xlu1 %4351 }
 0x382   : > { %v4444_v36 = vpop.f32.mrb[36].mxu1 }
 0x383   : > { %v4446_v55 = vpop.f32.mrb[37].mxu1  ;;  %v4445_v50 = vadd.f32 %v4444_v36, %v11085_v3 }
 0x384   : > { %v4448_v19 = vpop.f32.mrb[38].mxu1  ;;  %v4447_v32 = vadd.f32 %v4446_v55, %v11085_v3 }
 0x385   : > { %v4450_v52 = vpop.f32.mrb[39].mxu1  ;;  %v4449_v25 = vadd.f32 %v4448_v19, %v11088_v0  ;;  %v5143_v51 = vmax.f32 %v4445_v50, 0.0 }
 0x386   : > { %v4451_v2 = vadd.f32 %v4450_v52, %v11088_v0  ;;  %v5144_v8 = vmax.f32 %v4447_v32, 0.0 }
 0x387   : > { %v5179_v59 = vmax.f32 %v4449_v25, 0.0  ;;  %v5215_v47 = vmul.f32 %v5143_v51, %v12085_v6 }
 0x388   : > { %v5180_v13 = vmax.f32 %v4451_v2, 0.0  ;;  %v5216_v54 = vmul.f32 %v5144_v8, %v12088_v26 }
 0x389   : > { %v5251_v11 = vmul.f32 %v5179_v59, %v12085_v6  ;;  %v5621_v44 = vmul.f32 %v5450_v24, %v5215_v47  ;;  %v12091_v6 = vld [vmem:[#allocation58_spill] sm:$0xff] }
 0x38a   : > { %v5252_v38 = vmul.f32 %v5180_v13, %v12088_v26  ;;  %v5622_v41 = vmul.f32 %v5454_v48, %v5216_v54 }
 0x38b   : > { %v5657_v22 = vmul.f32 %v5450_v24, %v5251_v11 }
 0x38c   : > { %v5658_v55 = vmul.f32 %v5454_v48, %v5252_v38 }
 0x39b   : > { %v4530_v40 = vpop.f32.mrb[40].mxu1 }
 0x39c   : > { %v4532_v37 = vpop.f32.mrb[41].mxu1  ;;  %v4531_v50 = vadd.f32 %v4530_v40, %v11085_v3 }
 0x39d   : > { %v4534_v61 = vpop.f32.mrb[42].mxu1  ;;  %v4533_v32 = vadd.f32 %v4532_v37, %v11085_v3 }
 0x39e   : > { %v11075_v20 = vpop.f32.mrb[43].mxu1  ;;  %v5147_v40 = vmax.f32 %v4531_v50, 0.0 }
 0x39f   : > { %v4537_v37 = vadd.f32 %v11075_v20, %v11088_v0  ;;  %v5148_v59 = vmax.f32 %v4533_v32, 0.0  ;;  %v12092_v20 = vld [vmem:[#allocation18_spill] sm:$0xff] }
 0x3a1   : > { %v5184_v26 = vmax.f32 %v4537_v37, 0.0 }
 0x3b3   : > { %v11077_v1 = vpop.f32.mrb[44].mxu1 }
 0x3b4   : > { %v11079_v42 = vpop.f32.mrb[45].mxu1 }
 0x3b5   : > { %v11081_v33 = vpop.f32.mrb[46].mxu1 }
 0x3b6   : > { %v11083_v60 = vpop.f32.mrb[47].mxu1 }
 0x3c2   : > { %v4401_v45 = vpop.f32.mrb[36].mxu0 }
 0x3c3   : > { %v4402_v5 = vadd.f32 %v4401_v45, %v11085_v3  ;;  %v4403_v43 = vpop.f32.mrb[37].mxu0 }
 0x3c4   : > { %v4404_v16 = vadd.f32 %v4403_v43, %v11085_v3  ;;  %v4405_v10 = vpop.f32.mrb[38].mxu0 }
 0x3c5   : > { %v5141_v58 = vmax.f32 %v4402_v5, 0.0  ;;  %v4406_v27 = vadd.f32 %v4405_v10, %v11088_v0  ;;  %v4407_v53 = vpop.f32.mrb[39].mxu0  ;;  %v4535_v5 = vadd.f32 %v4534_v61, %v11088_v0 }
 0x3c6   : > { %v5142_v56 = vmax.f32 %v4404_v16, 0.0  ;;  %v4408_v57 = vadd.f32 %v4407_v53, %v11088_v0  ;;  %v12089_v16 = vld [vmem:[#allocation56_spill] sm:$0xff] }
 0x3c7   : > { %v5213_v49 = vmul.f32 %v5141_v58, %v12084_v18  ;;  %v5177_v30 = vmax.f32 %v4406_v27, 0.0  ;;  %v5458_v10 = vrot.slane %v11096_v62, %v12089_v16 }
 0x3c8   : > { %v5214_v23 = vmul.f32 %v5142_v56, %v12086_v34  ;;  %v5178_v9 = vmax.f32 %v4408_v57, 0.0  ;;  %v12090_v57 = vld [vmem:[#allocation57_spill] sm:$0xff] }
 0x3c9   : > { %v5619_v35 = vmul.f32 %v5442_v17, %v5213_v49  ;;  %v5249_v28 = vmul.f32 %v5177_v30, %v12084_v18  ;;  %v5462_v24 = vrot.slane %v11096_v62, %v12090_v57  ;;  %v5183_v30 = vmax.f32 %v4535_v5, 0.0 }
 0x3ca   : > { %v5620_v7 = vmul.f32 %v5446_v46, %v5214_v23  ;;  %v5250_v63 = vmul.f32 %v5178_v9, %v12086_v34  ;;  %v5466_v34 = vrot.slane %v11096_v62, %v12092_v20  ;;  %v12093_v23 = vld [vmem:[#allocation59_spill] sm:$0xff] }
 0x3cb   : > { %v5655_v12 = vmul.f32 %v5442_v17, %v5249_v28 }
 0x3cc   : > { %v5691_v4 = vadd.f32 %v5620_v7, %v5619_v35  ;;  %v5656_v39 = vmul.f32 %v5446_v46, %v5250_v63  ;;  %v12094_v35 = vld [vmem:[#allocation20_spill] sm:$0xff]  ;;  %v12095_v7 = vld [vmem:[#allocation21_spill] sm:$0xff] }
 0x3cd   : > { %v5219_v28 = vmul.f32 %v5147_v40, %v12094_v35  ;;  %v5220_v63 = vmul.f32 %v5148_v59, %v12095_v7 }
 0x3ce   : > { %v5692_v29 = vadd.f32 %v5691_v4, %v5621_v44  ;;  %v5701_v36 = vadd.f32 %v5656_v39, %v5655_v12  ;;  %v12096_v12 = vld [vmem:[#allocation19_spill] sm:$0xff]  ;;  %v5255_v39 = vmul.f32 %v5183_v30, %v12094_v35  ;;  %v12098_v35 = vld [vmem:[#allocation6_spill] sm:$0xff] }
 0x3cf   : > { %v5470_v44 = vrot.slane %v11096_v62, %v12096_v12  ;;  %v4619_v62 = vadd.f32 %v11079_v42, %v11085_v3 }
 0x3d0   : > { %v5702_v19 = vadd.f32 %v5701_v36, %v5657_v22  ;;  %v5693_v52 = vadd.f32 %v5692_v29, %v5622_v41  ;;  %v5625_v36 = vmul.f32 %v5466_v34, %v5219_v28  ;;  %v5661_v5 = vmul.f32 %v5466_v34, %v5255_v39 }
 0x3d1   : > { %v5626_v32 = vmul.f32 %v5470_v44, %v5220_v63 }
 0x3d2   : > { %v4487_v25 = vpop.f32.mrb[40].mxu0  ;;  %v5703_v45 = vadd.f32 %v5702_v19, %v5658_v55  ;;  %v5256_v55 = vmul.f32 %v5184_v26, %v12095_v7 }
 0x3d3   : > { %v4488_v43 = vadd.f32 %v4487_v25, %v11085_v3  ;;  %v4489_v51 = vpop.f32.mrb[41].mxu0  ;;  %v11122_v2 = vpop.f32.mrb[48].mxu1  ;;  %v4617_v25 = vadd.f32 %v11077_v1, %v11085_v3 }
 0x3d4   : > { %v4490_v58 = vadd.f32 %v4489_v51, %v11085_v3  ;;  %v4491_v17 = vpop.f32.mrb[42].mxu0  ;;  %v11127_v46 = vpop.f32.mrb[49].mxu1 }
 0x3d5   : > { %v5145_v27 = vmax.f32 %v4488_v43, 0.0  ;;  %v4492_v61 = vadd.f32 %v4491_v17, %v11088_v0  ;;  %v4493_v53 = vpop.f32.mrb[43].mxu0  ;;  %v11132_v8 = vpop.f32.mrb[50].mxu1  ;;  %v5151_v40 = vmax.f32 %v4617_v25, 0.0 }
 0x3d6   : > { %v5146_v56 = vmax.f32 %v4490_v58, 0.0  ;;  %v4494_v18 = vadd.f32 %v4493_v53, %v11088_v0  ;;  %v11137_v49 = vpop.f32.mrb[51].mxu1  ;;  %v11160_v58 = vld [vmem:[%s11359_s4 + $0x8] sm:$0xff] }
 0x3d7   : > { %v5217_v47 = vmul.f32 %v5145_v27, %v12091_v6  ;;  %v5181_v13 = vmax.f32 %v4492_v61, 0.0  ;;  %v5152_v27 = vmax.f32 %v4619_v62, 0.0  ;;  %v5486_v26 = vrot.slane %v11160_v58, %v12087_v21 }
 0x3d8   : > { %v5218_v9 = vmul.f32 %v5146_v56, %v12093_v23  ;;  %v5182_v48 = vmax.f32 %v4494_v18, 0.0 }
 0x3d9   : > { %v5623_v54 = vmul.f32 %v5458_v10, %v5217_v47  ;;  %v5253_v11 = vmul.f32 %v5181_v13, %v12091_v6  ;;  %v12097_v13 = vld [vmem:[#allocation10_spill] sm:$0xff]  ;;  %v5224_v28 = vmul.f32 %v5152_v27, %v12098_v35 }
 0x3da   : > { %v5624_v38 = vmul.f32 %v5462_v24, %v5218_v9  ;;  %v5254_v4 = vmul.f32 %v5182_v48, %v12093_v23  ;;  %v5223_v34 = vmul.f32 %v5151_v40, %v12097_v13  ;;  %v5478_v9 = vrot.slane %v11160_v58, %v12082_v31 }
 0x3db   : > { %v5694_v41 = vadd.f32 %v5693_v52, %v5623_v54  ;;  %v5659_v22 = vmul.f32 %v5458_v10, %v5253_v11  ;;  %v4621_v52 = vadd.f32 %v11081_v33, %v11088_v0  ;;  %v5662_v10 = vmul.f32 %v5470_v44, %v5256_v55  ;;  %v12099_v54 = vld [vmem:[#allocation63_spill] sm:$0xff]  ;;  %v12100_v44 = vld [vmem:[#allocation64_spill] sm:$0xff] }
 0x3dc   : > { %v5660_v29 = vmul.f32 %v5462_v24, %v5254_v4  ;;  %v5482_v33 = vrot.slane %v11160_v58, %v12083_v14 }
 0x3dd   : > { %v5695_v19 = vadd.f32 %v5694_v41, %v5624_v38  ;;  %v5704_v50 = vadd.f32 %v5703_v45, %v5659_v22  ;;  %v4623_v45 = vadd.f32 %v11083_v60, %v11088_v0  ;;  %v5187_v59 = vmax.f32 %v4621_v52, 0.0 }
 0x3de   : > { %v5474_v60 = vrot.slane %v11160_v58, %v12081_v15 }
 0x3df   : > { %v5705_v43 = vadd.f32 %v5704_v50, %v5660_v29  ;;  %v5696_v51 = vadd.f32 %v5695_v19, %v5625_v36  ;;  %v5188_v18 = vmax.f32 %v4623_v45, 0.0  ;;  %v5259_v63 = vmul.f32 %v5187_v59, %v12097_v13  ;;  %v11187_v19 = vld [vmem:[%s11359_s4 + $0x10] sm:$0xff] }
 0x3e0   : > { %v5629_v29 = vmul.f32 %v5482_v33, %v5223_v34  ;;  %v5630_v50 = vmul.f32 %v5486_v26, %v5224_v28  ;;  %v12102_v13 = vld [vmem:[#allocation23_spill] sm:$0xff] }
 0x3e1   : > { %v5697_v17 = vadd.f32 %v5696_v51, %v5626_v32  ;;  %v5706_v1 = vadd.f32 %v5705_v43, %v5661_v5  ;;  %v5260_v39 = vmul.f32 %v5188_v18, %v12098_v35  ;;  %v5665_v62 = vmul.f32 %v5482_v33, %v5259_v63 }
 0x3e2   : > { %v4573_v37 = vpop.f32.mrb[44].mxu0 }
 0x3e3   : > { %v4574_v42 = vadd.f32 %v4573_v37, %v11085_v3  ;;  %v4575_v61 = vpop.f32.mrb[45].mxu0  ;;  %v5707_v53 = vadd.f32 %v5706_v1, %v5662_v10  ;;  %v5666_v45 = vmul.f32 %v5486_v26, %v5260_v39  ;;  %v5514_v1 = vrot.slane %v11187_v19, %v12083_v14 }
 0x3e4   : > { %v4576_v56 = vadd.f32 %v4575_v61, %v11085_v3  ;;  %v4577_v24 = vpop.f32.mrb[46].mxu0  ;;  %v5490_v26 = vrot.slane %v11160_v58, %v12089_v16 }
 0x3e5   : > { %v5149_v30 = vmax.f32 %v4574_v42, 0.0  ;;  %v4578_v6 = vadd.f32 %v4577_v24, %v11088_v0  ;;  %v4579_v47 = vpop.f32.mrb[47].mxu0  ;;  %v5518_v24 = vrot.slane %v11187_v19, %v12087_v21 }
 0x3e6   : > { %v5150_v23 = vmax.f32 %v4576_v56, 0.0  ;;  %v4580_v48 = vadd.f32 %v4579_v47, %v11088_v0 }
 0x3e7   : > { %v5221_v11 = vmul.f32 %v5149_v30, %v12099_v54  ;;  %v5185_v7 = vmax.f32 %v4578_v6, 0.0  ;;  %v4703_v30 = vadd.f32 %v11122_v2, %v11085_v3  ;;  %v4707_v2 = vadd.f32 %v11132_v8, %v11088_v0 }
 0x3e8   : > { %v5222_v38 = vmul.f32 %v5150_v23, %v12100_v44  ;;  %v5186_v4 = vmax.f32 %v4580_v48, 0.0 }
 0x3e9   : > { %v5627_v41 = vmul.f32 %v5474_v60, %v5221_v11  ;;  %v5257_v22 = vmul.f32 %v5185_v7, %v12099_v54 }
 0x3ea   : > { %v5628_v36 = vmul.f32 %v5478_v9, %v5222_v38  ;;  %v5258_v55 = vmul.f32 %v5186_v4, %v12100_v44  ;;  %v4788_v25 = vpop.f32.mrb[52].mxu1  ;;  %v5155_v44 = vmax.f32 %v4703_v30, 0.0 }
 0x3eb   : > { %v5663_v32 = vmul.f32 %v5474_v60, %v5257_v22  ;;  %v5698_v5 = vadd.f32 %v5697_v17, %v5627_v41  ;;  %v4789_v52 = vadd.f32 %v4788_v25, %v11085_v3  ;;  %v4790_v10 = vpop.f32.mrb[53].mxu1  ;;  %v12101_v60 = vld [vmem:[#allocation22_spill] sm:$0xff] }
 0x3ec   : > { %v5711_v43 = vadd.f32 %v5629_v29, %v5628_v36  ;;  %v5664_v51 = vmul.f32 %v5478_v9, %v5258_v55  ;;  %v4791_v40 = vadd.f32 %v4790_v10, %v11085_v3  ;;  %v4792_v37 = vpop.f32.mrb[54].mxu1  ;;  %v4705_v9 = vadd.f32 %v11127_v46, %v11085_v3  ;;  %v12104_v10 = vld [vmem:[#allocation70_spill] sm:$0xff] }
 0x3ed   : > { %5699 = vadd.xlane.f32.xlu1 %v5698_v5  ;;  %v5708_v27 = vadd.f32 %v5707_v53, %v5663_v32  ;;  %v5159_v61 = vmax.f32 %v4789_v52, 0.0  ;;  %v4793_v59 = vadd.f32 %v4792_v37, %v11088_v0  ;;  %v4794_v17 = vpop.f32.mrb[55].mxu1  ;;  %v4709_v46 = vadd.f32 %v11137_v49, %v11088_v0 }
 0x3ee   : > { %v5721_v42 = vadd.f32 %v5665_v62, %v5664_v51  ;;  %v5712_v33 = vadd.f32 %v5711_v43, %v5630_v50  ;;  %v5160_v56 = vmax.f32 %v4791_v40, 0.0  ;;  %v4795_v18 = vadd.f32 %v4794_v17, %v11088_v0  ;;  %v12103_v62 = vld [vmem:[#allocation69_spill] sm:$0xff]  ;;  %v12105_v40 = vld [vmem:[#allocation12_spill] sm:$0xff] }
 0x3ef   : > { %5709 = vadd.xlane.f32.xlu0 %v5708_v27  ;;  %v5231_v6 = vmul.f32 %v5159_v61, %v12101_v60  ;;  %v5195_v47 = vmax.f32 %v4793_v59, 0.0  ;;  %v5156_v55 = vmax.f32 %v4705_v9, 0.0  ;;  %v5494_v32 = vrot.slane %v11160_v58, %v12090_v57 }
 0x3f0   : > { %v5722_v53 = vadd.f32 %v5721_v42, %v5666_v45  ;;  %v5232_v34 = vmul.f32 %v5160_v56, %v12102_v13  ;;  %v5196_v23 = vmax.f32 %v4795_v18, 0.0  ;;  %v5191_v5 = vmax.f32 %v4707_v2, 0.0 }
 0x3f1   : > { %v5637_v48 = vmul.f32 %v5514_v1, %v5231_v6  ;;  %v5267_v35 = vmul.f32 %v5195_v47, %v12101_v60  ;;  %v5498_v52 = vrot.slane %v11160_v58, %v12092_v20  ;;  %v5227_v37 = vmul.f32 %v5155_v44, %v12105_v40 }
 0x3f2   : > { %v4659_v28 = vpop.f32.mrb[48].mxu0  ;;  %v5638_v54 = vmul.f32 %v5518_v24, %v5232_v34  ;;  %v5268_v11 = vmul.f32 %v5196_v23, %v12102_v13  ;;  %v5192_v27 = vmax.f32 %v4709_v46, 0.0  ;;  %v5502_v59 = vrot.slane %v11160_v58, %v12096_v12 }
 0x3f3   : > { %v4660_v7 = vadd.f32 %v4659_v28, %v11085_v3  ;;  %v4661_v63 = vpop.f32.mrb[49].mxu0  ;;  %v5673_v38 = vmul.f32 %v5514_v1, %v5267_v35  ;;  %v5263_v30 = vmul.f32 %v5191_v5, %v12105_v40  ;;  %v5633_v13 = vmul.f32 %v5498_v52, %v5227_v37 }
 0x3f4   : > { %v4662_v4 = vadd.f32 %v4661_v63, %v11085_v3  ;;  %v4663_v39 = vpop.f32.mrb[50].mxu0  ;;  %v11213_v41 = vadd.f32 %v5638_v54, %v5637_v48  ;;  %v5674_v22 = vmul.f32 %v5518_v24, %v5268_v11  ;;  %v12106_v24 = vld [vmem:[#allocation7_spill] sm:$0xff] }
 0x3f5   : > { %v5153_v29 = vmax.f32 %v4660_v7, 0.0  ;;  %v4664_v8 = vadd.f32 %v4663_v39, %v11088_v0  ;;  %v4665_v36 = vpop.f32.mrb[51].mxu0  ;;  %v5228_v18 = vmul.f32 %v5156_v55, %v12106_v24  ;;  %v5264_v34 = vmul.f32 %v5192_v27, %v12106_v24 }
 0x3f6   : > { %v5154_v50 = vmax.f32 %v4662_v4, 0.0  ;;  %v4666_v25 = vadd.f32 %v4665_v36, %v11088_v0  ;;  %v11219_v49 = vadd.f32 %v5674_v22, %v5673_v38  ;;  %v5669_v35 = vmul.f32 %v5498_v52, %v5263_v30 }
 0x3f7   : > { %v5225_v43 = vmul.f32 %v5153_v29, %v12103_v62  ;;  %v5189_v51 = vmax.f32 %v4664_v8, 0.0  ;;  %v5634_v48 = vmul.f32 %v5502_v59, %v5228_v18  ;;  %v5670_v58 = vmul.f32 %v5502_v59, %v5264_v34 }
 0x3f8   : > { %v5226_v45 = vmul.f32 %v5154_v50, %v12104_v10  ;;  %v5190_v1 = vmax.f32 %v4666_v25, 0.0  ;;  %v5510_v55 = vrot.slane %v11187_v19, %v12082_v31  ;;  %v12107_v25 = vld [vmem:[#allocation75_spill] sm:$0xff] }
 0x3f9   : > { %v5631_v42 = vmul.f32 %v5490_v26, %v5225_v43  ;;  %v5261_v61 = vmul.f32 %v5189_v51, %v12103_v62  ;;  %v12108_v43 = vld [vmem:[#allocation76_spill] sm:$0xff] }
 0x3fa   : > { %v5632_v17 = vmul.f32 %v5494_v32, %v5226_v45  ;;  %v5262_v56 = vmul.f32 %v5190_v1, %v12104_v10 }
 0x3fb   : > { %v5713_v60 = vadd.f32 %v5712_v33, %v5631_v42  ;;  %v5667_v6 = vmul.f32 %v5490_v26, %v5261_v61 }
 0x3fc   : > { %v5668_v47 = vmul.f32 %v5494_v32, %v5262_v56 }
 0x3fd   : > { %v5714_v23 = vadd.f32 %v5713_v60, %v5632_v17  ;;  %v5723_v9 = vadd.f32 %v5722_v53, %v5667_v6  ;;  %v5506_v53 = vrot.slane %v11187_v19, %v12081_v15 }
 0x3ff   : > { %v5715_v28 = vadd.f32 %v5714_v23, %v5633_v13  ;;  %v5724_v2 = vadd.f32 %v5723_v9, %v5668_v47  ;;  %v5522_v47 = vrot.slane %v11187_v19, %v12089_v16 }
 0x401   : > { %v5725_v54 = vadd.f32 %v5724_v2, %v5669_v35  ;;  %v5716_v11 = vadd.f32 %v5715_v28, %v5634_v48 }
 0x402   : > { %v4745_v7 = vpop.f32.mrb[52].mxu0  ;;  %v4874_v46 = vpop.f32.mrb[56].mxu1 }
 0x403   : > { %v4746_v63 = vadd.f32 %v4745_v7, %v11085_v3  ;;  %v4747_v44 = vpop.f32.mrb[53].mxu0  ;;  %v5726_v33 = vadd.f32 %v5725_v54, %v5670_v58  ;;  %v4876_v4 = vpop.f32.mrb[57].mxu1  ;;  %v4875_v56 = vadd.f32 %v4874_v46, %v11085_v3  ;;  %v5526_v58 = vrot.slane %v11187_v19, %v12090_v57 }
 0x404   : > { %v4748_v26 = vadd.f32 %v4747_v44, %v11085_v3  ;;  %v4749_v38 = vpop.f32.mrb[54].mxu0  ;;  %v4878_v8 = vpop.f32.mrb[58].mxu1  ;;  %v4877_v18 = vadd.f32 %v4876_v4, %v11085_v3 }
 0x405   : > { %v5157_v39 = vmax.f32 %v4746_v63, 0.0  ;;  %v4750_v22 = vadd.f32 %v4749_v38, %v11088_v0  ;;  %v4751_v29 = vpop.f32.mrb[55].mxu0  ;;  %v4880_v32 = vpop.f32.mrb[59].mxu1  ;;  %v4879_v30 = vadd.f32 %v4878_v8, %v11088_v0  ;;  %v5163_v23 = vmax.f32 %v4875_v56, 0.0  ;;  %v12109_v63 = vld [vmem:[#allocation81_spill] sm:$0xff] }
 0x406   : > { %v5158_v36 = vmax.f32 %v4748_v26, 0.0  ;;  %v4752_v50 = vadd.f32 %v4751_v29, %v11088_v0  ;;  %v4881_v9 = vadd.f32 %v4880_v32, %v11088_v0  ;;  %v12110_v26 = vld [vmem:[#allocation82_spill] sm:$0xff]  ;;  %v12112_v32 = vld [vmem:[#allocation29_spill] sm:$0xff] }
 0x407   : > { %v5229_v5 = vmul.f32 %v5157_v39, %v12107_v25  ;;  %v5193_v62 = vmax.f32 %v4750_v22, 0.0  ;;  %v5199_v7 = vmax.f32 %v4879_v30, 0.0  ;;  %v12111_v39 = vld [vmem:[#allocation28_spill] sm:$0xff] }
 0x408   : > { %v5230_v51 = vmul.f32 %v5158_v36, %v12108_v43  ;;  %v5194_v52 = vmax.f32 %v4752_v50, 0.0  ;;  %v5200_v22 = vmax.f32 %v4881_v9, 0.0  ;;  %v5534_v36 = vrot.slane %v11187_v19, %v12096_v12 }
 0x409   : > { %v5635_v10 = vmul.f32 %v5506_v53, %v5229_v5  ;;  %v5265_v45 = vmul.f32 %v5193_v62, %v12107_v25  ;;  %v5271_v5 = vmul.f32 %v5199_v7, %v12111_v39 }
 0x40a   : > { %v5636_v1 = vmul.f32 %v5510_v55, %v5230_v51  ;;  %v5266_v40 = vmul.f32 %v5194_v52, %v12108_v43 }
 0x40b   : > { %v5671_v37 = vmul.f32 %v5506_v53, %v5265_v45  ;;  %v5717_v27 = vadd.f32 %v5716_v11, %v5635_v10  ;;  %v5164_v11 = vmax.f32 %v4877_v18, 0.0  ;;  %v5235_v53 = vmul.f32 %v5163_v23, %v12111_v39 }
 0x40c   : > { %v5672_v42 = vmul.f32 %v5510_v55, %v5266_v40 }
 0x40d   : > { %v5718_v61 = vadd.f32 %v5717_v27, %v5636_v1  ;;  %v5727_v59 = vadd.f32 %v5726_v33, %v5671_v37  ;;  %v5530_v33 = vrot.slane %v11187_v19, %v12092_v20  ;;  %v5236_v25 = vmul.f32 %v5164_v11, %v12112_v32 }
 0x40e   : > { %v5272_v1 = vmul.f32 %v5200_v22, %v12112_v32 }
 0x40f   : > { %5719 = vadd.xlane.f32.xlu0 %v5718_v61  ;;  %v5728_v17 = vadd.f32 %v5727_v59, %v5672_v42  ;;  %v5641_v45 = vmul.f32 %v5530_v33, %v5235_v53  ;;  %v5642_v42 = vmul.f32 %v5534_v36, %v5236_v25  ;;  %v5677_v61 = vmul.f32 %v5530_v33, %v5271_v5  ;;  %v12114_v33 = vld [vmem:[#allocation88_spill] sm:$0xff] }
 0x410   : > { %v5678_v56 = vmul.f32 %v5534_v36, %v5272_v1 }
 0x411   : > { %5729 = vadd.xlane.f32.xlu1 %v5728_v17 }
 0x412   : > { %v4831_v24 = vpop.f32.mrb[56].mxu0 }
 0x413   : > { %v4832_v60 = vadd.f32 %v4831_v24, %v11085_v3  ;;  %v4833_v6 = vpop.f32.mrb[57].mxu0 }
 0x414   : > { %v4834_v13 = vadd.f32 %v4833_v6, %v11085_v3  ;;  %v4835_v34 = vpop.f32.mrb[58].mxu0 }
 0x415   : > { %v5161_v48 = vmax.f32 %v4832_v60, 0.0  ;;  %v4836_v35 = vadd.f32 %v4835_v34, %v11088_v0  ;;  %v4837_v28 = vpop.f32.mrb[59].mxu0 }
 0x416   : > { %v5162_v2 = vmax.f32 %v4834_v13, 0.0  ;;  %v4838_v54 = vadd.f32 %v4837_v28, %v11088_v0 }
 0x417   : > { %v5233_v44 = vmul.f32 %v5161_v48, %v12109_v63  ;;  %v5197_v46 = vmax.f32 %v4836_v35, 0.0 }
 0x418   : > { %v5234_v38 = vmul.f32 %v5162_v2, %v12110_v26  ;;  %v5198_v4 = vmax.f32 %v4838_v54, 0.0 }
 0x419   : > { %v5639_v29 = vmul.f32 %v5522_v47, %v5233_v44  ;;  %v5269_v8 = vmul.f32 %v5197_v46, %v12109_v63  ;;  %v12113_v63 = vld [vmem:[#allocation87_spill] sm:$0xff] }
 0x41a   : > { %v5640_v55 = vmul.f32 %v5526_v58, %v5234_v38  ;;  %v5270_v50 = vmul.f32 %v5198_v4, %v12110_v26  ;;  %v4960_v51 = vpop.f32.mrb[60].mxu1  ;;  %v12115_v4 = vld [vmem:[#allocation34_spill] sm:$0xff] }
 0x41b   : > { %v5732_v62 = vadd.f32 %v11213_v41, %v5639_v29  ;;  %v5675_v43 = vmul.f32 %v5522_v47, %v5269_v8  ;;  %v4962_v10 = vpop.f32.mrb[61].mxu1  ;;  %v4961_v41 = vadd.f32 %v4960_v51, %v11085_v3 }
 0x41c   : > { %v5676_v52 = vmul.f32 %v5526_v58, %v5270_v50  ;;  %v4964_v19 = vpop.f32.mrb[62].mxu1  ;;  %v4963_v25 = vadd.f32 %v4962_v10, %v11085_v3 }
 0x41d   : > { %v5733_v40 = vadd.f32 %v5732_v62, %v5640_v55  ;;  %v5742_v37 = vadd.f32 %v11219_v49, %v5675_v43  ;;  %v4966_v27 = vpop.f32.mrb[63].mxu1  ;;  %v4965_v60 = vadd.f32 %v4964_v19, %v11088_v0  ;;  %v11277_v49 = vld [vmem:[%s11359_s4 + $0x18] sm:$0xff]  ;;  %v5167_v9 = vmax.f32 %v4961_v41, 0.0  ;;  %v12116_v41 = vld [vmem:[#allocation35_spill] sm:$0xff] }
 0x41e   : > { %v5538_v35 = vrot.slane %v11277_v49, %v12081_v15  ;;  %v5542_v54 = vrot.slane %v11277_v49, %v12082_v31  ;;  %v5546_v53 = vrot.slane %v11277_v49, %v12083_v14  ;;  %v4967_v43 = vadd.f32 %v4966_v27, %v11088_v0 }
 0x41f   : > { %v5734_v59 = vadd.f32 %v5733_v40, %v5641_v45  ;;  %v5743_v17 = vadd.f32 %v5742_v37, %v5676_v52  ;;  %v5203_v7 = vmax.f32 %v4965_v60, 0.0  ;;  %v5239_v39 = vmul.f32 %v5167_v9, %v12115_v4 }
 0x420   : > { %v5168_v37 = vmax.f32 %v4963_v25, 0.0  ;;  %v5204_v19 = vmax.f32 %v4967_v43, 0.0  ;;  %v5554_v10 = vrot.slane %v11277_v49, %v12089_v16  ;;  %v5558_v27 = vrot.slane %v11277_v49, %v12090_v57 }
 0x421   : > { %v5744_v24 = vadd.f32 %v5743_v17, %v5677_v61  ;;  %v5735_v18 = vadd.f32 %v5734_v59, %v5642_v42  ;;  %v5275_v55 = vmul.f32 %v5203_v7, %v12115_v4  ;;  %v5645_v62 = vmul.f32 %v5546_v53, %v5239_v39 }
 0x422   : > { %v4917_v30 = vpop.f32.mrb[60].mxu0  ;;  %v5550_v59 = vrot.slane %v11277_v49, %v12087_v21 }
 0x423   : > { %v4918_v6 = vadd.f32 %v4917_v30, %v11085_v3  ;;  %v4919_v47 = vpop.f32.mrb[61].mxu0  ;;  %v5745_v13 = vadd.f32 %v5744_v24, %v5678_v56  ;;  %v5681_v45 = vmul.f32 %v5546_v53, %v5275_v55  ;;  %v12119_v53 = vld [vmem:[#allocation40_spill] sm:$0xff] }
 0x424   : > { %v4920_v34 = vadd.f32 %v4919_v47, %v11085_v3  ;;  %v4921_v23 = vpop.f32.mrb[62].mxu0 }
 0x425   : > { %v5165_v48 = vmax.f32 %v4918_v6, 0.0  ;;  %v4922_v28 = vadd.f32 %v4921_v23, %v11088_v0  ;;  %v4923_v2 = vpop.f32.mrb[63].mxu0  ;;  %v5562_v6 = vrot.slane %v11277_v49, %v12092_v20 }
 0x426   : > { %v5166_v58 = vmax.f32 %v4920_v34, 0.0  ;;  %v4924_v11 = vadd.f32 %v4923_v2, %v11088_v0  ;;  %v5276_v34 = vmul.f32 %v5204_v19, %v12116_v41 }
 0x427   : > { %v5237_v44 = vmul.f32 %v5165_v48, %v12113_v63  ;;  %v5201_v46 = vmax.f32 %v4922_v28, 0.0 }
 0x428   : > { %v5238_v26 = vmul.f32 %v5166_v58, %v12114_v33  ;;  %v5202_v38 = vmax.f32 %v4924_v11, 0.0  ;;  %v12117_v11 = vld [vmem:[#allocation93_spill] sm:$0xff] }
 0x429   : > { %v5643_v22 = vmul.f32 %v5538_v35, %v5237_v44  ;;  %v5273_v29 = vmul.f32 %v5201_v46, %v12113_v63 }
 0x42a   : > { %v5644_v8 = vmul.f32 %v5542_v54, %v5238_v26  ;;  %v5274_v36 = vmul.f32 %v5202_v38, %v12114_v33  ;;  %v12118_v33 = vld [vmem:[#allocation94_spill] sm:$0xff] }
 0x42b   : > { %v5736_v50 = vadd.f32 %v5735_v18, %v5643_v22  ;;  %v5679_v32 = vmul.f32 %v5538_v35, %v5273_v29  ;;  %v5240_v18 = vmul.f32 %v5168_v37, %v12116_v41 }
 0x42c   : > { %v5680_v5 = vmul.f32 %v5542_v54, %v5274_v36  ;;  %v5682_v36 = vmul.f32 %v5550_v59, %v5276_v34 }
 0x42d   : > { %v5746_v51 = vadd.f32 %v5745_v13, %v5679_v32  ;;  %v5737_v52 = vadd.f32 %v5736_v50, %v5644_v8  ;;  %v5646_v46 = vmul.f32 %v5550_v59, %v5240_v18  ;;  %v5566_v50 = vrot.slane %v11277_v49, %v12096_v12 }
 0x42f   : > { %v5738_v1 = vadd.f32 %v5737_v52, %v5645_v62  ;;  %v5747_v40 = vadd.f32 %v5746_v51, %v5680_v5  ;;  %v12120_v62 = vld [vmem:[#allocation41_spill] sm:$0xff] }
 0x431   : > { %5739 = vadd.xlane.f32.xlu0 %v5738_v1  ;;  %v5748_v42 = vadd.f32 %v5747_v40, %v5681_v45 }
 0x432   : > { %v5003_v61 = vpop.f32.mrb[64].mxu0  ;;  %v5046_v24 = vpop.f32.mrb[64].mxu1 }
 0x433   : > { %v5004_v17 = vadd.f32 %v5003_v61, %v11085_v3  ;;  %v5005_v56 = vpop.f32.mrb[65].mxu0  ;;  %5749 = vadd.xlane.f32.xlu1 %v5748_v42  ;;  %v5047_v60 = vadd.f32 %v5046_v24, %v11085_v3  ;;  %v5048_v13 = vpop.f32.mrb[65].mxu1 }
 0x434   : > { %v5006_v30 = vadd.f32 %v5005_v56, %v11085_v3  ;;  %v5007_v47 = vpop.f32.mrb[66].mxu0  ;;  %v5049_v57 = vadd.f32 %v5048_v13, %v11085_v3  ;;  %v5050_v48 = vpop.f32.mrb[66].mxu1 }
 0x435   : > { %v5169_v16 = vmax.f32 %v5004_v17, 0.0  ;;  %v5008_v23 = vadd.f32 %v5007_v47, %v11088_v0  ;;  %v5009_v9 = vpop.f32.mrb[67].mxu0  ;;  %v5171_v28 = vmax.f32 %v5047_v60, 0.0  ;;  %v5051_v58 = vadd.f32 %v5050_v48, %v11088_v0  ;;  %v5052_v54 = vpop.f32.mrb[67].mxu1 }
 0x436   : > { %v5170_v35 = vmax.f32 %v5006_v30, 0.0  ;;  %v5010_v2 = vadd.f32 %v5009_v9, %v11088_v0  ;;  %v5172_v63 = vmax.f32 %v5049_v57, 0.0  ;;  %v5053_v44 = vadd.f32 %v5052_v54, %v11088_v0 }
 0x437   : > { %v5241_v20 = vmul.f32 %v5169_v16, %v12117_v11  ;;  %v5205_v7 = vmax.f32 %v5008_v23, 0.0  ;;  %v5207_v4 = vmax.f32 %v5051_v58, 0.0  ;;  %v5243_v22 = vmul.f32 %v5171_v28, %v12119_v53 }
 0x438   : > { %v5242_v26 = vmul.f32 %v5170_v35, %v12118_v33  ;;  %v5206_v38 = vmax.f32 %v5010_v2, 0.0  ;;  %v5208_v8 = vmax.f32 %v5053_v44, 0.0  ;;  %v5244_v43 = vmul.f32 %v5172_v63, %v12120_v62 }
 0x439   : > { %v5647_v39 = vmul.f32 %v5554_v10, %v5241_v20  ;;  %v5277_v29 = vmul.f32 %v5205_v7, %v12117_v11  ;;  %v5279_v51 = vmul.f32 %v5207_v4, %v12119_v53  ;;  %v5649_v1 = vmul.f32 %v5562_v6, %v5243_v22  ;;  %v12121_v11 = vld [vmem:[#allocation99_spill] sm:$0xff]  ;;  %v12123_v4 = vld [vmem:[#allocation50_spill] sm:$0xff] }
 0x43a   : > { %v5648_v55 = vmul.f32 %v5558_v27, %v5242_v26  ;;  %v5278_v32 = vmul.f32 %v5206_v38, %v12118_v33  ;;  %v5280_v37 = vmul.f32 %v5208_v8, %v12120_v62  ;;  %v5650_v42 = vmul.f32 %v5566_v50, %v5244_v43 }
 0x43b   : > { %v5751_v25 = vadd.f32 %v5647_v39, %v5646_v46  ;;  %v5683_v5 = vmul.f32 %v5554_v10, %v5277_v29  ;;  %v5685_v59 = vmul.f32 %v5562_v6, %v5279_v51  ;;  %v5433_v10 = vld [vmem:[%s11359_s4 + $0x20] sm:$0xf]  ;;  %v12122_v46 = vld [vmem:[#allocation100_spill] sm:$0xff] }
 0x43c   : > { %v5684_v52 = vmul.f32 %v5558_v27, %v5278_v32  ;;  %v5686_v49 = vmul.f32 %v5566_v50, %v5280_v37  ;;  %v5570_v47 = vrot.slane %v5433_v10, %v12081_v15  ;;  %v5574_v58 = vrot.slane %v5433_v10, %v12082_v31 }
 0x43d   : > { %v5752_v45 = vadd.f32 %v5751_v25, %v5648_v55  ;;  %v5761_v40 = vadd.f32 %v5683_v5, %v5682_v36  ;;  %v5578_v44 = vrot.slane %v5433_v10, %v12083_v14  ;;  %v5582_v29 = vrot.slane %v5433_v10, %v12087_v21  ;;  %v12124_v36 = vld [vmem:[#allocation51_spill] sm:$0xff] }
 0x43f   : > { %v5753_v19 = vadd.f32 %v5752_v45, %v5649_v1  ;;  %v5762_v61 = vadd.f32 %v5761_v40, %v5684_v52 }
 0x441   : > { %v5754_v17 = vadd.f32 %v5753_v19, %v5650_v42  ;;  %v5763_v12 = vadd.f32 %v5762_v61, %v5685_v59  ;;  %v5946_v42 = vld [vmem:[#allocation5] ss:$0 sm:$0xff] }
 0x443   : > { %v5764_v56 = vadd.f32 %v5763_v12, %v5686_v49  ;;  %v5132_v41 = vpop.f32.mrb[68].mxu1 }
 0x444   : > { %v5089_v24 = vpop.f32.mrb[68].mxu0  ;;  %v5133_v18 = vadd.f32 %v5132_v41, %v11085_v3  ;;  %v5134_v60 = vpop.f32.mrb[69].mxu1 }
 0x445   : > { %v5090_v27 = vadd.f32 %v5089_v24, %v11085_v3  ;;  %v5091_v30 = vpop.f32.mrb[69].mxu0  ;;  %v5135_v13 = vadd.f32 %v5134_v60, %v11085_v3  ;;  %v5136_v16 = vpop.f32.mrb[70].mxu1 }
 0x446   : > { %v5092_v6 = vadd.f32 %v5091_v30, %v11085_v3  ;;  %v5093_v34 = vpop.f32.mrb[70].mxu0  ;;  %v5175_v57 = vmax.f32 %v5133_v18, 0.0  ;;  %v5137_v48 = vadd.f32 %v5136_v16, %v11088_v0  ;;  %v5138_v28 = vpop.f32.mrb[71].mxu1 }
 0x447   : > { %v5173_v23 = vmax.f32 %v5090_v27, 0.0  ;;  %v5094_v9 = vadd.f32 %v5093_v34, %v11088_v0  ;;  %v5095_v35 = vpop.f32.mrb[71].mxu0  ;;  %v5139_v15 = vadd.f32 %v5138_v28, %v11088_v0  ;;  %v5176_v3 = vmax.f32 %v5135_v13, 0.0 }
 0x448   : > { %v5174_v2 = vmax.f32 %v5092_v6, 0.0  ;;  %v5096_v54 = vadd.f32 %v5095_v35, %v11088_v0  ;;  %v5211_v63 = vmax.f32 %v5137_v48, 0.0  ;;  %v5247_v39 = vmul.f32 %v5175_v57, %v12123_v4 }
 0x449   : > { %v5245_v20 = vmul.f32 %v5173_v23, %v12121_v11  ;;  %v5209_v7 = vmax.f32 %v5094_v9, 0.0  ;;  %v5212_v31 = vmax.f32 %v5139_v15, 0.0  ;;  %v5248_v55 = vmul.f32 %v5176_v3, %v12124_v36 }
 0x44a   : > { %v5246_v33 = vmul.f32 %v5174_v2, %v12122_v46  ;;  %v5210_v26 = vmax.f32 %v5096_v54, 0.0  ;;  %v5283_v14 = vmul.f32 %v5211_v63, %v12123_v4  ;;  %v5653_v25 = vmul.f32 %v5578_v44, %v5247_v39 }
 0x44b   : > { %v5651_v38 = vmul.f32 %v5570_v47, %v5245_v20  ;;  %v5281_v53 = vmul.f32 %v5209_v7, %v12121_v11  ;;  %v5284_v43 = vmul.f32 %v5212_v31, %v12124_v36  ;;  %v5654_v51 = vmul.f32 %v5582_v29, %v5248_v55 }
 0x44c   : > { %v5652_v22 = vmul.f32 %v5574_v58, %v5246_v33  ;;  %v5282_v0 = vmul.f32 %v5210_v26, %v12122_v46  ;;  %v5689_v52 = vmul.f32 %v5578_v44, %v5283_v14 }
 0x44d   : > { %v5755_v8 = vadd.f32 %v5754_v17, %v5651_v38  ;;  %v5687_v50 = vmul.f32 %v5570_v47, %v5281_v53  ;;  %v5690_v21 = vmul.f32 %v5582_v29, %v5284_v43 }
 0x44e   : > { %v5688_v32 = vmul.f32 %v5574_v58, %v5282_v0 }
 0x44f   : > { %v5756_v5 = vadd.f32 %v5755_v8, %v5652_v22  ;;  %v5765_v62 = vadd.f32 %v5764_v56, %v5687_v50 }
 0x451   : > { %v5766_v45 = vadd.f32 %v5765_v62, %v5688_v32  ;;  %v5757_v1 = vadd.f32 %v5756_v5, %v5653_v25 }
 0x453   : > { %v5758_v40 = vadd.f32 %v5757_v1, %v5654_v51  ;;  %v5767_v37 = vadd.f32 %v5766_v45, %v5689_v52 }
 0x455   : > { %5759 = vadd.xlane.f32.xlu0 %v5758_v40  ;;  %v5768_v19 = vadd.f32 %v5767_v37, %v5690_v21 }
 0x457   : > { %5769 = vadd.xlane.f32.xlu1 %v5768_v19 }
 0x46b   : > { %5787 = vperm.xlu0 %6507, %v5946_v42  }
 0x47a   : > { %v5700_v59 = vpop.xlane.xlu1 %5699 }
 0x47c   : > { %v5710_v61 = vpop.xlane.xlu0 %5709 }
 0x49c   : > { %v5720_v17 = vpop.xlane.xlu0 %5719 }
 0x49d   : > { %v5772_v41 = vsel %vm5771_vm6, %v5700_v59, %v5720_v17 }
 0x49e   : > { %v5730_v12 = vpop.xlane.xlu1 %5729 }
 0x49f   : > { %v5773_v27 = vsel %vm5771_vm6, %v5710_v61, %v5730_v12 }
 0x4be   : > { %v5740_v49 = vpop.xlane.xlu0 %5739 }
 0x4bf   : > { %v5775_v18 = vsel %vm5774_vm7, %v5772_v41, %v5740_v49 }
 0x4c0   : > { %v5750_v56 = vpop.xlane.xlu1 %5749 }
 0x4c1   : > { %v5776_v30 = vsel %vm5774_vm7, %v5773_v27, %v5750_v56 }
 0x4e2   : > { %v5760_v10 = vpop.xlane.xlu0 %5759 }
 0x4e3   : > { %v5778_v47 = vsel %vm5777_vm8, %v5775_v18, %v5760_v10 }
 0x4e4   : > { %v5770_v24 = vpop.xlane.xlu1 %5769 }
 0x4e5   : > { %v5779_v6 = vsel %vm5777_vm8, %v5776_v30, %v5770_v24 }
 0x4ea   : > { %v5788_v60 = vpop.permute.xlu0 %5787 }
 0x4eb   : > { %v5790_v13 = vadd.f32 %v5788_v60, %v5778_v47  ;;  %v5791_v34 = vadd.f32 %v5788_v60, %v5779_v6 }
 0x4ed   : > { %5793 = vst.msk [vmem:[%s258_s27] sm:$0xff] %vm5792_vm9, %v5790_v13  ;;  %5794 = vst.msk [vmem:[%s258_s27 + $0x8] sm:$0xff] %vm5792_vm9, %v5791_v34 }
 0x4ee PF: > { %s18_s23 = sadd.s32 1, %s7103_s23  }
 0x4ef   : > { %p15_p5 = scmp.ge.s32.totalorder %s18_s23, 4  }
 0x4f1   :  { %17 = sbr.rel (!%p15_p5) target bundleno = 3 (0x3), region = 77 }

</bundles_post_ra>
